<compile_context>
chip_gen: v7x
topology: tpu7x:2x2x1
jax: 0.10.0
libtpu: 0.0.40
codegen_flags: <defaults>
</compile_context>

<pallas_src>
import functools

import jax
import jax.numpy as jnp
from jax.experimental import pallas as pl
from jax.experimental.pallas import tpu as pltpu


# ----------------------------------------------------------------------------
# Fused kernel: [1x1 + BN + ReLU] -> [3x3 + BN + ReLU] -> concat([x, y])
# ----------------------------------------------------------------------------
def _make_kernel(H, W, c_in, c_inner, c_out, bottleneck, b_tile):
    HW = H * W

    def kernel(*refs):
        if bottleneck:
            x_ref, w1_ref, b1_ref, w2_ref, b2_ref, o_ref, yp_ref = refs
        else:
            x_ref, w2_ref, b2_ref, o_ref, yp_ref = refs

        # ---- zero ONLY the 1-pixel halo, once per grid step -----------------
        # (interior is fully overwritten for every image below; do NOT gate
        #  this on program_id==0 -- scratch is per-core under "parallel").
        zrow = jnp.zeros((1, W + 2, c_inner), jnp.bfloat16)
        zcol = jnp.zeros((H + 2, 1, c_inner), jnp.bfloat16)
        yp_ref[pl.ds(0, 1), :, :] = zrow
        yp_ref[pl.ds(H + 1, 1), :, :] = zrow
        yp_ref[:, pl.ds(0, 1), :] = zcol
        yp_ref[:, pl.ds(W + 1, 1), :] = zcol

        if bottleneck:
            w1 = w1_ref[...]            # (Cin, Cinner) bf16
            b1 = b1_ref[...]            # (1, Cinner)   f32
        b2 = b2_ref[...]                # (1, Cout)     f32

        for b in range(b_tile):         # static unroll: amortize step overhead
            x_chw = x_ref[b]                                        # (Cin, HW)
            x_hwc = jnp.transpose(x_chw).astype(jnp.bfloat16)       # (HW, Cin)

            # ---- stage 1: 1x1 conv (BN folded) + ReLU; bf16 in / f32 acc ----
            if bottleneck:
                y1 = jnp.dot(x_hwc, w1, preferred_element_type=jnp.float32)
                y1 = jnp.maximum(y1 + b1, 0.0).astype(jnp.bfloat16)  # (HW, Cinner)
            else:
                y1 = x_hwc                                           # (HW, Cin)

            # interior of the padded scratch fully overwritten per image
            yp_ref[pl.ds(1, H), pl.ds(1, W), :] = y1.reshape(H, W, c_inner)

            # ---- stage 2: 3x3 conv = 9 accumulated MXU matmuls (no im2col) --
            acc = None
            for t in range(9):                                       # static
                ky, kx = divmod(t, 3)
                tap = yp_ref[pl.ds(ky, H), pl.ds(kx, W), :].reshape(HW, c_inner)
                w_t = w2_ref[pl.ds(t * c_inner, c_inner), :]         # (Cinner, Cout)
                contrib = jnp.dot(tap, w_t, preferred_element_type=jnp.float32)
                acc = contrib if acc is None else acc + contrib
            y2 = jnp.maximum(acc + b2, 0.0)                          # (HW, Cout) f32

            # ---- fused concat: two direct, lane-dense sub-stores ------------
            o_ref[b, pl.ds(0, c_in), :] = x_chw.astype(o_ref.dtype)
            o_ref[b, pl.ds(c_in, c_out), :] = jnp.transpose(y2).astype(o_ref.dtype)

    return kernel


# ----------------------------------------------------------------------------
# Wrapper
# ----------------------------------------------------------------------------
def _pick_batch_tile(n, hw, c_in, c_out, itemsize):
    """Largest divisor of n (<=8) whose blocks stay small, while keeping >=2
    grid steps so both v7x TensorCores get work when possible."""
    budget = 4 << 20
    for cand in (8, 4, 2):
        if n % cand:
            continue
        if cand * hw * (2 * c_in + c_out) * itemsize > budget:
            continue
        if n // cand < 2:
            continue
        return cand
    return 1


def conv_normal_forward(params, x):
    """x: NCHW (or a list whose first element is NCHW). Returns NCHW."""
    if isinstance(x, (list, tuple)):
        x = x[0]
    n, c_in, h, w = x.shape
    bottleneck = params["bottleneck"]
    c_out = params["b2"].shape[1]
    c_inner = params["w1"].shape[1] if bottleneck else c_in
    hw = h * w
    itemsize = x.dtype.itemsize

    x3 = x.reshape(n, c_in, hw)                  # pure reshape: NO transpose pass

    bt = _pick_batch_tile(n, hw, c_in, c_out, itemsize)
    kernel = _make_kernel(h, w, c_in, c_inner, c_out, bottleneck, bt)

    if bottleneck:
        ops = (x3, params["w1"], params["b1"], params["w2"], params["b2"])
        in_specs = [
            pl.BlockSpec((bt, c_in, hw), lambda i: (i, 0, 0)),
            pl.BlockSpec((c_in, c_inner), lambda i: (0, 0)),
            pl.BlockSpec((1, c_inner), lambda i: (0, 0)),
            pl.BlockSpec((9 * c_inner, c_out), lambda i: (0, 0)),
            pl.BlockSpec((1, c_out), lambda i: (0, 0)),
        ]
    else:
        ops = (x3, params["w2"], params["b2"])
        in_specs = [
            pl.BlockSpec((bt, c_in, hw), lambda i: (i, 0, 0)),
            pl.BlockSpec((9 * c_inner, c_out), lambda i: (0, 0)),
            pl.BlockSpec((1, c_out), lambda i: (0, 0)),
        ]

    # Advisory cost + explicit VMEM budget (keeps v7x's 64 MiB happy).
    flops = 2 * n * hw * 9 * c_inner * c_out
    if bottleneck:
        flops += 2 * n * hw * c_in * c_inner
    w_bytes = (9 * c_inner * c_out * 2
               + (c_in * c_inner * 2 if bottleneck else 0)
               + 4 * (c_inner + c_out))
    bytes_accessed = n * hw * (2 * c_in + c_out) * itemsize + w_bytes
    blk_bytes = bt * hw * (2 * c_in + c_out) * itemsize
    scratch_bytes = (h + 2) * (w + 2) * c_inner * 2
    vmem_limit = int(min(
        100 * 2**20,
        max(16 * 2**20, 6 * (2 * (blk_bytes + w_bytes) + scratch_bytes))))

    out3 = pl.pallas_call(
        kernel,
        out_shape=jax.ShapeDtypeStruct((n, c_in + c_out, hw), x.dtype),
        grid=(n // bt,),
        in_specs=in_specs,
        out_specs=pl.BlockSpec((bt, c_in + c_out, hw), lambda i: (i, 0, 0)),
        scratch_shapes=[pltpu.VMEM((h + 2, w + 2, c_inner), jnp.bfloat16)],
        compiler_params=pltpu.CompilerParams(
            dimension_semantics=("parallel",),
            vmem_limit_bytes=vmem_limit),
        cost_estimate=pl.CostEstimate(
            flops=flops, transcendentals=0, bytes_accessed=bytes_accessed),
    )(*ops)

    return out3.reshape(n, c_in + c_out, h, w)   # pure reshape: still NCHW


# ----------------------------------------------------------------------------
# Parameter init (deterministic, matches ConvNormal.__init__ shapes).
# BN (eval) scale is folded into the conv weights; only the bias survives.
# Matmul weights are stored in bf16 (halves weight DMA / VMEM).
# ----------------------------------------------------------------------------
def _fold_bn(gamma, beta, mean, var, eps=1e-5):
    scale = gamma / jnp.sqrt(var + eps)
    bias = beta - mean * scale
    return scale, bias


def init_conv_normal_params(key, n_in, n_out, bottleneck, bn_width):
    ks = jax.random.split(key, 10)
    params = {"bottleneck": bottleneck}
    n_inner = n_in
    if bottleneck:
        n_inner = min(n_inner, bn_width * n_out)
        # Conv2d(nIn, nInner, 1, bias=False) weight: OIHW (nInner, nIn, 1, 1)
        w1 = jax.random.normal(ks[0], (n_inner, n_in, 1, 1), jnp.float32) * 0.2
        g1 = jax.random.uniform(ks[1], (n_inner,), jnp.float32, 0.5, 1.5)
        be1 = jax.random.normal(ks[2], (n_inner,), jnp.float32) * 0.1
        m1 = jax.random.normal(ks[3], (n_inner,), jnp.float32) * 0.1
        v1 = jax.random.uniform(ks[4], (n_inner,), jnp.float32, 0.5, 1.5)
        s1, b1 = _fold_bn(g1, be1, m1, v1)
        w1_folded = jnp.transpose(w1[:, :, 0, 0], (1, 0)) * s1[None, :]  # (Cin, Cinner)
        params["w1"] = w1_folded.astype(jnp.bfloat16)
        params["b1"] = b1.reshape(1, -1)                                 # (1, Cinner) f32
    # Conv2d(nInner, nOut, 3, stride=1, pad=1, bias=False): OIHW (nOut, nInner, 3, 3)
    w2 = jax.random.normal(ks[5], (n_out, n_inner, 3, 3), jnp.float32) * 0.2
    g2 = jax.random.uniform(ks[6], (n_out,), jnp.float32, 0.5, 1.5)
    be2 = jax.random.normal(ks[7], (n_out,), jnp.float32) * 0.1
    m2 = jax.random.normal(ks[8], (n_out,), jnp.float32) * 0.1
    v2 = jax.random.uniform(ks[9], (n_out,), jnp.float32, 0.5, 1.5)
    s2, b2 = _fold_bn(g2, be2, m2, v2)
    w2_hwio = jnp.transpose(w2, (2, 3, 1, 0)) * s2[None, None, None, :]  # (3,3,Cinner,Cout)
    params["w2_hwio"] = w2_hwio.astype(jnp.bfloat16)       # for the XLA reference
    params["w2"] = params["w2_hwio"].reshape(9 * n_inner, n_out)  # rows (ky, kx, ci)
    params["b2"] = b2.reshape(1, -1)                        # (1, Cout) f32
    return params


# ----------------------------------------------------------------------------
# Pure-JAX reference (no Pallas), quantized at the same points (bf16 matmul
# inputs, f32 accumulation/epilogues) for tight correctness checking.
# ----------------------------------------------------------------------------
def _reference_forward(params, x):
    if isinstance(x, (list, tuple)):
        x = x[0]
    x_nhwc = jnp.transpose(x, (0, 2, 3, 1))
    if params["bottleneck"]:
        y = jnp.einsum("nhwc,cd->nhwd", x_nhwc.astype(jnp.bfloat16), params["w1"],
                       preferred_element_type=jnp.float32)
        y = jnp.maximum(y + params["b1"].reshape(-1), 0.0).astype(jnp.bfloat16)
    else:
        y = x_nhwc.astype(jnp.bfloat16)
    y = jax.lax.conv_general_dilated(
        y, params["w2_hwio"], window_strides=(1, 1), padding="SAME",
        dimension_numbers=("NHWC", "HWIO", "NHWC"),
        preferred_element_type=jnp.float32)
    y = jnp.maximum(y + params["b2"].reshape(-1), 0.0)
    out = jnp.concatenate([x_nhwc, y.astype(x.dtype)], axis=-1)
    return jnp.transpose(out, (0, 3, 1, 2))


if __name__ == "__main__":
    N, H, W = 2, 16, 16
    nIn, nOut, bnWidth = 4, 8, 4

    key = jax.random.PRNGKey(0)
    k_param, k_param2, k_x = jax.random.split(key, 3)
    x = jax.random.normal(k_x, (N, nIn, H, W), jnp.float32)   # NCHW, like PyTorch

    # bottleneck=True (the common MSDNet configuration)
    params = init_conv_normal_params(k_param, nIn, nOut, True, bnWidth)
    out = jax.block_until_ready(
        jax.jit(functools.partial(conv_normal_forward, params))(x))
    assert out.shape == (N, nIn + nOut, H, W), out.shape
    ref = _reference_forward(params, x)
    err = float(jnp.max(jnp.abs(out - ref)))
    assert err < 2e-2, err

    # bottleneck=False path (3x3 directly on x); also exercises the list input
    params_nb = init_conv_normal_params(k_param2, nIn, nOut, False, bnWidth)
    out_nb = jax.block_until_ready(
        jax.jit(functools.partial(conv_normal_forward, params_nb))([x]))
    assert out_nb.shape == (N, nIn + nOut, H, W), out_nb.shape
    ref_nb = _reference_forward(params_nb, x)
    err_nb = float(jnp.max(jnp.abs(out_nb - ref_nb)))
    assert err_nb < 2e-2, err_nb

    print("KERNEL_OK")
</pallas_src>

<mosaic_0001>
module attributes {stable_mosaic.version = 11 : i64} {
  func.func @kernel(%arg0: i32, %arg1: memref<1x4x256xf32, #tpu.memory_space<vmem>>, %arg2: memref<4x4xbf16, #tpu.memory_space<vmem>>, %arg3: memref<1x4xf32, #tpu.memory_space<vmem>>, %arg4: memref<36x8xbf16, #tpu.memory_space<vmem>>, %arg5: memref<1x8xf32, #tpu.memory_space<vmem>>, %arg6: memref<1x12x256xf32, #tpu.memory_space<vmem>>, %arg7: memref<18x18x4xbf16, #tpu.memory_space<vmem>>) attributes {dimension_semantics = [#tpu.dimension_semantics<parallel>], iteration_bounds = array<i64: 2>, scalar_prefetch = 0 : i64, scratch_operands = 1 : i64, tpu.core_type = #tpu.core_type<tc>, window_params = [{transform_indices = @transform_0, window_bounds = array<i64: 1, 4, 256>}, {pipeline_mode = #tpu.pipeline_mode<synchronous>, transform_indices = @transform_1, window_bounds = array<i64: 4, 4>}, {pipeline_mode = #tpu.pipeline_mode<synchronous>, transform_indices = @transform_2, window_bounds = array<i64: 1, 4>}, {pipeline_mode = #tpu.pipeline_mode<synchronous>, transform_indices = @transform_3, window_bounds = array<i64: 36, 8>}, {pipeline_mode = #tpu.pipeline_mode<synchronous>, transform_indices = @transform_4, window_bounds = array<i64: 1, 8>}, {transform_indices = @transform_5, window_bounds = array<i64: 1, 12, 256>}]} {
    %cst = arith.constant 0.000000e+00 : bf16
    %0 = vector.broadcast %cst : bf16 to vector<1x18x4xbf16>
    %cst_0 = arith.constant 0.000000e+00 : bf16
    %1 = vector.broadcast %cst_0 : bf16 to vector<18x1x4xbf16>
    %c0 = arith.constant 0 : index
    %c0_1 = arith.constant 0 : index
    %c0_2 = arith.constant 0 : index
    %2 = vector.load %arg7[%c0, %c0_1, %c0_2] : memref<18x18x4xbf16, #tpu.memory_space<vmem>>, vector<1x18x4xbf16>
    tpu.vector_store %arg7[%c0, %c0_1, %c0_2], %0 {strides = array<i32>} : memref<18x18x4xbf16, #tpu.memory_space<vmem>>, vector<1x18x4xbf16>,
    %c17 = arith.constant 17 : index
    %c0_3 = arith.constant 0 : index
    %c0_4 = arith.constant 0 : index
    %3 = vector.load %arg7[%c17, %c0_3, %c0_4] : memref<18x18x4xbf16, #tpu.memory_space<vmem>>, vector<1x18x4xbf16>
    tpu.vector_store %arg7[%c17, %c0_3, %c0_4], %0 {strides = array<i32>} : memref<18x18x4xbf16, #tpu.memory_space<vmem>>, vector<1x18x4xbf16>,
    %c0_5 = arith.constant 0 : index
    %c0_6 = arith.constant 0 : index
    %c0_7 = arith.constant 0 : index
    %4 = vector.load %arg7[%c0_5, %c0_6, %c0_7] : memref<18x18x4xbf16, #tpu.memory_space<vmem>>, vector<18x1x4xbf16>
    tpu.vector_store %arg7[%c0_5, %c0_6, %c0_7], %1 {strides = array<i32>} : memref<18x18x4xbf16, #tpu.memory_space<vmem>>, vector<18x1x4xbf16>,
    %c0_8 = arith.constant 0 : index
    %c17_9 = arith.constant 17 : index
    %c0_10 = arith.constant 0 : index
    %5 = vector.load %arg7[%c0_8, %c17_9, %c0_10] : memref<18x18x4xbf16, #tpu.memory_space<vmem>>, vector<18x1x4xbf16>
    tpu.vector_store %arg7[%c0_8, %c17_9, %c0_10], %1 {strides = array<i32>} : memref<18x18x4xbf16, #tpu.memory_space<vmem>>, vector<18x1x4xbf16>,
    %c0_11 = arith.constant 0 : index
    %c0_12 = arith.constant 0 : index
    %6 = vector.load %arg2[%c0_11, %c0_12] : memref<4x4xbf16, #tpu.memory_space<vmem>>, vector<4x4xbf16>
    %c0_13 = arith.constant 0 : index
    %c0_14 = arith.constant 0 : index
    %7 = vector.load %arg3[%c0_13, %c0_14] : memref<1x4xf32, #tpu.memory_space<vmem>>, vector<1x4xf32>
    %c0_15 = arith.constant 0 : index
    %c0_16 = arith.constant 0 : index
    %8 = vector.load %arg5[%c0_15, %c0_16] : memref<1x8xf32, #tpu.memory_space<vmem>>, vector<1x8xf32>
    %c0_17 = arith.constant 0 : index
    %c0_18 = arith.constant 0 : index
    %c0_19 = arith.constant 0 : index
    %9 = vector.load %arg1[%c0_17, %c0_18, %c0_19] : memref<1x4x256xf32, #tpu.memory_space<vmem>>, vector<1x4x256xf32>
    %10 = vector.shape_cast %9 : vector<1x4x256xf32> to vector<4x256xf32>
    %11 = tpu.transpose %10, [1, 0] : vector<4x256xf32> -> vector<256x4xf32>
    %12 = arith.truncf %11 : vector<256x4xf32> to vector<256x4xbf16>
    %cst_20 = arith.constant dense<0.000000e+00> : vector<256x4xf32>
    %13 = tpu.matmul %12, %6, %cst_20 {dimension_numbers = #tpu.dot_dimension_numbers<[1], [0], [0], [1], [0, 0, 1, 1], [], []>} : vector<256x4xbf16>, vector<4x4xbf16>, vector<256x4xf32> -> vector<256x4xf32>
    %14 = vector.broadcast %7 : vector<1x4xf32> to vector<256x4xf32>
    %15 = arith.addf %13, %14 : vector<256x4xf32>
    %cst_21 = arith.constant 0.000000e+00 : f32
    %16 = vector.broadcast %cst_21 : f32 to vector<256x4xf32>
    %17 = arith.maximumf %15, %16 : vector<256x4xf32>
    %18 = arith.truncf %17 : vector<256x4xf32> to vector<256x4xbf16>
    %19 = vector.shape_cast %18 : vector<256x4xbf16> to vector<16x16x4xbf16>
    %c1 = arith.constant 1 : index
    %c1_22 = arith.constant 1 : index
    %c0_23 = arith.constant 0 : index
    %20 = vector.load %arg7[%c1, %c1_22, %c0_23] : memref<18x18x4xbf16, #tpu.memory_space<vmem>>, vector<16x16x4xbf16>
    tpu.vector_store %arg7[%c1, %c1_22, %c0_23], %19 {strides = array<i32>} : memref<18x18x4xbf16, #tpu.memory_space<vmem>>, vector<16x16x4xbf16>,
    %c0_24 = arith.constant 0 : index
    %c0_25 = arith.constant 0 : index
    %c0_26 = arith.constant 0 : index
    %21 = vector.load %arg7[%c0_24, %c0_25, %c0_26] : memref<18x18x4xbf16, #tpu.memory_space<vmem>>, vector<16x16x4xbf16>
    %22 = vector.shape_cast %21 : vector<16x16x4xbf16> to vector<256x4xbf16>
    %c0_27 = arith.constant 0 : index
    %c0_28 = arith.constant 0 : index
    %23 = vector.load %arg4[%c0_27, %c0_28] : memref<36x8xbf16, #tpu.memory_space<vmem>>, vector<4x8xbf16>
    %cst_29 = arith.constant dense<0.000000e+00> : vector<256x8xf32>
    %24 = tpu.matmul %22, %23, %cst_29 {dimension_numbers = #tpu.dot_dimension_numbers<[1], [0], [0], [1], [0, 0, 1, 1], [], []>} : vector<256x4xbf16>, vector<4x8xbf16>, vector<256x8xf32> -> vector<256x8xf32>
    %c0_30 = arith.constant 0 : index
    %c1_31 = arith.constant 1 : index
    %c0_32 = arith.constant 0 : index
    %25 = vector.load %arg7[%c0_30, %c1_31, %c0_32] : memref<18x18x4xbf16, #tpu.memory_space<vmem>>, vector<16x16x4xbf16>
    %26 = vector.shape_cast %25 : vector<16x16x4xbf16> to vector<256x4xbf16>
    %c4 = arith.constant 4 : index
    %c0_33 = arith.constant 0 : index
    %27 = vector.load %arg4[%c4, %c0_33] : memref<36x8xbf16, #tpu.memory_space<vmem>>, vector<4x8xbf16>
    %cst_34 = arith.constant dense<0.000000e+00> : vector<256x8xf32>
    %28 = tpu.matmul %26, %27, %cst_34 {dimension_numbers = #tpu.dot_dimension_numbers<[1], [0], [0], [1], [0, 0, 1, 1], [], []>} : vector<256x4xbf16>, vector<4x8xbf16>, vector<256x8xf32> -> vector<256x8xf32>
    %29 = arith.addf %24, %28 : vector<256x8xf32>
    %c0_35 = arith.constant 0 : index
    %c2 = arith.constant 2 : index
    %c0_36 = arith.constant 0 : index
    %30 = vector.load %arg7[%c0_35, %c2, %c0_36] : memref<18x18x4xbf16, #tpu.memory_space<vmem>>, vector<16x16x4xbf16>
    %31 = vector.shape_cast %30 : vector<16x16x4xbf16> to vector<256x4xbf16>
    %c8 = arith.constant 8 : index
    %c0_37 = arith.constant 0 : index
    %32 = vector.load %arg4[%c8, %c0_37] : memref<36x8xbf16, #tpu.memory_space<vmem>>, vector<4x8xbf16>
    %cst_38 = arith.constant dense<0.000000e+00> : vector<256x8xf32>
    %33 = tpu.matmul %31, %32, %cst_38 {dimension_numbers = #tpu.dot_dimension_numbers<[1], [0], [0], [1], [0, 0, 1, 1], [], []>} : vector<256x4xbf16>, vector<4x8xbf16>, vector<256x8xf32> -> vector<256x8xf32>
    %34 = arith.addf %29, %33 : vector<256x8xf32>
    %c1_39 = arith.constant 1 : index
    %c0_40 = arith.constant 0 : index
    %c0_41 = arith.constant 0 : index
    %35 = vector.load %arg7[%c1_39, %c0_40, %c0_41] : memref<18x18x4xbf16, #tpu.memory_space<vmem>>, vector<16x16x4xbf16>
    %36 = vector.shape_cast %35 : vector<16x16x4xbf16> to vector<256x4xbf16>
    %c12 = arith.constant 12 : index
    %c0_42 = arith.constant 0 : index
    %37 = vector.load %arg4[%c12, %c0_42] : memref<36x8xbf16, #tpu.memory_space<vmem>>, vector<4x8xbf16>
    %cst_43 = arith.constant dense<0.000000e+00> : vector<256x8xf32>
    %38 = tpu.matmul %36, %37, %cst_43 {dimension_numbers = #tpu.dot_dimension_numbers<[1], [0], [0], [1], [0, 0, 1, 1], [], []>} : vector<256x4xbf16>, vector<4x8xbf16>, vector<256x8xf32> -> vector<256x8xf32>
    %39 = arith.addf %34, %38 : vector<256x8xf32>
    %c1_44 = arith.constant 1 : index
    %c1_45 = arith.constant 1 : index
    %c0_46 = arith.constant 0 : index
    %40 = vector.load %arg7[%c1_44, %c1_45, %c0_46] : memref<18x18x4xbf16, #tpu.memory_space<vmem>>, vector<16x16x4xbf16>
    %41 = vector.shape_cast %40 : vector<16x16x4xbf16> to vector<256x4xbf16>
    %c16 = arith.constant 16 : index
    %c0_47 = arith.constant 0 : index
    %42 = vector.load %arg4[%c16, %c0_47] : memref<36x8xbf16, #tpu.memory_space<vmem>>, vector<4x8xbf16>
    %cst_48 = arith.constant dense<0.000000e+00> : vector<256x8xf32>
    %43 = tpu.matmul %41, %42, %cst_48 {dimension_numbers = #tpu.dot_dimension_numbers<[1], [0], [0], [1], [0, 0, 1, 1], [], []>} : vector<256x4xbf16>, vector<4x8xbf16>, vector<256x8xf32> -> vector<256x8xf32>
    %44 = arith.addf %39, %43 : vector<256x8xf32>
    %c1_49 = arith.constant 1 : index
    %c2_50 = arith.constant 2 : index
    %c0_51 = arith.constant 0 : index
    %45 = vector.load %arg7[%c1_49, %c2_50, %c0_51] : memref<18x18x4xbf16, #tpu.memory_space<vmem>>, vector<16x16x4xbf16>
    %46 = vector.shape_cast %45 : vector<16x16x4xbf16> to vector<256x4xbf16>
    %c20 = arith.constant 20 : index
    %c0_52 = arith.constant 0 : index
    %47 = vector.load %arg4[%c20, %c0_52] : memref<36x8xbf16, #tpu.memory_space<vmem>>, vector<4x8xbf16>
    %cst_53 = arith.constant dense<0.000000e+00> : vector<256x8xf32>
    %48 = tpu.matmul %46, %47, %cst_53 {dimension_numbers = #tpu.dot_dimension_numbers<[1], [0], [0], [1], [0, 0, 1, 1], [], []>} : vector<256x4xbf16>, vector<4x8xbf16>, vector<256x8xf32> -> vector<256x8xf32>
    %49 = arith.addf %44, %48 : vector<256x8xf32>
    %c2_54 = arith.constant 2 : index
    %c0_55 = arith.constant 0 : index
    %c0_56 = arith.constant 0 : index
    %50 = vector.load %arg7[%c2_54, %c0_55, %c0_56] : memref<18x18x4xbf16, #tpu.memory_space<vmem>>, vector<16x16x4xbf16>
    %51 = vector.shape_cast %50 : vector<16x16x4xbf16> to vector<256x4xbf16>
    %c24 = arith.constant 24 : index
    %c0_57 = arith.constant 0 : index
    %52 = vector.load %arg4[%c24, %c0_57] : memref<36x8xbf16, #tpu.memory_space<vmem>>, vector<4x8xbf16>
    %cst_58 = arith.constant dense<0.000000e+00> : vector<256x8xf32>
    %53 = tpu.matmul %51, %52, %cst_58 {dimension_numbers = #tpu.dot_dimension_numbers<[1], [0], [0], [1], [0, 0, 1, 1], [], []>} : vector<256x4xbf16>, vector<4x8xbf16>, vector<256x8xf32> -> vector<256x8xf32>
    %54 = arith.addf %49, %53 : vector<256x8xf32>
    %c2_59 = arith.constant 2 : index
    %c1_60 = arith.constant 1 : index
    %c0_61 = arith.constant 0 : index
    %55 = vector.load %arg7[%c2_59, %c1_60, %c0_61] : memref<18x18x4xbf16, #tpu.memory_space<vmem>>, vector<16x16x4xbf16>
    %56 = vector.shape_cast %55 : vector<16x16x4xbf16> to vector<256x4xbf16>
    %c28 = arith.constant 28 : index
    %c0_62 = arith.constant 0 : index
    %57 = vector.load %arg4[%c28, %c0_62] : memref<36x8xbf16, #tpu.memory_space<vmem>>, vector<4x8xbf16>
    %cst_63 = arith.constant dense<0.000000e+00> : vector<256x8xf32>
    %58 = tpu.matmul %56, %57, %cst_63 {dimension_numbers = #tpu.dot_dimension_numbers<[1], [0], [0], [1], [0, 0, 1, 1], [], []>} : vector<256x4xbf16>, vector<4x8xbf16>, vector<256x8xf32> -> vector<256x8xf32>
    %59 = arith.addf %54, %58 : vector<256x8xf32>
    %c2_64 = arith.constant 2 : index
    %c2_65 = arith.constant 2 : index
    %c0_66 = arith.constant 0 : index
    %60 = vector.load %arg7[%c2_64, %c2_65, %c0_66] : memref<18x18x4xbf16, #tpu.memory_space<vmem>>, vector<16x16x4xbf16>
    %61 = vector.shape_cast %60 : vector<16x16x4xbf16> to vector<256x4xbf16>
    %c32 = arith.constant 32 : index
    %c0_67 = arith.constant 0 : index
    %62 = vector.load %arg4[%c32, %c0_67] : memref<36x8xbf16, #tpu.memory_space<vmem>>, vector<4x8xbf16>
    %cst_68 = arith.constant dense<0.000000e+00> : vector<256x8xf32>
    %63 = tpu.matmul %61, %62, %cst_68 {dimension_numbers = #tpu.dot_dimension_numbers<[1], [0], [0], [1], [0, 0, 1, 1], [], []>} : vector<256x4xbf16>, vector<4x8xbf16>, vector<256x8xf32> -> vector<256x8xf32>
    %64 = arith.addf %59, %63 : vector<256x8xf32>
    %65 = vector.broadcast %8 : vector<1x8xf32> to vector<256x8xf32>
    %66 = arith.addf %64, %65 : vector<256x8xf32>
    %cst_69 = arith.constant 0.000000e+00 : f32
    %67 = vector.broadcast %cst_69 : f32 to vector<256x8xf32>
    %68 = arith.maximumf %66, %67 : vector<256x8xf32>
    %c0_70 = arith.constant 0 : index
    %c0_71 = arith.constant 0 : index
    %c0_72 = arith.constant 0 : index
    %69 = vector.load %arg6[%c0_70, %c0_71, %c0_72] : memref<1x12x256xf32, #tpu.memory_space<vmem>>, vector<1x4x256xf32>
    %70 = vector.shape_cast %69 : vector<1x4x256xf32> to vector<4x256xf32>
    %71 = vector.shape_cast %10 : vector<4x256xf32> to vector<1x4x256xf32>
    tpu.vector_store %arg6[%c0_70, %c0_71, %c0_72], %71 {strides = array<i32>} : memref<1x12x256xf32, #tpu.memory_space<vmem>>, vector<1x4x256xf32>,
    %72 = tpu.transpose %68, [1, 0] : vector<256x8xf32> -> vector<8x256xf32>
    %c0_73 = arith.constant 0 : index
    %c4_74 = arith.constant 4 : index
    %c0_75 = arith.constant 0 : index
    %73 = vector.load %arg6[%c0_73, %c4_74, %c0_75] : memref<1x12x256xf32, #tpu.memory_space<vmem>>, vector<1x8x256xf32>
    %74 = vector.shape_cast %73 : vector<1x8x256xf32> to vector<8x256xf32>
    %75 = vector.shape_cast %72 : vector<8x256xf32> to vector<1x8x256xf32>
    tpu.vector_store %arg6[%c0_73, %c4_74, %c0_75], %75 {strides = array<i32>} : memref<1x12x256xf32, #tpu.memory_space<vmem>>, vector<1x8x256xf32>,
    return
  }
  func.func @transform_0(%arg0: i32) -> (i32, i32, i32) {
    %c0_i32 = arith.constant 0 : i32
    %c0_i32_0 = arith.constant 0 : i32
    %c0_i32_1 = arith.constant 0 : i32
    return %arg0, %c0_i32, %c0_i32_0 : i32, i32, i32
  }
  func.func @transform_1(%arg0: i32) -> (i32, i32) {
    %c0_i32 = arith.constant 0 : i32
    %c0_i32_0 = arith.constant 0 : i32
    %c0_i32_1 = arith.constant 0 : i32
    return %c0_i32, %c0_i32_0 : i32, i32
  }
  func.func @transform_2(%arg0: i32) -> (i32, i32) {
    %c0_i32 = arith.constant 0 : i32
    %c0_i32_0 = arith.constant 0 : i32
    %c0_i32_1 = arith.constant 0 : i32
    return %c0_i32, %c0_i32_0 : i32, i32
  }
  func.func @transform_3(%arg0: i32) -> (i32, i32) {
    %c0_i32 = arith.constant 0 : i32
    %c0_i32_0 = arith.constant 0 : i32
    %c0_i32_1 = arith.constant 0 : i32
    return %c0_i32, %c0_i32_0 : i32, i32
  }
  func.func @transform_4(%arg0: i32) -> (i32, i32) {
    %c0_i32 = arith.constant 0 : i32
    %c0_i32_0 = arith.constant 0 : i32
    %c0_i32_1 = arith.constant 0 : i32
    return %c0_i32, %c0_i32_0 : i32, i32
  }
  func.func @transform_5(%arg0: i32) -> (i32, i32, i32) {
    %c0_i32 = arith.constant 0 : i32
    %c0_i32_0 = arith.constant 0 : i32
    %c0_i32_1 = arith.constant 0 : i32
    return %arg0, %c0_i32, %c0_i32_0 : i32, i32, i32
  }
}

</mosaic_0001>

<bundles_post_ra>
// kernel: conv_normal_forward.1
= control target key start
LH: loop header
LB: loop body
LE: loop exit
PB: predicated region body
PF: predicated region fallthrough
CT: control target
= control target key end

     0   :  { %s7343_s18 = smov 0   ;;  %s9152_s0 = inlined_call_operand.vmem [shape: f32[2,4,256], index: 0, kind: input, shape index: {}]   ;;  %s9153_s1 = inlined_call_operand.vmem [shape: bf16[4,4], index: 1, kind: input, shape index: {}]   ;;  %s9154_s2 = inlined_call_operand.vmem [shape: f32[1,4], index: 2, kind: input, shape index: {}]   ;;  %s9155_s3 = inlined_call_operand.vmem [shape: bf16[36,8], index: 3, kind: input, shape index: {}]   ;;  %s9156_s4 = inlined_call_operand.vmem [shape: f32[1,8], index: 4, kind: input, shape index: {}]   ;;  %s9157_s5 = inlined_call_operand.vmem [shape: f32[2,12,256], index: 5, kind: output, shape index: {}]  }
   0x1 LB: > { %s5985_s19 = sadd.s32 4294967295, %s7310_s18   ;;  %p5989_p0 = scmp.ge.s32.totalorder %s7310_s18, 1  ;;  %s7310_s18 = sphi %s7343_s18, %s15_s18  }
   0x2   : > { %p187_p1 = scmp.lt.s32.totalorder %s7310_s18, 3 }
   0x4   : > { %p188_p2 = pnand %p5989_p0, %p187_p1 }
   0x6   : > { %191 = sbr.rel (%p188_p2) target bundleno = 1218 (0x4c2), region = 40 }
   0xd   : > { %p215_p3 = scmp.lt.s32.totalorder %s5985_s19, 1  ;;  %v348_v2 = vld [vmem:[%s9153_s1] sm:$0x3]  ;;  %vm490_vm0 = vcmask 1041408   ;;  %vm229_vm1 = vcmask 24576   ;;  %vm441_vm4 = vcmask 31744  }
   0xe   : > { %7186 = vmatprep.subr.msk.bf16.mxu0 %vm490_vm0, %v348_v2  ;;  %v492_v3 = vsel %vm490_vm0, %v348_v2, 0  ;;  %vm236_vm2 = vsmask.f32 256  ;;  %v244_v4 = vld [vmem:[#allocation2 + $0x18] sm:$0x1]  ;;  %vm226_vm6 = vcmask 27648  }
   0xf   : > { %s9230_s19 = smov (!%p215_p3, %s5985_s19), 1  ;;  %6591 = vmatpush3.bf16.msra.mxu0 %v492_v3  ;;  %vm7368_vm3 = vmand %vm229_vm1, %vm236_vm2  ;;  %vm292_vm5 = vsmask.f32 7938  ;;  %v241_v46 = vld [vmem:[#allocation2 + $0xc] sm:$0x1]  ;;  %v9175_v48 = vmov 0 }
  0x10   : > { %s6386_s20 = sshll.u32 %s9230_s19, 3  ;;  %s6387_s21 = sshll.u32 %s9230_s19, 5  ;;  %v245_v7 = vsel %vm7368_vm3, 0, %v244_v4  ;;  %v242_v47 = vsel %vm7368_vm3, 0, %v241_v46  ;;  %vm7391_vm7 = vmand %vm229_vm1, %vm292_vm5  ;;  %v300_v49 = vld [vmem:[#allocation2 + $0x20] sm:$0x1] }
  0x11   : > { %s219_s24 = scalar_lea.vmem %s9152_s0, %s6386_s20  ;;  %s7357_s27 = scalar_lea.vmem %s9157_s5, %s6387_s21  ;;  %246 = vst [vmem:[#allocation2 + $0x18] sm:$0x1] %v245_v7  ;;  %v9176_v48 = vsel %vm7391_vm7, 4294967295, %v9175_v48  ;;  %243 = vst [vmem:[#allocation2 + $0xc] sm:$0x1] %v242_v47  ;;  %v301_v51 = vsel %vm7391_vm7, 0, %v300_v49 }
  0x12   : > { %v351_v0 = vld [vmem:[%s219_s24] sm:$0xff]  ;;  %9177 = vst [vmem:[#allocation3_spill] sm:$0xff] %v9176_v48  ;;  %v297_v52 = vld [vmem:[#allocation2 + $0x14] sm:$0x1]  ;;  %302 = vst [vmem:[#allocation2 + $0x20] sm:$0x1] %v301_v51 }
  0x13   : > { %355 = vxpose.xlu0.b32.start.end [1/1] (short) %v351_v0, 128  ;;  %5854 = vst [vmem:[%s7357_s27] sm:$0xf] %v351_v0  ;;  %v353_v1 = vcombine.high %v351_v0, %v351_v0  ;;  %v298_v53 = vsel %vm7391_vm7, 0, %v297_v52  ;;  %v7312_v54 = vmov 0   ;;  %v250_v60 = vld [vmem:[#allocation2 + $0x30] sm:$0x1]  ;;  %vm7482_vm12 = vmand %vm226_vm6, %vm292_vm5  ;;  %vm2261_vm14 = vcmask 1042432  }
  0x14   : > { %227 = vst.msk [vmem:[#allocation2] sm:$0xf] %vm226_vm6, %v7312_v54  ;;  %228 = vst.msk [vmem:[#allocation2 + $0x4] sm:$0xf] %vm226_vm6, %v7312_v54  ;;  %v251_v62 = vsel %vm7368_vm3, 0, %v250_v60  ;;  %vm2262_vm15 = vcmask 1046532  }
  0x15   : > { %5855 = vst [vmem:[%s7357_s27 + $0x8] sm:$0xf] %v353_v1  ;;  %230 = vst.msk [vmem:[#allocation2 + $0x8] sm:$0x1] %vm229_vm1, %v7312_v54  ;;  %v247_v2 = vld [vmem:[#allocation2 + $0x24] sm:$0x1] }
  0x16   : > { %232 = vst.msk [vmem:[#allocation2 + $0xcc] sm:$0xf] %vm226_vm6, %v7312_v54  ;;  %233 = vst.msk [vmem:[#allocation2 + $0xd0] sm:$0xf] %vm226_vm6, %v7312_v54  ;;  %v248_v3 = vsel %vm7368_vm3, 0, %v247_v2 }
  0x17   : > { %234 = vst.msk [vmem:[#allocation2 + $0xd4] sm:$0x1] %vm229_vm1, %v7312_v54  ;;  %299 = vst [vmem:[#allocation2 + $0x14] sm:$0x1] %v298_v53  ;;  %v306_v4 = vld [vmem:[#allocation2 + $0x38] sm:$0x1] }
  0x18   : > { %252 = vst [vmem:[#allocation2 + $0x30] sm:$0x1] %v251_v62  ;;  %249 = vst [vmem:[#allocation2 + $0x24] sm:$0x1] %v248_v3  ;;  %v307_v7 = vsel %vm7391_vm7, 0, %v306_v4 }
  0x19   : > { %308 = vst [vmem:[#allocation2 + $0x38] sm:$0x1] %v307_v7  ;;  %vm1269_vm8 = vsmask.f32 3328  ;;  %vm1270_vm9 = vsmask.f32 7440  ;;  %vm7992_vm1 = vmor %vm2261_vm14, %vm2262_vm15 }
  0x1a   : > { %vm7423_vm10 = vmor %vm1269_vm8, %vm1270_vm9  ;;  %v262_v46 = vld [vmem:[#allocation2 + $0x60] sm:$0x1]  ;;  %v259_v49 = vld [vmem:[#allocation2 + $0x54] sm:$0x1]  ;;  %vm783_vm11 = vsmask.f32 4368 }
  0x1b   : > { %v238_v58 = vld [vmem:[#allocation2] sm:$0x1]  ;;  %v263_v47 = vsel %vm7368_vm3, 0, %v262_v46  ;;  %v318_v51 = vld [vmem:[#allocation2 + $0x68] sm:$0x1]  ;;  %vm7487_vm13 = vmor %vm236_vm2, %vm783_vm11 }
  0x1c   : > { %v239_v59 = vsel %vm7368_vm3, 0, %v238_v58  ;;  %v294_v63 = vld [vmem:[#allocation2 + $0x8] sm:$0x1]  ;;  %264 = vst [vmem:[#allocation2 + $0x60] sm:$0x1] %v263_v47  ;;  %v319_v53 = vsel %vm7391_vm7, 0, %v318_v51 }
  0x1d   : > { %240 = vst [vmem:[#allocation2] sm:$0x1] %v239_v59  ;;  %v315_v52 = vld [vmem:[#allocation2 + $0x5c] sm:$0x1]  ;;  %320 = vst [vmem:[#allocation2 + $0x68] sm:$0x1] %v319_v53 }
  0x1e   : > { %v316_v54 = vsel %vm7391_vm7, 0, %v315_v52  ;;  %v324_v58 = vld [vmem:[#allocation2 + $0x80] sm:$0x1]  ;;  %v330_v3 = vld [vmem:[#allocation2 + $0x98] sm:$0x1] }
  0x1f   : > { %317 = vst [vmem:[#allocation2 + $0x5c] sm:$0x1] %v316_v54  ;;  %v325_v60 = vsel %vm7391_vm7, 0, %v324_v58  ;;  %v327_v4 = vld [vmem:[#allocation2 + $0x8c] sm:$0x1] }
  0x20   : > { %326 = vst [vmem:[#allocation2 + $0x80] sm:$0x1] %v325_v60  ;;  %v328_v7 = vsel %vm7391_vm7, 0, %v327_v4  ;;  %v280_v58 = vld [vmem:[#allocation2 + $0xa8] sm:$0x1] }
  0x21   : > { %329 = vst [vmem:[#allocation2 + $0x8c] sm:$0x1] %v328_v7 }
  0x50   : > { %387 = vxpose.xlu0.b32.start.end [1/1] (short) %v353_v1, 128  ;;  %v295_v1 = vsel %vm7391_vm7, 0, %v294_v63  ;;  %v274_v63 = vld [vmem:[#allocation2 + $0x90] sm:$0x1] }
  0x51   : > { %296 = vst [vmem:[#allocation2 + $0x8] sm:$0x1] %v295_v1  ;;  %v271_v1 = vld [vmem:[#allocation2 + $0x84] sm:$0x1] }
  0x52   : > { %v272_v2 = vsel %vm7368_vm3, 0, %v271_v1 }
  0x53   : > { %273 = vst [vmem:[#allocation2 + $0x84] sm:$0x1] %v272_v2 }
  0x93   : > { %v371_v5 = vpop.trf.xlu0 }
  0x97   : > { %v372_v8 = vpop.trf.xlu0 }
  0x98   : > { %v419_v9 = vpack.c.bf16 %v372_v8, %v371_v5  ;;  %v303_v8 = vld [vmem:[#allocation2 + $0x2c] sm:$0x1] }
  0x9a   : > { %6592 = vmatprep.mubr.msk.bf16.mxu0 %vm441_vm4, %v419_v9  ;;  %v304_v9 = vsel %vm7391_vm7, 0, %v303_v8  ;;  %v7474_v8 = vld [vmem:[%s9154_s2] ss:$0 sm:$0xff] }
  0x9b   : > { %v373_v10 = vpop.trf.xlu0  ;;  %305 = vst [vmem:[#allocation2 + $0x2c] sm:$0x1] %v304_v9 }
  0x9f   : > { %v374_v11 = vpop.trf.xlu0 }
  0xa0   : > { %v420_v12 = vpack.c.bf16 %v374_v11, %v373_v10  ;;  %v1220_v10 = vld [vmem:[#allocation2] sm:$0xf]  ;;  %v1221_v11 = vld [vmem:[#allocation2 + $0x4] sm:$0xf] }
  0xa2   : > { %6593 = vmatmul.mubr.msk.bf16.vlgmr.msra.gmra.mrb[0].mxu0 %vm441_vm4, %v420_v12  ;;  %v1273_v12 = vshrl.u32 %v1220_v10, 16 }
  0xa3   : > { %v375_v13 = vpop.trf.xlu0 }
  0xa7   : > { %v376_v14 = vpop.trf.xlu0 }
  0xa8   : > { %v421_v15 = vpack.c.bf16 %v376_v14, %v375_v13  ;;  %v1276_v13 = vshll.u32 %v1220_v10, 16  ;;  %v1282_v14 = vshll.u32 %v1221_v11, 16 }
  0xaa   : > { %6596 = vmatprep.mubr.msk.bf16.mxu0 %vm441_vm4, %v421_v15  ;;  %v1286_v15 = vshrl.u32 %v1221_v11, 16 }
  0xab   : > { %v377_v16 = vpop.trf.xlu0 }
  0xaf   : > { %v378_v17 = vpop.trf.xlu0 }
  0xb0   : > { %v422_v18 = vpack.c.bf16 %v378_v17, %v377_v16  ;;  %v1275_v17 = vrot.slane %v1273_v12, 4 }
  0xb2   : > { %6597 = vmatmul.mubr.msk.bf16.gmra.mrb[4].mxu0 %vm441_vm4, %v422_v18  ;;  %v1278_v18 = vrot.slane %v1276_v13, 5 }
  0xb3   : > { %v379_v19 = vpop.trf.xlu0 }
  0xb7   : > { %v380_v20 = vpop.trf.xlu0 }
  0xb8   : > { %v423_v21 = vpack.c.bf16 %v380_v20, %v379_v19  ;;  %v1284_v19 = vrot.slane %v1282_v14, 5  ;;  %v1288_v20 = vrot.slane %v1286_v15, 4 }
  0xba   : > { %6600 = vmatprep.mubr.msk.bf16.mxu0 %vm441_vm4, %v423_v21 }
  0xbb   : > { %v381_v22 = vpop.trf.xlu0 }
  0xbf   : > { %v382_v23 = vpop.trf.xlu0 }
  0xc0   : > { %v424_v24 = vpack.c.bf16 %v382_v23, %v381_v22  ;;  %v1253_v22 = vld [vmem:[#allocation2 + $0x8] sm:$0x1]  ;;  %v7207_v23 = vld [vmem:[%s9155_s3] ss:$0 sps:$4 sm:$0xcc]  }
  0xc2   : > { %6601 = vmatmul.mubr.msk.bf16.gmra.mrb[8].mxu0 %vm441_vm4, %v424_v24  ;;  %v1279_v24 = vor.u32 %v1278_v18, %v1275_v17 }
  0xc3   : > { %v383_v25 = vpop.trf.xlu0 }
  0xc7   : > { %v384_v26 = vpop.trf.xlu0 }
  0xc8   : > { %v425_v27 = vpack.c.bf16 %v384_v26, %v383_v25  ;;  %v1289_v25 = vor.u32 %v1288_v20, %v1284_v19  ;;  %v1292_v26 = vshll.u32 %v1253_v22, 16 }
  0xca   : > { %6604 = vmatprep.mubr.msk.bf16.mxu0 %vm441_vm4, %v425_v27  ;;  %v1708_v27 = vrot.slane %v7207_v23, 2 }
  0xcb   : > { %v385_v28 = vpop.trf.xlu0 }
  0xcc   : > { %7187 = vmatprep.subr.msk.bf16.mxu0 %vm490_vm0, %v1708_v27 }
  0xcf   : > { %v386_v29 = vpop.trf.xlu0 }
  0xd0   : > { %v426_v30 = vpack.c.bf16 %v386_v29, %v385_v28  ;;  %v1280_v28 = vrot.slane %v1279_v24, 4  ;;  %v1290_v29 = vrot.slane %v1289_v25, 4 }
  0xd2   : > { %6605 = vmatmul.mubr.msk.bf16.gmra.mrb[12].mxu0 %vm441_vm4, %v426_v30  ;;  %v1294_v30 = vrot.slane %v1292_v26, 5 }
  0xd3   : > { %v403_v31 = vpop.trf.xlu0 }
  0xd7   : > { %v404_v32 = vpop.trf.xlu0 }
  0xd8   : > { %v427_v33 = vpack.c.bf16 %v404_v32, %v403_v31  ;;  %v9178_v31 = vmov 0  ;;  %v1758_v32 = vsel %vm490_vm0, %v1708_v27, 0 }
  0xd9   : > { %v9179_v31 = vsel %vm7423_vm10, 4294967295, %v9178_v31  ;;  %6625 = vmatpush3.bf16.msra.mxu0 %v1758_v32  ;;  %v1115_v32 = vld [vmem:[#allocation2 + $0x18] sm:$0xf] }
  0xda   : > { %6608 = vmatprep.mubr.msk.bf16.mxu0 %vm441_vm4, %v427_v33  ;;  %9180 = vst [vmem:[#allocation4_spill] sm:$0xff] %v9179_v31  ;;  %v3462_v33 = vld [vmem:[%s9155_s3 + $0x8] sm:$0x3] }
  0xdb   : > { %v405_v34 = vpop.trf.xlu0  ;;  %7191 = vmatprep.subr.msk.bf16.mxu1 %vm490_vm0, %v3462_v33 }
  0xdf   : > { %v406_v35 = vpop.trf.xlu0 }
  0xe0   : > { %v428_v36 = vpack.c.bf16 %v406_v35, %v405_v34  ;;  %v1285_v34 = vsel %vm7423_vm10, %v1280_v28, %v1284_v19  ;;  %v1295_v35 = vsel %vm7423_vm10, %v1290_v29, %v1294_v30 }
  0xe2   : > { %6609 = vmatmul.mubr.msk.bf16.gmra.mrb[16].mxu0 %vm441_vm4, %v428_v36  ;;  %v256_v36 = vld [vmem:[#allocation2 + $0x48] sm:$0x1] }
  0xe3   : > { %v407_v37 = vpop.trf.xlu0 }
  0xe7   : > { %v408_v38 = vpop.trf.xlu0 }
  0xe8   : > { %v429_v39 = vpack.c.bf16 %v408_v38, %v407_v37  ;;  %v3560_v37 = vsel %vm490_vm0, %v3462_v33, 0  ;;  %v6043_v38 = vcombine.low %v1285_v34, %v1295_v35 }
  0xe9   : > { %6761 = vmatpush3.bf16.msra.mxu1 %v3560_v37  ;;  %v1108_v37 = vld [vmem:[#allocation2 + $0xc] sm:$0xf] }
  0xea   : > { %6612 = vmatprep.mubr.msk.bf16.mxu0 %vm441_vm4, %v429_v39  ;;  %v257_v39 = vsel %vm7368_vm3, 0, %v256_v36 }
  0xeb   : > { %v409_v40 = vpop.trf.xlu0  ;;  %258 = vst [vmem:[#allocation2 + $0x48] sm:$0x1] %v257_v39 }
  0xef   : > { %v410_v41 = vpop.trf.xlu0 }
  0xf0   : > { %v430_v42 = vpack.c.bf16 %v410_v41, %v409_v40  ;;  %v253_v40 = vld [vmem:[#allocation2 + $0x3c] sm:$0x1] }
  0xf1   : > { %v254_v41 = vsel %vm7368_vm3, 0, %v253_v40 }
  0xf2   : > { %6613 = vmatmul.mubr.msk.bf16.gmra.mrb[20].mxu0 %vm441_vm4, %v430_v42  ;;  %v312_v42 = vld [vmem:[#allocation2 + $0x50] sm:$0x1]  ;;  %255 = vst [vmem:[#allocation2 + $0x3c] sm:$0x1] %v254_v41 }
  0xf3   : > { %v411_v43 = vpop.trf.xlu0 }
  0xf7   : > { %v412_v44 = vpop.trf.xlu0 }
  0xf8   : > { %v431_v45 = vpack.c.bf16 %v412_v44, %v411_v43  ;;  %v313_v43 = vsel %vm7391_vm7, 0, %v312_v42  ;;  %v309_v44 = vld [vmem:[#allocation2 + $0x44] sm:$0x1]  ;;  %v1119_v42 = vld [vmem:[#allocation2 + $0x20] sm:$0x1] }
  0xf9   : > { %314 = vst [vmem:[#allocation2 + $0x50] sm:$0x1] %v313_v43 }
  0xfa   : > { %6616 = vmatprep.mubr.msk.bf16.mxu0 %vm441_vm4, %v431_v45  ;;  %v310_v45 = vsel %vm7391_vm7, 0, %v309_v44 }
  0xfb   : > { %v413_v50 = vpop.trf.xlu0  ;;  %311 = vst [vmem:[#allocation2 + $0x44] sm:$0x1] %v310_v45 }
  0xff   : > { %v414_v55 = vpop.trf.xlu0 }
 0x100   : > { %v432_v56 = vpack.c.bf16 %v414_v55, %v413_v50  ;;  %v260_v50 = vsel %vm7368_vm3, 0, %v259_v49  ;;  %v268_v55 = vld [vmem:[#allocation2 + $0x78] sm:$0x1] }
 0x101   : > { %261 = vst [vmem:[#allocation2 + $0x54] sm:$0x1] %v260_v50  ;;  %v1112_v50 = vld [vmem:[#allocation2 + $0x14] sm:$0x1] }
 0x102   : > { %6617 = vmatmul.mubr.msk.bf16.gmra.mrb[24].mxu0 %vm441_vm4, %v432_v56  ;;  %v269_v56 = vsel %vm7368_vm3, 0, %v268_v55 }
 0x103   : > { %v415_v57 = vpop.trf.xlu0  ;;  %270 = vst [vmem:[#allocation2 + $0x78] sm:$0x1] %v269_v56 }
 0x107   : > { %v416_v61 = vpop.trf.xlu0 }
 0x108   : > { %v433_v0 = vpack.c.bf16 %v416_v61, %v415_v57  ;;  %v265_v57 = vld [vmem:[#allocation2 + $0x6c] sm:$0x1]  ;;  %v321_v61 = vld [vmem:[#allocation2 + $0x74] sm:$0x1] }
 0x109   : > { %v266_v59 = vsel %vm7368_vm3, 0, %v265_v57  ;;  %v322_v62 = vsel %vm7391_vm7, 0, %v321_v61  ;;  %v7208_v57 = vld [vmem:[%s9155_s3 + $0x8] ss:$0 sps:$4 sm:$0xcc]  }
 0x10a   : > { %6620 = vmatprep.mubr.msk.bf16.mxu0 %vm441_vm4, %v433_v0  ;;  %267 = vst [vmem:[#allocation2 + $0x6c] sm:$0x1] %v266_v59  ;;  %323 = vst [vmem:[#allocation2 + $0x74] sm:$0x1] %v322_v62  ;;  %v275_v0 = vsel %vm7368_vm3, 0, %v274_v63  ;;  %v281_v62 = vsel %vm7368_vm3, 0, %v280_v58 }
 0x10b   : > { %v417_v5 = vpop.trf.xlu0  ;;  %276 = vst [vmem:[#allocation2 + $0x90] sm:$0x1] %v275_v0  ;;  %v3983_v1 = vrot.slane %v7208_v57, 2  ;;  %282 = vst [vmem:[#allocation2 + $0xa8] sm:$0x1] %v281_v62 }
 0x10d   : > { %7192 = vmatprep.subr.msk.bf16.mxu1 %vm490_vm0, %v3983_v1 }
 0x10f   : > { %v418_v16 = vpop.trf.xlu0 }
 0x110   : > { %v434_v21 = vpack.c.bf16 %v418_v16, %v417_v5  ;;  %v331_v5 = vsel %vm7391_vm7, 0, %v330_v3 }
 0x111   : > { %332 = vst [vmem:[#allocation2 + $0x98] sm:$0x1] %v331_v5 }
 0x112   : > { %6621 = vmatmul.mubr.msk.bf16.gmra.mrb[28].mxu0 %vm441_vm4, %v434_v21 }
 0x113   : > { %6626 = vmatprep.mubr.msk.bf16.mxu0 %vm441_vm4, %v6043_v38 }
 0x175   : > { %v6594_v9 = vpop.f32.mrb[0].mxu0 }
 0x176   : > { %v537_v10 = vadd.f32 %v6594_v9, %v7474_v8  ;;  %v528_v11 = vpop.f32.mrb[1].mxu0 }
 0x177   : > { %v529_v12 = vadd.f32 %v7474_v8, %v528_v11  ;;  %v6595_v13 = vpop.f32.mrb[2].mxu0  ;;  %v277_v11 = vld [vmem:[#allocation2 + $0x9c] sm:$0x1] }
 0x178   : > { %v657_v14 = vmax.f32 %v537_v10, 0.0  ;;  %v540_v15 = vadd.f32 %v6595_v13, %v7474_v8  ;;  %v531_v16 = vpop.f32.mrb[3].mxu0 }
 0x179   : > { %v655_v17 = vmax.f32 %v529_v12, 0.0  ;;  %v532_v18 = vadd.f32 %v7474_v8, %v531_v16 }
 0x17a   : > { %v6390_v19 = vpack.c.bf16 %v657_v14, %v657_v14  ;;  %v658_v20 = vmax.f32 %v540_v15, 0.0  ;;  %v278_v14 = vsel %vm7368_vm3, 0, %v277_v11 }
 0x17b   : > { %v6388_v21 = vpack.c.bf16 %v655_v17, %v655_v17  ;;  %v656_v22 = vmax.f32 %v532_v18, 0.0  ;;  %279 = vst [vmem:[#allocation2 + $0x9c] sm:$0x1] %v278_v14 }
 0x17c   : > { %v803_v23 = vshrl.u32 %v6390_v19, 16  ;;  %v6391_v24 = vpack.c.bf16 %v658_v20, %v658_v20  ;;  %v806_v28 = vshll.u32 %v6390_v19, 16 }
 0x17d   : > { %v786_v25 = vshrl.u32 %v6388_v21, 16  ;;  %v6389_v26 = vpack.c.bf16 %v656_v22, %v656_v22  ;;  %v789_v34 = vshll.u32 %v6388_v21, 16  ;;  %v7518_v21 = vsel %vm490_vm0, %v3983_v1, 0 }
 0x17e   : > { %v805_v27 = vrot.slane %v803_v23, 7  ;;  %v811_v29 = vshrl.u32 %v6391_v24, 16  ;;  %v814_v39 = vshll.u32 %v6391_v24, 16 }
 0x17f   : > { %v788_v33 = vrot.slane %v786_v25, 7  ;;  %v794_v35 = vshrl.u32 %v6389_v26, 16  ;;  %v797_v44 = vshll.u32 %v6389_v26, 16 }
 0x180   : > { %v808_v36 = vor.u32 %v806_v28, %v805_v27  ;;  %v813_v38 = vrot.slane %v811_v29, 7  ;;  %v809_v45 = vrot.slane %v805_v27, 4  ;;  %v1129_v28 = vld [vmem:[#allocation2 + $0x30] sm:$0xf] }
 0x181   : > { %v791_v40 = vor.u32 %v789_v34, %v788_v33  ;;  %v796_v43 = vrot.slane %v794_v35, 7  ;;  %v792_v51 = vrot.slane %v788_v33, 4  ;;  %v1122_v35 = vld [vmem:[#allocation2 + $0x24] sm:$0xf] }
 0x182   : > { %v1116_v46 = vsel %vm7482_vm12, %v808_v36, %v1115_v32  ;;  %v816_v47 = vor.u32 %v814_v39, %v813_v38  ;;  %v818_v49 = vrot.slane %v813_v38, 4 }
 0x183   : > { %1117 = vst [vmem:[#allocation2 + $0x18] sm:$0xf] %v1116_v46  ;;  %v1109_v52 = vsel %vm7482_vm12, %v791_v40, %v1108_v37  ;;  %v799_v53 = vor.u32 %v797_v44, %v796_v43  ;;  %v801_v54 = vrot.slane %v796_v43, 4  ;;  %v1133_v43 = vld [vmem:[#allocation2 + $0x38] sm:$0x1] }
 0x184   : > { %1110 = vst [vmem:[#allocation2 + $0xc] sm:$0xf] %v1109_v52  ;;  %v817_v55 = vsel %vm7487_vm13, %v809_v45, %v816_v47  ;;  %v1120_v56 = vsel %vm7368_vm3, %v818_v49, %v1119_v42 }
 0x185   : > { %1118 = vst.msk [vmem:[#allocation2 + $0x1c] sm:$0xf] %vm226_vm6, %v817_v55  ;;  %1121 = vst [vmem:[#allocation2 + $0x20] sm:$0x1] %v1120_v56  ;;  %v800_v59 = vsel %vm7487_vm13, %v792_v51, %v799_v53  ;;  %v1113_v60 = vsel %vm7368_vm3, %v801_v54, %v1112_v50  ;;  %v6598_v61 = vpop.f32.mrb[4].mxu0 }
 0x186   : > { %1111 = vst.msk [vmem:[#allocation2 + $0x10] sm:$0xf] %vm226_vm6, %v800_v59  ;;  %1114 = vst [vmem:[#allocation2 + $0x14] sm:$0x1] %v1113_v60  ;;  %v553_v63 = vadd.f32 %v6598_v61, %v7474_v8  ;;  %v544_v0 = vpop.f32.mrb[5].mxu0 }
 0x187   : > { %v545_v2 = vadd.f32 %v7474_v8, %v544_v0  ;;  %v6599_v3 = vpop.f32.mrb[6].mxu0  ;;  %v1126_v54 = vld [vmem:[#allocation2 + $0x2c] sm:$0x1] }
 0x188   : > { %v661_v4 = vmax.f32 %v553_v63, 0.0  ;;  %v556_v5 = vadd.f32 %v6599_v3, %v7474_v8  ;;  %v547_v7 = vpop.f32.mrb[7].mxu0 }
 0x189   : > { %v659_v9 = vmax.f32 %v545_v2, 0.0  ;;  %v548_v10 = vadd.f32 %v7474_v8, %v547_v7 }
 0x18a   : > { %v6394_v12 = vpack.c.bf16 %v661_v4, %v661_v4  ;;  %v662_v13 = vmax.f32 %v556_v5, 0.0  ;;  %v7524_v61 = vld [vmem:[#allocation2 + $0x18] sm:$0xf] }
 0x18b   : > { %v6392_v15 = vpack.c.bf16 %v659_v9, %v659_v9  ;;  %v660_v16 = vmax.f32 %v548_v10, 0.0  ;;  %v1222_v17 = vld [vmem:[#allocation2 + $0xc] sm:$0xf]  ;;  %v1321_v14 = vshrl.u32 %v7524_v61, 16 }
 0x18c   : > { %v837_v18 = vshrl.u32 %v6394_v12, 16  ;;  %v6395_v19 = vpack.c.bf16 %v662_v13, %v662_v13  ;;  %v1297_v20 = vshrl.u32 %v1222_v17, 16  ;;  %v840_v22 = vshll.u32 %v6394_v12, 16  ;;  %v3030_v56 = vld [vmem:[#allocation2 + $0xc] sm:$0xf] }
 0x18d   : > { %v820_v23 = vshrl.u32 %v6392_v15, 16  ;;  %v823_v24 = vshll.u32 %v6392_v15, 16  ;;  %v6393_v25 = vpack.c.bf16 %v660_v16, %v660_v16  ;;  %v1223_v26 = vld [vmem:[#allocation2 + $0x10] sm:$0xf]  ;;  %v1300_v38 = vshll.u32 %v1222_v17, 16 }
 0x18e   : > { %v839_v27 = vrot.slane %v837_v18, 7  ;;  %v845_v29 = vshrl.u32 %v6395_v19, 16  ;;  %v848_v32 = vshll.u32 %v6395_v19, 16  ;;  %v1299_v33 = vrot.slane %v1297_v20, 4  ;;  %v1254_v49 = vld [vmem:[#allocation2 + $0x14] sm:$0x1] }
 0x18f   : > { %v822_v34 = vrot.slane %v820_v23, 7  ;;  %v828_v36 = vshrl.u32 %v6393_v25, 16  ;;  %v831_v37 = vshll.u32 %v6393_v25, 16  ;;  %v1306_v44 = vshll.u32 %v1223_v26, 16  ;;  %v7530_v2 = vld [vmem:[#allocation2 + $0x10] sm:$0xf] }
 0x190   : > { %v842_v39 = vor.u32 %v840_v22, %v839_v27  ;;  %v843_v40 = vrot.slane %v839_v27, 4  ;;  %v847_v42 = vrot.slane %v845_v29, 7  ;;  %v1302_v50 = vrot.slane %v1300_v38, 5  ;;  %v7546_v29 = vld [vmem:[#allocation2 + $0x14] sm:$0x1] }
 0x191   : > { %v825_v45 = vor.u32 %v823_v24, %v822_v34  ;;  %v826_v46 = vrot.slane %v822_v34, 4  ;;  %v830_v47 = vrot.slane %v828_v36, 7  ;;  %v1308_v55 = vrot.slane %v1306_v44, 5 }
 0x192   : > { %v1130_v51 = vsel %vm7482_vm12, %v842_v39, %v1129_v28  ;;  %v850_v52 = vor.u32 %v848_v32, %v847_v42  ;;  %v852_v53 = vrot.slane %v847_v42, 4  ;;  %v1303_v60 = vor.u32 %v1302_v50, %v1299_v33 }
 0x193   : > { %1131 = vst [vmem:[#allocation2 + $0x30] sm:$0xf] %v1130_v51  ;;  %v1123_v57 = vsel %vm7482_vm12, %v825_v45, %v1122_v35  ;;  %v833_v58 = vor.u32 %v831_v37, %v830_v47  ;;  %v835_v59 = vrot.slane %v830_v47, 4  ;;  %v1310_v0 = vshrl.u32 %v1223_v26, 16 }
 0x194   : > { %1124 = vst [vmem:[#allocation2 + $0x24] sm:$0xf] %v1123_v57  ;;  %v851_v62 = vsel %vm7487_vm13, %v843_v40, %v850_v52  ;;  %v1134_v63 = vsel %vm7368_vm3, %v852_v53, %v1133_v43  ;;  %v1316_v1 = vshll.u32 %v1254_v49, 16  ;;  %v1304_v7 = vrot.slane %v1303_v60, 4  ;;  %v1143_v52 = vld [vmem:[#allocation2 + $0x48] sm:$0xf] }
 0x195   : > { %1132 = vst.msk [vmem:[#allocation2 + $0x34] sm:$0xf] %vm226_vm6, %v851_v62  ;;  %1135 = vst [vmem:[#allocation2 + $0x38] sm:$0x1] %v1134_v63  ;;  %v834_v3 = vsel %vm7487_vm13, %v826_v46, %v833_v58  ;;  %v1127_v4 = vsel %vm7368_vm3, %v835_v59, %v1126_v54  ;;  %v6602_v5 = vpop.f32.mrb[8].mxu0  ;;  %v3079_v9 = vshrl.u32 %v3030_v56, 16 }
 0x196   : > { %1125 = vst.msk [vmem:[#allocation2 + $0x28] sm:$0xf] %vm226_vm6, %v834_v3  ;;  %1128 = vst [vmem:[#allocation2 + $0x2c] sm:$0x1] %v1127_v4  ;;  %v569_v10 = vadd.f32 %v6602_v5, %v7474_v8  ;;  %v560_v11 = vpop.f32.mrb[9].mxu0  ;;  %v1312_v12 = vrot.slane %v1310_v0, 4  ;;  %v1309_v28 = vsel %vm7423_vm10, %v1304_v7, %v1308_v55 }
 0x197   : > { %v3082_v13 = vshll.u32 %v3030_v56, 16  ;;  %v561_v15 = vadd.f32 %v7474_v8, %v560_v11  ;;  %v6603_v16 = vpop.f32.mrb[10].mxu0  ;;  %v1318_v17 = vrot.slane %v1316_v1, 5  ;;  %v3081_v18 = vrot.slane %v3079_v9, 4  ;;  %v1136_v57 = vld [vmem:[#allocation2 + $0x3c] sm:$0xf] }
 0x198   : > { %v3088_v19 = vshll.u32 %v7530_v2, 16  ;;  %v665_v20 = vmax.f32 %v569_v10, 0.0  ;;  %v572_v22 = vadd.f32 %v6603_v16, %v7474_v8  ;;  %v563_v23 = vpop.f32.mrb[11].mxu0  ;;  %v1313_v24 = vor.u32 %v1312_v12, %v1308_v55  ;;  %v1147_v1 = vld [vmem:[#allocation2 + $0x50] sm:$0x1] }
 0x199   : > { %v3084_v25 = vrot.slane %v3082_v13, 5  ;;  %v663_v26 = vmax.f32 %v561_v15, 0.0  ;;  %v564_v27 = vadd.f32 %v7474_v8, %v563_v23  ;;  %v3092_v32 = vshrl.u32 %v7530_v2, 16  ;;  %v1140_v7 = vld [vmem:[#allocation2 + $0x44] sm:$0x1] }
 0x19a   : > { %v6398_v33 = vpack.c.bf16 %v665_v20, %v665_v20  ;;  %v666_v34 = vmax.f32 %v572_v22, 0.0  ;;  %v1314_v35 = vrot.slane %v1313_v24, 4  ;;  %v3090_v39 = vrot.slane %v3088_v19, 5  ;;  %v1225_v11 = vld [vmem:[#allocation2 + $0x1c] sm:$0xf] }
 0x19b   : > { %v3085_v36 = vor.u32 %v3084_v25, %v3081_v18  ;;  %v6396_v37 = vpack.c.bf16 %v663_v26, %v663_v26  ;;  %v664_v38 = vmax.f32 %v564_v27, 0.0  ;;  %v3094_v40 = vrot.slane %v3092_v32, 4  ;;  %v3033_v18 = vld [vmem:[#allocation2 + $0x18] sm:$0xf] }
 0x19c   : > { %v871_v42 = vshrl.u32 %v6398_v33, 16  ;;  %v6399_v43 = vpack.c.bf16 %v666_v34, %v666_v34  ;;  %v1319_v44 = vsel %vm7423_vm10, %v1314_v35, %v1318_v17  ;;  %v3098_v45 = vshll.u32 %v7546_v29, 16  ;;  %v1255_v17 = vld [vmem:[#allocation2 + $0x20] sm:$0x1] }
 0x19d   : > { %v874_v46 = vshll.u32 %v6398_v33, 16  ;;  %v854_v47 = vshrl.u32 %v6396_v37, 16  ;;  %v6397_v49 = vpack.c.bf16 %v664_v38, %v664_v38  ;;  %v6044_v50 = vcombine.low %v1309_v28, %v1319_v44  ;;  %v7566_v28 = vld [vmem:[#allocation2 + $0x1c] sm:$0xf] }
 0x19e   : > { %v873_v51 = vrot.slane %v871_v42, 7  ;;  %v857_v53 = vshll.u32 %v6396_v37, 16  ;;  %v879_v54 = vshrl.u32 %v6399_v43, 16  ;;  %v3086_v55 = vrot.slane %v3085_v36, 4  ;;  %v7575_v36 = vld [vmem:[#allocation2 + $0x20] sm:$0x1] }
 0x19f   : > { %v856_v56 = vrot.slane %v854_v47, 7  ;;  %v882_v58 = vshll.u32 %v6399_v43, 16  ;;  %v862_v59 = vshrl.u32 %v6397_v49, 16  ;;  %6627 = vmatmul.mubr.msk.bf16.vlgmr.msra.gmra.mrb[32].mxu0 %vm441_vm4, %v6044_v50  ;;  %v3095_v60 = vor.u32 %v3094_v40, %v3090_v39 }
 0x1a0   : > { %v876_v62 = vor.u32 %v874_v46, %v873_v51  ;;  %v877_v63 = vrot.slane %v873_v51, 4  ;;  %v881_v0 = vrot.slane %v879_v54, 7  ;;  %v865_v3 = vshll.u32 %v6397_v49, 16 }
 0x1a1   : > { %v859_v4 = vor.u32 %v857_v53, %v856_v56  ;;  %v864_v5 = vrot.slane %v862_v59, 7  ;;  %v3091_v9 = vsel %vm7423_vm10, %v3086_v55, %v3090_v39  ;;  %v3096_v10 = vrot.slane %v3095_v60, 4 }
 0x1a2   : > { %v1144_v12 = vsel %vm7482_vm12, %v876_v62, %v1143_v52  ;;  %v884_v13 = vor.u32 %v882_v58, %v881_v0  ;;  %v886_v15 = vrot.slane %v881_v0, 4  ;;  %v3100_v16 = vrot.slane %v3098_v45, 5 }
 0x1a3   : > { %1145 = vst [vmem:[#allocation2 + $0x48] sm:$0xf] %v1144_v12  ;;  %v860_v19 = vrot.slane %v856_v56, 4  ;;  %v1137_v20 = vsel %vm7482_vm12, %v859_v4, %v1136_v57  ;;  %v867_v22 = vor.u32 %v865_v3, %v864_v5  ;;  %v869_v23 = vrot.slane %v864_v5, 4 }
 0x1a4   : > { %1138 = vst [vmem:[#allocation2 + $0x3c] sm:$0xf] %v1137_v20  ;;  %v885_v24 = vsel %vm7487_vm13, %v877_v63, %v884_v13  ;;  %v1148_v25 = vsel %vm7368_vm3, %v886_v15, %v1147_v1  ;;  %v3101_v26 = vsel %vm7423_vm10, %v3096_v10, %v3100_v16  ;;  %v3821_v27 = vrot.slane %v7530_v2, 5 }
 0x1a5   : > { %1146 = vst.msk [vmem:[#allocation2 + $0x4c] sm:$0xf] %vm226_vm6, %v885_v24  ;;  %1149 = vst [vmem:[#allocation2 + $0x50] sm:$0x1] %v1148_v25  ;;  %v868_v32 = vsel %vm7487_vm13, %v860_v19, %v867_v22  ;;  %v1141_v33 = vsel %vm7368_vm3, %v869_v23, %v1140_v7  ;;  %v6189_v34 = vcombine.low %v3091_v9, %v3101_v26  ;;  %v1323_v35 = vrot.slane %v1321_v14, 4  ;;  %v6606_v37 = vpop.f32.mrb[12].mxu0 }
 0x1a6   : > { %1139 = vst.msk [vmem:[#allocation2 + $0x40] sm:$0xf] %vm226_vm6, %v868_v32  ;;  %1142 = vst [vmem:[#allocation2 + $0x44] sm:$0x1] %v1141_v33  ;;  %v1324_v38 = vshll.u32 %v7524_v61, 16  ;;  %v1330_v39 = vshll.u32 %v1225_v11, 16  ;;  %v585_v1 = vadd.f32 %v6606_v37, %v7474_v8 }
 0x1a7   : > { %v1334_v40 = vshrl.u32 %v1225_v11, 16  ;;  %v1340_v42 = vshll.u32 %v1255_v17, 16  ;;  %v576_v43 = vpop.f32.mrb[13].mxu0  ;;  %6762 = vmatprep.mubr.msk.bf16.mxu1 %vm441_vm4, %v6189_v34  ;;  %v3103_v44 = vshrl.u32 %v3033_v18, 16  ;;  %v3106_v45 = vshll.u32 %v3033_v18, 16 }
 0x1a8   : > { %v3112_v46 = vshll.u32 %v7566_v28, 16  ;;  %v3116_v14 = vshrl.u32 %v7566_v28, 16  ;;  %v6607_v47 = vpop.f32.mrb[14].mxu0  ;;  %v3824_v49 = vrot.slane %v7546_v29, 5  ;;  %v1326_v50 = vrot.slane %v1324_v38, 5 }
 0x1a9   : > { %v1332_v51 = vrot.slane %v1330_v39, 5  ;;  %v1336_v52 = vrot.slane %v1334_v40, 4  ;;  %v579_v53 = vpop.f32.mrb[15].mxu0  ;;  %v3105_v61 = vrot.slane %v3103_v44, 4  ;;  %v3108_v54 = vrot.slane %v3106_v45, 5 }
 0x1aa   : > { %v3114_v55 = vrot.slane %v3112_v46, 5  ;;  %v3118_v56 = vrot.slane %v3116_v14, 4  ;;  %v1327_v57 = vor.u32 %v1326_v50, %v1323_v35  ;;  %v1342_v59 = vrot.slane %v1340_v42, 5  ;;  %v1226_v18 = vld [vmem:[#allocation2 + $0x24] sm:$0xf] }
 0x1ab   : > { %v1337_v58 = vor.u32 %v1336_v52, %v1332_v51  ;;  %v3122_v60 = vshll.u32 %v7575_v36, 16  ;;  %v3109_v62 = vor.u32 %v3108_v54, %v3105_v61  ;;  %v3828_v0 = vrot.slane %v7566_v28, 5  ;;  %v1227_v24 = vld [vmem:[#allocation2 + $0x28] sm:$0xf]  ;;  %v1157_v39 = vld [vmem:[#allocation2 + $0x60] sm:$0xf] }
 0x1ac   : > { %v3119_v63 = vor.u32 %v3118_v56, %v3114_v55  ;;  %v1328_v3 = vrot.slane %v1327_v57, 4  ;;  %v669_v11 = vmax.f32 %v585_v1, 0.0  ;;  %v577_v12 = vadd.f32 %v7474_v8, %v576_v43  ;;  %v1256_v44 = vld [vmem:[#allocation2 + $0x2c] sm:$0x1]  ;;  %v1150_v56 = vld [vmem:[#allocation2 + $0x54] sm:$0xf] }
 0x1ad   : > { %v1338_v4 = vrot.slane %v1337_v58, 4  ;;  %v3124_v5 = vrot.slane %v3122_v60, 5  ;;  %v3110_v9 = vrot.slane %v3109_v62, 4  ;;  %v588_v16 = vadd.f32 %v6607_v47, %v7474_v8  ;;  %v1161_v57 = vld [vmem:[#allocation2 + $0x68] sm:$0x1] }
 0x1ae   : > { %v3120_v10 = vrot.slane %v3119_v63, 4  ;;  %v1333_v13 = vsel %vm7423_vm10, %v1328_v3, %v1332_v51  ;;  %v580_v17 = vadd.f32 %v7474_v8, %v579_v53  ;;  %v6402_v23 = vpack.c.bf16 %v669_v11, %v669_v11  ;;  %v1154_v1 = vld [vmem:[#allocation2 + $0x5c] sm:$0x1]  ;;  %v3755_v7 = vld [vmem:[#allocation2 + $0xc] sm:$0xe] }
 0x1af   : > { %v1343_v15 = vsel %vm7423_vm10, %v1338_v4, %v1342_v59  ;;  %v3115_v20 = vsel %vm7423_vm10, %v3110_v9, %v3114_v55  ;;  %v667_v26 = vmax.f32 %v577_v12, 0.0  ;;  %v670_v32 = vmax.f32 %v588_v16, 0.0  ;;  %v3036_v12 = vld [vmem:[#allocation2 + $0x24] sm:$0xf]  ;;  %v8040_v28 = vld [vmem:[#allocation2 + $0x1c] sm:$0xf] }
 0x1b0   : > { %v6045_v19 = vcombine.low %v1333_v13, %v1343_v15  ;;  %v3125_v22 = vsel %vm7423_vm10, %v3120_v10, %v3124_v5  ;;  %v668_v33 = vmax.f32 %v580_v17, 0.0  ;;  %v905_v34 = vshrl.u32 %v6402_v23, 16 }
 0x1b1   : > { %v6190_v25 = vcombine.low %v3115_v20, %v3125_v22  ;;  %v908_v35 = vshll.u32 %v6402_v23, 16  ;;  %v1345_v37 = vshrl.u32 %v1226_v18, 16  ;;  %v1348_v38 = vshll.u32 %v1226_v18, 16 }
 0x1b2   : > { %6630 = vmatprep.mubr.msk.bf16.mxu0 %vm441_vm4, %v6045_v19  ;;  %v6400_v40 = vpack.c.bf16 %v667_v26, %v667_v26  ;;  %v6403_v42 = vpack.c.bf16 %v670_v32, %v670_v32  ;;  %v6401_v43 = vpack.c.bf16 %v668_v33, %v668_v33  ;;  %v1354_v45 = vshll.u32 %v1227_v24, 16 }
 0x1b3   : > { %6763 = vmatmul.mubr.msk.bf16.vlgmr.msra.gmra.mrb[0].mxu1 %vm441_vm4, %v6190_v25  ;;  %v907_v46 = vrot.slane %v905_v34, 7  ;;  %v1347_v14 = vrot.slane %v1345_v37, 4  ;;  %v1350_v47 = vrot.slane %v1348_v38, 5  ;;  %v1358_v50 = vshrl.u32 %v1227_v24, 16  ;;  %v3037_v25 = vld [vmem:[#allocation2 + $0x28] sm:$0xf] }
 0x1b4   : > { %6795 = vmatpush3.bf16.msra.mxu1 %v7518_v21  ;;  %v888_v51 = vshrl.u32 %v6400_v40, 16  ;;  %v891_v52 = vshll.u32 %v6400_v40, 16  ;;  %v913_v53 = vshrl.u32 %v6403_v42, 16  ;;  %v916_v61 = vshll.u32 %v6403_v42, 16  ;;  %v1228_v37 = vld [vmem:[#allocation2 + $0x30] sm:$0xf] }
 0x1b5   : > { %v910_v54 = vor.u32 %v908_v35, %v907_v46  ;;  %v911_v55 = vrot.slane %v907_v46, 4  ;;  %v896_v58 = vshrl.u32 %v6401_v43, 16  ;;  %v899_v59 = vshll.u32 %v6401_v43, 16  ;;  %v7601_v60 = vpop.f32.mrb[16].mxu0  ;;  %v3038_v35 = vld [vmem:[#allocation2 + $0x2c] sm:$0x1] }
 0x1b6   : > { %v890_v62 = vrot.slane %v888_v51, 7  ;;  %v915_v63 = vrot.slane %v913_v53, 7  ;;  %v1351_v3 = vor.u32 %v1350_v47, %v1347_v14  ;;  %v1356_v4 = vrot.slane %v1354_v45, 5  ;;  %v7603_v5 = vpop.f32.mrb[17].mxu0  ;;  %v1229_v14 = vld [vmem:[#allocation2 + $0x34] sm:$0xf] }
 0x1b7   : > { %v1158_v21 = vsel %vm7482_vm12, %v910_v54, %v1157_v39  ;;  %v898_v9 = vrot.slane %v896_v58, 7  ;;  %v1360_v10 = vrot.slane %v1358_v50, 4  ;;  %v1364_v11 = vshll.u32 %v1256_v44, 16  ;;  %v7607_v13 = vpop.f32.mrb[18].mxu0  ;;  %v1257_v51 = vld [vmem:[#allocation2 + $0x38] sm:$0x1] }
 0x1b8   : > { %1159 = vst [vmem:[#allocation2 + $0x60] sm:$0xf] %v1158_v21  ;;  %v893_v15 = vor.u32 %v891_v52, %v890_v62  ;;  %v894_v16 = vrot.slane %v890_v62, 4  ;;  %v918_v17 = vor.u32 %v916_v61, %v915_v63  ;;  %v920_v18 = vrot.slane %v915_v63, 4  ;;  %v7609_v19 = vpop.f32.mrb[19].mxu0 }
 0x1b9   : > { %v901_v20 = vor.u32 %v899_v59, %v898_v9  ;;  %v903_v22 = vrot.slane %v898_v9, 4  ;;  %v1352_v23 = vrot.slane %v1351_v3, 4  ;;  %v1361_v24 = vor.u32 %v1360_v10, %v1356_v4  ;;  %v3040_v9 = vld [vmem:[#allocation2 + $0x34] sm:$0xf] }
 0x1ba   : > { %v1151_v26 = vsel %vm7482_vm12, %v893_v15, %v1150_v56  ;;  %v919_v32 = vsel %vm7487_vm13, %v911_v55, %v918_v17  ;;  %v1162_v33 = vsel %vm7368_vm3, %v920_v18, %v1161_v57  ;;  %v1366_v34 = vrot.slane %v1364_v11, 5  ;;  %v3039_v57 = vld [vmem:[#allocation2 + $0x30] sm:$0xf] }
 0x1bb   : > { %1152 = vst [vmem:[#allocation2 + $0x54] sm:$0xf] %v1151_v26  ;;  %1160 = vst.msk [vmem:[#allocation2 + $0x64] sm:$0xf] %vm226_vm6, %v919_v32  ;;  %v902_v38 = vsel %vm7487_vm13, %v894_v16, %v901_v20  ;;  %v1155_v39 = vsel %vm7368_vm3, %v903_v22, %v1154_v1  ;;  %v1357_v40 = vsel %vm7423_vm10, %v1352_v23, %v1356_v4  ;;  %v1362_v42 = vrot.slane %v1361_v24, 4 }
 0x1bc   : > { %1163 = vst [vmem:[#allocation2 + $0x68] sm:$0x1] %v1162_v33  ;;  %1153 = vst.msk [vmem:[#allocation2 + $0x58] sm:$0xf] %vm226_vm6, %v902_v38  ;;  %v3127_v43 = vshrl.u32 %v3036_v12, 16  ;;  %v3130_v44 = vshll.u32 %v3036_v12, 16 }
 0x1bd   : > { %1156 = vst [vmem:[#allocation2 + $0x5c] sm:$0x1] %v1155_v39  ;;  %v3136_v45 = vshll.u32 %v3037_v25, 16  ;;  %v3140_v46 = vshrl.u32 %v3037_v25, 16  ;;  %v1367_v47 = vsel %vm7423_vm10, %v1362_v42, %v1366_v34  ;;  %v3146_v50 = vshll.u32 %v3038_v35, 16 }
 0x1be   : > { %v1369_v52 = vshrl.u32 %v1228_v37, 16  ;;  %v1372_v53 = vshll.u32 %v1228_v37, 16  ;;  %v6046_v61 = vcombine.low %v1357_v40, %v1367_v47  ;;  %v3129_v54 = vrot.slane %v3127_v43, 4  ;;  %v3041_v22 = vld [vmem:[#allocation2 + $0x38] sm:$0x1] }
 0x1bf   : > { %v3132_v55 = vrot.slane %v3130_v44, 5  ;;  %v3138_v56 = vrot.slane %v3136_v45, 5  ;;  %v3142_v58 = vrot.slane %v3140_v46, 4  ;;  %v3148_v59 = vrot.slane %v3146_v50, 5 }
 0x1c0   : > { %v1371_v62 = vrot.slane %v1369_v52, 4  ;;  %v1374_v63 = vrot.slane %v1372_v53, 5  ;;  %6631 = vmatmul.mubr.msk.bf16.gmra.mrb[36].mxu0 %vm441_vm4, %v6046_v61  ;;  %v1378_v3 = vshll.u32 %v1229_v14, 16  ;;  %v1382_v4 = vshrl.u32 %v1229_v14, 16  ;;  %v1230_v53 = vld [vmem:[#allocation2 + $0x3c] sm:$0xf] }
 0x1c1   : > { %v3133_v1 = vor.u32 %v3132_v55, %v3129_v54  ;;  %v1388_v21 = vshll.u32 %v1257_v51, 16  ;;  %v3143_v10 = vor.u32 %v3142_v58, %v3138_v56  ;;  %v3151_v12 = vshrl.u32 %v3039_v57, 16  ;;  %v1231_v58 = vld [vmem:[#allocation2 + $0x40] sm:$0xf] }
 0x1c2   : > { %v1375_v11 = vor.u32 %v1374_v63, %v1371_v62  ;;  %v3154_v15 = vshll.u32 %v3039_v57, 16  ;;  %v1380_v17 = vrot.slane %v1378_v3, 5  ;;  %v1384_v18 = vrot.slane %v1382_v4, 4 }
 0x1c3   : > { %v3134_v16 = vrot.slane %v3133_v1, 4  ;;  %v1390_v20 = vrot.slane %v1388_v21, 5  ;;  %v3144_v23 = vrot.slane %v3143_v10, 4  ;;  %v3153_v25 = vrot.slane %v3151_v12, 4 }
 0x1c4   : > { %v1376_v24 = vrot.slane %v1375_v11, 4  ;;  %v3156_v26 = vrot.slane %v3154_v15, 5  ;;  %v1385_v33 = vor.u32 %v1384_v18, %v1380_v17  ;;  %v3160_v34 = vshll.u32 %v3040_v9, 16 }
 0x1c5   : > { %v3139_v32 = vsel %vm7423_vm10, %v3134_v16, %v3138_v56  ;;  %v3164_v35 = vshrl.u32 %v3040_v9, 16  ;;  %v3149_v37 = vsel %vm7423_vm10, %v3144_v23, %v3148_v59  ;;  %v3170_v40 = vshll.u32 %v3041_v22, 16  ;;  %v7634_v42 = vpop.f32.mrb[20].mxu0 }
 0x1c6   : > { %v1381_v38 = vsel %vm7423_vm10, %v1376_v24, %v1380_v17  ;;  %v3157_v39 = vor.u32 %v3156_v26, %v3153_v25  ;;  %v6191_v43 = vcombine.low %v3139_v32, %v3149_v37  ;;  %v1386_v44 = vrot.slane %v1385_v33, 4  ;;  %v7636_v14 = vpop.f32.mrb[21].mxu0  ;;  %v1171_v32 = vld [vmem:[#allocation2 + $0x78] sm:$0xf]  ;;  %v1164_v37 = vld [vmem:[#allocation2 + $0x6c] sm:$0xf] }
 0x1c7   : > { %v3162_v45 = vrot.slane %v3160_v34, 5  ;;  %v3166_v46 = vrot.slane %v3164_v35, 4  ;;  %v3172_v50 = vrot.slane %v3170_v40, 5  ;;  %v601_v51 = vadd.f32 %v7601_v60, %v7474_v8  ;;  %v7642_v61 = vpop.f32.mrb[22].mxu0 }
 0x1c8   : > { %v3158_v47 = vrot.slane %v3157_v39, 4  ;;  %v593_v52 = vadd.f32 %v7474_v8, %v7603_v5  ;;  %6766 = vmatprep.mubr.msk.bf16.mxu1 %vm441_vm4, %v6191_v43  ;;  %v1391_v54 = vsel %vm7423_vm10, %v1386_v44, %v1390_v20  ;;  %v604_v56 = vadd.f32 %v7607_v13, %v7474_v8  ;;  %v7651_v60 = vpop.f32.mrb[23].mxu0 }
 0x1c9   : > { %v3167_v55 = vor.u32 %v3166_v46, %v3162_v45  ;;  %v596_v57 = vadd.f32 %v7474_v8, %v7609_v19  ;;  %v6047_v59 = vcombine.low %v1381_v38, %v1391_v54  ;;  %v673_v62 = vmax.f32 %v601_v51, 0.0  ;;  %v1168_v51 = vld [vmem:[#allocation2 + $0x74] sm:$0x1] }
 0x1ca   : > { %v3163_v5 = vsel %vm7423_vm10, %v3158_v47, %v3162_v45  ;;  %v671_v63 = vmax.f32 %v593_v52, 0.0  ;;  %v674_v3 = vmax.f32 %v604_v56, 0.0  ;;  %v1393_v21 = vshrl.u32 %v1230_v53, 16  ;;  %v1258_v56 = vld [vmem:[#allocation2 + $0x44] sm:$0x1] }
 0x1cb   : > { %v3168_v1 = vrot.slane %v3167_v55, 4  ;;  %v672_v4 = vmax.f32 %v596_v57, 0.0  ;;  %6634 = vmatprep.mubr.msk.bf16.mxu0 %vm441_vm4, %v6047_v59  ;;  %v6406_v9 = vpack.c.bf16 %v673_v62, %v673_v62  ;;  %v1396_v10 = vshll.u32 %v1230_v53, 16  ;;  %v3042_v57 = vld [vmem:[#allocation2 + $0x3c] sm:$0xf] }
 0x1cc   : > { %v6404_v13 = vpack.c.bf16 %v671_v63, %v671_v63  ;;  %v1402_v11 = vshll.u32 %v1231_v58, 16  ;;  %v6407_v19 = vpack.c.bf16 %v674_v3, %v674_v3  ;;  %v1395_v15 = vrot.slane %v1393_v21, 4  ;;  %v3043_v63 = vld [vmem:[#allocation2 + $0x40] sm:$0xf] }
 0x1cd   : > { %v3173_v8 = vsel %vm7423_vm10, %v3168_v1, %v3172_v50  ;;  %v6405_v12 = vpack.c.bf16 %v672_v4, %v672_v4  ;;  %v939_v17 = vshrl.u32 %v6406_v9, 16  ;;  %v942_v18 = vshll.u32 %v6406_v9, 16  ;;  %v1175_v50 = vld [vmem:[#allocation2 + $0x80] sm:$0x1]  ;;  %v3044_v1 = vld [vmem:[#allocation2 + $0x44] sm:$0x1] }
 0x1ce   : > { %v6192_v16 = vcombine.low %v3163_v5, %v3173_v8  ;;  %v922_v20 = vshrl.u32 %v6404_v13, 16  ;;  %v925_v22 = vshll.u32 %v6404_v13, 16  ;;  %v947_v23 = vshrl.u32 %v6407_v19, 16  ;;  %v1232_v13 = vld [vmem:[#allocation2 + $0x48] sm:$0xf] }
 0x1cf   : > { %v950_v24 = vshll.u32 %v6407_v19, 16  ;;  %v930_v25 = vshrl.u32 %v6405_v12, 16  ;;  %v941_v26 = vrot.slane %v939_v17, 7  ;;  %v933_v34 = vshll.u32 %v6405_v12, 16  ;;  %v1233_v12 = vld [vmem:[#allocation2 + $0x4c] sm:$0xf] }
 0x1d0   : > { %6767 = vmatmul.mubr.msk.bf16.gmra.mrb[4].mxu1 %vm441_vm4, %v6192_v16  ;;  %v924_v33 = vrot.slane %v922_v20, 7  ;;  %v1398_v35 = vrot.slane %v1396_v10, 5  ;;  %v949_v38 = vrot.slane %v947_v23, 7  ;;  %v1404_v40 = vrot.slane %v1402_v11, 5 }
 0x1d1   : > { %v932_v39 = vrot.slane %v930_v25, 7  ;;  %v1406_v43 = vshrl.u32 %v1231_v58, 16  ;;  %v944_v44 = vor.u32 %v942_v18, %v941_v26  ;;  %v945_v45 = vrot.slane %v941_v26, 4 }
 0x1d2   : > { %v927_v46 = vor.u32 %v925_v22, %v924_v33  ;;  %v928_v47 = vrot.slane %v924_v33, 4  ;;  %v952_v52 = vor.u32 %v950_v24, %v949_v38  ;;  %v954_v53 = vrot.slane %v949_v38, 4  ;;  %v3045_v33 = vld [vmem:[#allocation2 + $0x48] sm:$0xf] }
 0x1d3   : > { %v935_v54 = vor.u32 %v933_v34, %v932_v39  ;;  %v937_v55 = vrot.slane %v932_v39, 4  ;;  %v1172_v59 = vsel %vm7482_vm12, %v944_v44, %v1171_v32  ;;  %v1399_v62 = vor.u32 %v1398_v35, %v1395_v15  ;;  %v1259_v32 = vld [vmem:[#allocation2 + $0x50] sm:$0x1] }
 0x1d4   : > { %v1165_v5 = vsel %vm7482_vm12, %v927_v46, %v1164_v37  ;;  %v1408_v58 = vrot.slane %v1406_v43, 4  ;;  %1173 = vst [vmem:[#allocation2 + $0x78] sm:$0xf] %v1172_v59  ;;  %v953_v3 = vsel %vm7487_vm13, %v945_v45, %v952_v52  ;;  %v1176_v4 = vsel %vm7368_vm3, %v954_v53, %v1175_v50 }
 0x1d5   : > { %1166 = vst [vmem:[#allocation2 + $0x6c] sm:$0xf] %v1165_v5  ;;  %v936_v21 = vsel %vm7487_vm13, %v928_v47, %v935_v54  ;;  %v1169_v9 = vsel %vm7368_vm3, %v937_v55, %v1168_v51  ;;  %1174 = vst.msk [vmem:[#allocation2 + $0x7c] sm:$0xf] %vm226_vm6, %v953_v3  ;;  %v1400_v10 = vrot.slane %v1399_v62, 4  ;;  %v1412_v8 = vshll.u32 %v1258_v56, 16 }
 0x1d6   : > { %1177 = vst [vmem:[#allocation2 + $0x80] sm:$0x1] %v1176_v4  ;;  %1167 = vst.msk [vmem:[#allocation2 + $0x70] sm:$0xf] %vm226_vm6, %v936_v21  ;;  %v1409_v11 = vor.u32 %v1408_v58, %v1404_v40  ;;  %v3175_v19 = vshrl.u32 %v3042_v57, 16  ;;  %v7673_v15 = vpop.f32.mrb[24].mxu0 }
 0x1d7   : > { %1170 = vst [vmem:[#allocation2 + $0x74] sm:$0x1] %v1169_v9  ;;  %v3178_v16 = vshll.u32 %v3042_v57, 16  ;;  %v3184_v17 = vshll.u32 %v3043_v63, 16  ;;  %v3188_v18 = vshrl.u32 %v3043_v63, 16  ;;  %v3194_v20 = vshll.u32 %v3044_v1, 16 }
 0x1d8   : > { %v7675_v22 = vpop.f32.mrb[25].mxu0  ;;  %v1405_v23 = vsel %vm7423_vm10, %v1400_v10, %v1404_v40  ;;  %v1410_v24 = vrot.slane %v1409_v11, 4  ;;  %v1414_v25 = vrot.slane %v1412_v8, 5  ;;  %v3177_v26 = vrot.slane %v3175_v19, 4  ;;  %v3046_v40 = vld [vmem:[#allocation2 + $0x4c] sm:$0xf] }
 0x1d9   : > { %v7679_v34 = vpop.f32.mrb[26].mxu0  ;;  %v3180_v35 = vrot.slane %v3178_v16, 5  ;;  %v3186_v37 = vrot.slane %v3184_v17, 5  ;;  %v3190_v38 = vrot.slane %v3188_v18, 4  ;;  %v3196_v39 = vrot.slane %v3194_v20, 5 }
 0x1da   : > { %v7681_v43 = vpop.f32.mrb[27].mxu0  ;;  %v1415_v44 = vsel %vm7423_vm10, %v1410_v24, %v1414_v25  ;;  %v1417_v45 = vshrl.u32 %v1232_v13, 16  ;;  %v1420_v46 = vshll.u32 %v1232_v13, 16  ;;  %v1426_v47 = vshll.u32 %v1233_v12, 16  ;;  %v1252_v54 = vld [vmem:[%s9155_s3] sm:$0x3] }
 0x1db   : > { %v6048_v50 = vcombine.low %v1405_v23, %v1415_v44  ;;  %v3181_v51 = vor.u32 %v3180_v35, %v3177_v26  ;;  %v3191_v52 = vor.u32 %v3190_v38, %v3186_v37  ;;  %v1430_v53 = vshrl.u32 %v1233_v12, 16  ;;  %v4261_v55 = vld [vmem:[%s9155_s3 + $0xc] sm:$0x3]  ;;  %7188 = vmatprep.subr.msk.bf16.mxu0 %vm490_vm0, %v1252_v54  ;;  %v3047_v21 = vld [vmem:[#allocation2 + $0x50] sm:$0x1] }
 0x1dc   : > { %v1419_v56 = vrot.slane %v1417_v45, 4  ;;  %v1422_v57 = vrot.slane %v1420_v46, 5  ;;  %v1428_v59 = vrot.slane %v1426_v47, 5  ;;  %v1436_v5 = vshll.u32 %v1259_v32, 16  ;;  %7193 = vmatprep.subr.msk.bf16.mxu1 %vm490_vm0, %v4261_v55  ;;  %v7701_v25 = vld [vmem:[%s9154_s2] ss:$0 sm:$0xff] }
 0x1dd   : > { %6635 = vmatmul.mubr.msk.bf16.gmra.mrb[40].mxu0 %vm441_vm4, %v6048_v50  ;;  %v3182_v62 = vrot.slane %v3181_v51, 4  ;;  %v3192_v58 = vrot.slane %v3191_v52, 4  ;;  %v1432_v63 = vrot.slane %v1430_v53, 4  ;;  %v3199_v1 = vshrl.u32 %v3045_v33, 16  ;;  %v1234_v38 = vld [vmem:[#allocation2 + $0x54] sm:$0xf] }
 0x1de   : > { %v1423_v3 = vor.u32 %v1422_v57, %v1419_v56  ;;  %v1438_v4 = vrot.slane %v1436_v5, 5  ;;  %v3202_v9 = vshll.u32 %v3045_v33, 16  ;;  %v3208_v13 = vshll.u32 %v3046_v40, 16 }
 0x1df   : > { %v3187_v10 = vsel %vm7423_vm10, %v3182_v62, %v3186_v37  ;;  %v3197_v11 = vsel %vm7423_vm10, %v3192_v58, %v3196_v39  ;;  %v1433_v8 = vor.u32 %v1432_v63, %v1428_v59  ;;  %v3201_v19 = vrot.slane %v3199_v1, 4  ;;  %v1185_v1 = vld [vmem:[#allocation2 + $0x90] sm:$0xf] }
 0x1e0   : > { %v6193_v12 = vcombine.low %v3187_v10, %v3197_v11  ;;  %v1424_v16 = vrot.slane %v1423_v3, 4  ;;  %v3204_v17 = vrot.slane %v3202_v9, 5  ;;  %v3210_v18 = vrot.slane %v3208_v13, 5  ;;  %v1178_v11 = vld [vmem:[#allocation2 + $0x84] sm:$0xf] }
 0x1e1   : > { %v1434_v20 = vrot.slane %v1433_v8, 4  ;;  %v3212_v23 = vshrl.u32 %v3046_v40, 16  ;;  %v3218_v24 = vshll.u32 %v3047_v21, 16  ;;  %v617_v26 = vadd.f32 %v7701_v25, %v7634_v42  ;;  %v1189_v8 = vld [vmem:[#allocation2 + $0x98] sm:$0x1] }
 0x1e2   : > { %6770 = vmatprep.mubr.msk.bf16.mxu1 %vm441_vm4, %v6193_v12  ;;  %v1429_v32 = vsel %vm7423_vm10, %v1424_v16, %v1428_v59  ;;  %v3205_v33 = vor.u32 %v3204_v17, %v3201_v19  ;;  %v609_v35 = vadd.f32 %v7701_v25, %v7636_v14  ;;  %v620_v37 = vadd.f32 %v7701_v25, %v7642_v61 }
 0x1e3   : > { %v1439_v39 = vsel %vm7423_vm10, %v1434_v20, %v1438_v4  ;;  %v3214_v44 = vrot.slane %v3212_v23, 4  ;;  %v3220_v45 = vrot.slane %v3218_v24, 5  ;;  %v677_v46 = vmax.f32 %v617_v26, 0.0  ;;  %v1235_v23 = vld [vmem:[#allocation2 + $0x58] sm:$0xf] }
 0x1e4   : > { %v6049_v42 = vcombine.low %v1429_v32, %v1439_v39  ;;  %v3206_v47 = vrot.slane %v3205_v33, 4  ;;  %v675_v40 = vmax.f32 %v609_v35, 0.0  ;;  %v678_v50 = vmax.f32 %v620_v37, 0.0  ;;  %v1260_v37 = vld [vmem:[#allocation2 + $0x5c] sm:$0x1] }
 0x1e5   : > { %v3215_v51 = vor.u32 %v3214_v44, %v3210_v18  ;;  %v6410_v52 = vpack.c.bf16 %v677_v46, %v677_v46  ;;  %v612_v53 = vadd.f32 %v7701_v25, %v7651_v60  ;;  %v1441_v14 = vshrl.u32 %v1234_v38, 16  ;;  %v7719_v57 = vpop.f32.mrb[28].mxu0 }
 0x1e6   : > { %6638 = vmatprep.mubr.msk.bf16.mxu0 %vm441_vm4, %v6049_v42  ;;  %v3211_v61 = vsel %vm7423_vm10, %v3206_v47, %v3210_v18  ;;  %v6408_v54 = vpack.c.bf16 %v675_v40, %v675_v40  ;;  %v6411_v55 = vpack.c.bf16 %v678_v50, %v678_v50  ;;  %v1444_v56 = vshll.u32 %v1234_v38, 16  ;;  %v7721_v63 = vpop.f32.mrb[29].mxu0  ;;  %v3048_v38 = vld [vmem:[#allocation2 + $0x54] sm:$0xf]  ;;  %v1182_v42 = vld [vmem:[#allocation2 + $0x8c] sm:$0x1] }
 0x1e7   : > { %v3216_v59 = vrot.slane %v3215_v51, 4  ;;  %v973_v5 = vshrl.u32 %v6410_v52, 16  ;;  %v976_v62 = vshll.u32 %v6410_v52, 16  ;;  %v676_v58 = vmax.f32 %v612_v53, 0.0  ;;  %v7723_v9 = vpop.f32.mrb[30].mxu0 }
 0x1e8   : > { %v956_v3 = vshrl.u32 %v6408_v54, 16  ;;  %v959_v60 = vshll.u32 %v6408_v54, 16  ;;  %v981_v4 = vshrl.u32 %v6411_v55, 16  ;;  %v984_v21 = vshll.u32 %v6411_v55, 16  ;;  %v7727_v16 = vpop.f32.mrb[31].mxu0 }
 0x1e9   : > { %v3221_v13 = vsel %vm7423_vm10, %v3216_v59, %v3220_v45  ;;  %v975_v10 = vrot.slane %v973_v5, 7  ;;  %v6409_v19 = vpack.c.bf16 %v676_v58, %v676_v58  ;;  %v1443_v12 = vrot.slane %v1441_v14, 4  ;;  %v3049_v54 = vld [vmem:[#allocation2 + $0x58] sm:$0xf] }
 0x1ea   : > { %v6194_v17 = vcombine.low %v3211_v61, %v3221_v13  ;;  %v958_v18 = vrot.slane %v956_v3, 7  ;;  %v983_v20 = vrot.slane %v981_v4, 7  ;;  %v1446_v24 = vrot.slane %v1444_v56, 5  ;;  %v3050_v3 = vld [vmem:[#allocation2 + $0x5c] sm:$0x1] }
 0x1eb   : > { %v978_v26 = vor.u32 %v976_v62, %v975_v10  ;;  %v979_v32 = vrot.slane %v975_v10, 4  ;;  %v964_v33 = vshrl.u32 %v6409_v19, 16  ;;  %v967_v35 = vshll.u32 %v6409_v19, 16  ;;  %v1236_v62 = vld [vmem:[#allocation2 + $0x60] sm:$0xf] }
 0x1ec   : > { %6771 = vmatmul.mubr.msk.bf16.gmra.mrb[8].mxu1 %vm441_vm4, %v6194_v17  ;;  %v961_v39 = vor.u32 %v959_v60, %v958_v18  ;;  %v962_v44 = vrot.slane %v958_v18, 4  ;;  %v986_v45 = vor.u32 %v984_v21, %v983_v20  ;;  %v988_v46 = vrot.slane %v983_v20, 4 }
 0x1ed   : > { %v1186_v47 = vsel %vm7482_vm12, %v978_v26, %v1185_v1  ;;  %v966_v40 = vrot.slane %v964_v33, 7  ;;  %v1447_v50 = vor.u32 %v1446_v24, %v1443_v12  ;;  %v1450_v51 = vshll.u32 %v1235_v23, 16 }
 0x1ee   : > { %1187 = vst [vmem:[#allocation2 + $0x90] sm:$0xf] %v1186_v47  ;;  %v1179_v52 = vsel %vm7482_vm12, %v961_v39, %v1178_v11  ;;  %v987_v53 = vsel %vm7487_vm13, %v979_v32, %v986_v45  ;;  %v1190_v14 = vsel %vm7368_vm3, %v988_v46, %v1189_v8  ;;  %v1454_v61 = vshrl.u32 %v1235_v23, 16  ;;  %v1237_v8 = vld [vmem:[#allocation2 + $0x64] sm:$0xf] }
 0x1ef   : > { %1180 = vst [vmem:[#allocation2 + $0x84] sm:$0xf] %v1179_v52  ;;  %1188 = vst.msk [vmem:[#allocation2 + $0x94] sm:$0xf] %vm226_vm6, %v987_v53  ;;  %v969_v55 = vor.u32 %v967_v35, %v966_v40  ;;  %v971_v56 = vrot.slane %v966_v40, 4  ;;  %v1448_v59 = vrot.slane %v1447_v50, 4 }
 0x1f0   : > { %1191 = vst [vmem:[#allocation2 + $0x98] sm:$0x1] %v1190_v14  ;;  %v1452_v5 = vrot.slane %v1450_v51, 5  ;;  %v1456_v58 = vrot.slane %v1454_v61, 4  ;;  %v1460_v1 = vshll.u32 %v1260_v37, 16  ;;  %v3223_v60 = vshrl.u32 %v3048_v38, 16 }
 0x1f1   : > { %v3226_v4 = vshll.u32 %v3048_v38, 16  ;;  %v970_v21 = vsel %vm7487_vm13, %v962_v44, %v969_v55  ;;  %v1183_v13 = vsel %vm7368_vm3, %v971_v56, %v1182_v42  ;;  %v3232_v11 = vshll.u32 %v3049_v54, 16  ;;  %v1261_v35 = vld [vmem:[#allocation2 + $0x68] sm:$0x1]  ;;  %v3051_v42 = vld [vmem:[#allocation2 + $0x60] sm:$0xf] }
 0x1f2   : > { %v1453_v10 = vsel %vm7423_vm10, %v1448_v59, %v1452_v5  ;;  %1181 = vst.msk [vmem:[#allocation2 + $0x88] sm:$0xf] %vm226_vm6, %v970_v21  ;;  %1184 = vst [vmem:[#allocation2 + $0x8c] sm:$0x1] %v1183_v13  ;;  %v1457_v19 = vor.u32 %v1456_v58, %v1452_v5  ;;  %v1462_v12 = vrot.slane %v1460_v1, 5  ;;  %v3225_v17 = vrot.slane %v3223_v60, 4 }
 0x1f3   : > { %v3228_v18 = vrot.slane %v3226_v4, 5  ;;  %v3234_v20 = vrot.slane %v3232_v11, 5  ;;  %v3236_v23 = vshrl.u32 %v3049_v54, 16  ;;  %v3242_v24 = vshll.u32 %v3050_v3, 16  ;;  %v3052_v52 = vld [vmem:[#allocation2 + $0x64] sm:$0xf] }
 0x1f4   : > { %v1465_v26 = vshrl.u32 %v1236_v62, 16  ;;  %v1458_v32 = vrot.slane %v1457_v19, 4  ;;  %v1468_v37 = vshll.u32 %v1236_v62, 16  ;;  %v1474_v38 = vshll.u32 %v1237_v8, 16  ;;  %v3053_v59 = vld [vmem:[#allocation2 + $0x68] sm:$0x1] }
 0x1f5   : > { %v3229_v33 = vor.u32 %v3228_v18, %v3225_v17  ;;  %v3238_v39 = vrot.slane %v3236_v23, 4  ;;  %v3244_v44 = vrot.slane %v3242_v24, 5  ;;  %v1478_v46 = vshrl.u32 %v1237_v8, 16  ;;  %v336_v17 = vld [vmem:[#allocation2 + $0xb0] sm:$0x1] }
 0x1f6   : > { %v1467_v45 = vrot.slane %v1465_v26, 4  ;;  %v1463_v47 = vsel %vm7423_vm10, %v1458_v32, %v1462_v12  ;;  %v1470_v50 = vrot.slane %v1468_v37, 5  ;;  %v1476_v51 = vrot.slane %v1474_v38, 5  ;;  %v333_v26 = vld [vmem:[#allocation2 + $0xa4] sm:$0x1] }
 0x1f7   : > { %v3230_v40 = vrot.slane %v3229_v33, 4  ;;  %v6050_v53 = vcombine.low %v1453_v10, %v1463_v47  ;;  %v3239_v14 = vor.u32 %v3238_v39, %v3234_v20  ;;  %v1480_v61 = vrot.slane %v1478_v46, 4  ;;  %v1238_v38 = vld [vmem:[#allocation2 + $0x6c] sm:$0xf] }
 0x1f8   : > { %v1484_v54 = vshll.u32 %v1261_v35, 16  ;;  %v1471_v56 = vor.u32 %v1470_v50, %v1467_v45  ;;  %v3247_v5 = vshrl.u32 %v3051_v42, 16  ;;  %v3250_v62 = vshll.u32 %v3051_v42, 16  ;;  %v1239_v42 = vld [vmem:[#allocation2 + $0x70] sm:$0xf] }
 0x1f9   : > { %v3235_v55 = vsel %vm7423_vm10, %v3230_v40, %v3234_v20  ;;  %6639 = vmatmul.mubr.msk.bf16.gmra.mrb[44].mxu0 %vm441_vm4, %v6050_v53  ;;  %v3240_v58 = vrot.slane %v3239_v14, 4  ;;  %v1481_v1 = vor.u32 %v1480_v61, %v1476_v51  ;;  %v3256_v60 = vshll.u32 %v3052_v52, 16 }
 0x1fa   : > { %v1486_v3 = vrot.slane %v1484_v54, 5  ;;  %v1472_v4 = vrot.slane %v1471_v56, 4  ;;  %v3249_v21 = vrot.slane %v3247_v5, 4  ;;  %v3252_v13 = vrot.slane %v3250_v62, 5 }
 0x1fb   : > { %v3260_v10 = vshrl.u32 %v3052_v52, 16  ;;  %v3245_v11 = vsel %vm7423_vm10, %v3240_v58, %v3244_v44  ;;  %v1482_v8 = vrot.slane %v1481_v1, 4  ;;  %v3258_v19 = vrot.slane %v3256_v60, 5  ;;  %v1199_v60 = vld [vmem:[#allocation2 + $0xa8] sm:$0xf] }
 0x1fc   : > { %v3266_v12 = vshll.u32 %v3053_v59, 16  ;;  %v6195_v18 = vcombine.low %v3235_v55, %v3245_v11  ;;  %v1477_v20 = vsel %vm7423_vm10, %v1472_v4, %v1476_v51  ;;  %v3253_v23 = vor.u32 %v3252_v13, %v3249_v21  ;;  %v1192_v21 = vld [vmem:[#allocation2 + $0x9c] sm:$0xf] }
 0x1fd   : > { %v3262_v24 = vrot.slane %v3260_v10, 4  ;;  %v1487_v32 = vsel %vm7423_vm10, %v1482_v8, %v1486_v3  ;;  %v633_v35 = vadd.f32 %v7701_v25, %v7673_v15  ;;  %v625_v37 = vadd.f32 %v7701_v25, %v7675_v22 }
 0x1fe   : > { %v3268_v33 = vrot.slane %v3266_v12, 5  ;;  %6774 = vmatprep.mubr.msk.bf16.mxu1 %vm441_vm4, %v6195_v18  ;;  %v6051_v39 = vcombine.low %v1477_v20, %v1487_v32  ;;  %v3254_v44 = vrot.slane %v3253_v23, 4  ;;  %v337_v46 = vsel %vm7391_vm7, 0, %v336_v17 }
 0x1ff   : > { %v3263_v45 = vor.u32 %v3262_v24, %v3258_v19  ;;  %v681_v47 = vmax.f32 %v633_v35, 0.0  ;;  %v679_v40 = vmax.f32 %v625_v37, 0.0  ;;  %338 = vst [vmem:[#allocation2 + $0xb0] sm:$0x1] %v337_v46  ;;  %v636_v50 = vadd.f32 %v7701_v25, %v7679_v34 }
 0x200   : > { %v334_v15 = vsel %vm7391_vm7, 0, %v333_v26  ;;  %6642 = vmatprep.mubr.msk.bf16.mxu0 %vm441_vm4, %v6051_v39  ;;  %v3259_v22 = vsel %vm7423_vm10, %v3254_v44, %v3258_v19  ;;  %v628_v52 = vadd.f32 %v7701_v25, %v7681_v43  ;;  %v1489_v53 = vshrl.u32 %v1238_v38, 16  ;;  %v1262_v19 = vld [vmem:[#allocation2 + $0x74] sm:$0x1]  ;;  %v3054_v26 = vld [vmem:[#allocation2 + $0x6c] sm:$0xf] }
 0x201   : > { %v3264_v51 = vrot.slane %v3263_v45, 4  ;;  %335 = vst [vmem:[#allocation2 + $0xa4] sm:$0x1] %v334_v15  ;;  %v6414_v14 = vpack.c.bf16 %v681_v47, %v681_v47  ;;  %v6412_v61 = vpack.c.bf16 %v679_v40, %v679_v40  ;;  %v682_v54 = vmax.f32 %v636_v50, 0.0 }
 0x202   : > { %v1492_v55 = vshll.u32 %v1238_v38, 16  ;;  %v680_v56 = vmax.f32 %v628_v52, 0.0  ;;  %v1491_v59 = vrot.slane %v1489_v53, 4  ;;  %v1498_v5 = vshll.u32 %v1239_v42, 16 }
 0x203   : > { %v3269_v34 = vsel %vm7423_vm10, %v3264_v51, %v3268_v33  ;;  %v1007_v58 = vshrl.u32 %v6414_v14, 16  ;;  %v1010_v1 = vshll.u32 %v6414_v14, 16  ;;  %v990_v3 = vshrl.u32 %v6412_v61, 16  ;;  %v7780_v14 = vld [vmem:[#allocation2 + $0x70] sm:$0xf] }
 0x204   : > { %v6196_v62 = vcombine.low %v3259_v22, %v3269_v34  ;;  %v993_v4 = vshll.u32 %v6412_v61, 16  ;;  %v6415_v13 = vpack.c.bf16 %v682_v54, %v682_v54  ;;  %v6413_v43 = vpack.c.bf16 %v680_v56, %v680_v56  ;;  %v3056_v61 = vld [vmem:[#allocation2 + $0x74] sm:$0x1] }
 0x205   : > { %v1494_v10 = vrot.slane %v1492_v55, 5  ;;  %v1009_v11 = vrot.slane %v1007_v58, 7  ;;  %v992_v8 = vrot.slane %v990_v3, 7  ;;  %v1500_v12 = vrot.slane %v1498_v5, 5  ;;  %v1241_v3 = vld [vmem:[#allocation2 + $0x7c] sm:$0xf] }
 0x206   : > { %6775 = vmatmul.mubr.msk.bf16.gmra.mrb[12].mxu1 %vm441_vm4, %v6196_v62  ;;  %v1502_v17 = vshrl.u32 %v1239_v42, 16  ;;  %v1015_v18 = vshrl.u32 %v6415_v13, 16  ;;  %v1018_v20 = vshll.u32 %v6415_v13, 16  ;;  %v998_v23 = vshrl.u32 %v6413_v43, 16  ;;  %v1203_v38 = vld [vmem:[#allocation2 + $0xb0] sm:$0x1] }
 0x207   : > { %v1001_v24 = vshll.u32 %v6413_v43, 16  ;;  %v1012_v32 = vor.u32 %v1010_v1, %v1009_v11  ;;  %v1013_v33 = vrot.slane %v1009_v11, 4  ;;  %v995_v35 = vor.u32 %v993_v4, %v992_v8  ;;  %v1263_v11 = vld [vmem:[#allocation2 + $0x80] sm:$0x1] }
 0x208   : > { %v996_v37 = vrot.slane %v992_v8, 4  ;;  %v1196_v39 = vld [vmem:[#allocation2 + $0xa4] sm:$0x1]  ;;  %v1017_v44 = vrot.slane %v1015_v18, 7  ;;  %v1000_v45 = vrot.slane %v998_v23, 7  ;;  %v1495_v46 = vor.u32 %v1494_v10, %v1491_v59 }
 0x209   : > { %v1504_v47 = vrot.slane %v1502_v17, 4  ;;  %v1200_v40 = vsel %vm7482_vm12, %v1012_v32, %v1199_v60  ;;  %v1193_v42 = vsel %vm7482_vm12, %v995_v35, %v1192_v21  ;;  %v1508_v50 = vshll.u32 %v1262_v19, 16  ;;  %v1240_v59 = vld [vmem:[#allocation2 + $0x78] sm:$0xf] }
 0x20a   : > { %v3271_v15 = vshrl.u32 %v3054_v26, 16  ;;  %1201 = vst [vmem:[#allocation2 + $0xa8] sm:$0xf] %v1200_v40  ;;  %1194 = vst [vmem:[#allocation2 + $0x9c] sm:$0xf] %v1193_v42  ;;  %v1020_v22 = vor.u32 %v1018_v20, %v1017_v44  ;;  %v1022_v51 = vrot.slane %v1017_v44, 4  ;;  %v1003_v52 = vor.u32 %v1001_v24, %v1000_v45 }
 0x20b   : > { %v1005_v53 = vrot.slane %v1000_v45, 4  ;;  %v1496_v54 = vrot.slane %v1495_v46, 4  ;;  %v1505_v55 = vor.u32 %v1504_v47, %v1500_v12  ;;  %v1510_v34 = vrot.slane %v1508_v50, 5  ;;  %v3057_v24 = vld [vmem:[#allocation2 + $0x78] sm:$0xf] }
 0x20c   : > { %v3273_v56 = vrot.slane %v3271_v15, 4  ;;  %v1021_v5 = vsel %vm7487_vm13, %v1013_v33, %v1020_v22  ;;  %v1204_v62 = vsel %vm7368_vm3, %v1022_v51, %v1203_v38  ;;  %v1004_v58 = vsel %vm7487_vm13, %v996_v37, %v1003_v52  ;;  %v7801_v22 = vld [vmem:[#allocation2 + $0x80] sm:$0x1] }
 0x20d   : > { %v1197_v1 = vsel %vm7368_vm3, %v1005_v53, %v1196_v39  ;;  %1202 = vst.msk [vmem:[#allocation2 + $0xac] sm:$0xf] %vm226_vm6, %v1021_v5  ;;  %1205 = vst [vmem:[#allocation2 + $0xb0] sm:$0x1] %v1204_v62  ;;  %v1501_v60 = vsel %vm7423_vm10, %v1496_v54, %v1500_v12  ;;  %v1506_v4 = vrot.slane %v1505_v55, 4  ;;  %v3274_v21 = vshll.u32 %v3054_v26, 16 }
 0x20e   : > { %1195 = vst.msk [vmem:[#allocation2 + $0xa0] sm:$0xf] %vm226_vm6, %v1004_v58  ;;  %1198 = vst [vmem:[#allocation2 + $0xa4] sm:$0x1] %v1197_v1  ;;  %v3280_v13 = vshll.u32 %v7780_v14, 16  ;;  %v3284_v43 = vshrl.u32 %v7780_v14, 16 }
 0x20f   : > { %v3290_v10 = vshll.u32 %v3056_v61, 16  ;;  %v1513_v8 = vshrl.u32 %v1240_v59, 16  ;;  %v1516_v19 = vshll.u32 %v1240_v59, 16  ;;  %v1511_v17 = vsel %vm7423_vm10, %v1506_v4, %v1510_v34  ;;  %v7798_v26 = vld [vmem:[#allocation2 + $0x7c] sm:$0xf] }
 0x210   : > { %v3276_v18 = vrot.slane %v3274_v21, 5  ;;  %v3282_v20 = vrot.slane %v3280_v13, 5  ;;  %v1522_v23 = vshll.u32 %v1241_v3, 16  ;;  %v6052_v32 = vcombine.low %v1501_v60, %v1511_v17  ;;  %v286_v55 = vld [vmem:[#allocation2 + $0xc0] sm:$0x1] }
 0x211   : > { %v3286_v33 = vrot.slane %v3284_v43, 4  ;;  %v3292_v12 = vrot.slane %v3290_v10, 5  ;;  %v1515_v35 = vrot.slane %v1513_v8, 4  ;;  %v1518_v38 = vrot.slane %v1516_v19, 5  ;;  %v283_v60 = vld [vmem:[#allocation2 + $0xb4] sm:$0x1] }
 0x212   : > { %v3277_v37 = vor.u32 %v3276_v18, %v3273_v56  ;;  %v1524_v39 = vrot.slane %v1522_v23, 5  ;;  %v1526_v44 = vshrl.u32 %v1241_v3, 16  ;;  %6643 = vmatmul.mubr.msk.bf16.gmra.mrb[48].mxu0 %vm441_vm4, %v6052_v32  ;;  %v1532_v46 = vshll.u32 %v1263_v11, 16  ;;  %v342_v4 = vld [vmem:[#allocation2 + $0xc8] sm:$0x1] }
 0x213   : > { %v3287_v45 = vor.u32 %v3286_v33, %v3282_v20  ;;  %v3295_v47 = vshrl.u32 %v3057_v24, 16  ;;  %v3298_v40 = vshll.u32 %v3057_v24, 16  ;;  %v1519_v50 = vor.u32 %v1518_v38, %v1515_v35  ;;  %v339_v18 = vld [vmem:[#allocation2 + $0xbc] sm:$0x1]  ;;  %v7825_v33 = vld [vmem:[#allocation2 + $0x84] sm:$0xf] }
 0x214   : > { %v3278_v42 = vrot.slane %v3277_v37, 4  ;;  %v1528_v15 = vrot.slane %v1526_v44, 4  ;;  %v3304_v51 = vshll.u32 %v7798_v26, 16  ;;  %v1534_v53 = vrot.slane %v1532_v46, 5  ;;  %v7829_v38 = vld [vmem:[#allocation2 + $0x88] sm:$0xf] }
 0x215   : > { %v3288_v52 = vrot.slane %v3287_v45, 4  ;;  %v3297_v61 = vrot.slane %v3295_v47, 4  ;;  %v3300_v54 = vrot.slane %v3298_v40, 5  ;;  %v1520_v56 = vrot.slane %v1519_v50, 4 }
 0x216   : > { %v3283_v34 = vsel %vm7423_vm10, %v3278_v42, %v3282_v20  ;;  %v1529_v59 = vor.u32 %v1528_v15, %v1524_v39  ;;  %v3306_v5 = vrot.slane %v3304_v51, 5  ;;  %v3308_v1 = vshrl.u32 %v7798_v26, 16 }
 0x217   : > { %v3293_v62 = vsel %vm7423_vm10, %v3288_v52, %v3292_v12  ;;  %v3301_v58 = vor.u32 %v3300_v54, %v3297_v61  ;;  %v3314_v3 = vshll.u32 %v7801_v22, 16  ;;  %v1525_v13 = vsel %vm7423_vm10, %v1520_v56, %v1524_v39  ;;  %v1264_v56 = vld [vmem:[#allocation2 + $0x8c] sm:$0x1] }
 0x218   : > { %v6197_v21 = vcombine.low %v3283_v34, %v3293_v62  ;;  %v1530_v43 = vrot.slane %v1529_v59, 4  ;;  %v287_v10 = vsel %vm7368_vm3, 0, %v286_v55  ;;  %v3310_v8 = vrot.slane %v3308_v1, 4 }
 0x219   : > { %v3302_v11 = vrot.slane %v3301_v58, 4  ;;  %v3316_v19 = vrot.slane %v3314_v3, 5  ;;  %288 = vst [vmem:[#allocation2 + $0xc0] sm:$0x1] %v287_v10  ;;  %v649_v17 = vadd.f32 %v7701_v25, %v7719_v57  ;;  %v284_v23 = vsel %vm7368_vm3, 0, %v283_v60 }
 0x21a   : > { %6778 = vmatprep.mubr.msk.bf16.mxu1 %vm441_vm4, %v6197_v21  ;;  %v1535_v20 = vsel %vm7423_vm10, %v1530_v43, %v1534_v53  ;;  %v641_v24 = vadd.f32 %v7701_v25, %v7721_v63  ;;  %v343_v32 = vsel %vm7391_vm7, 0, %v342_v4  ;;  %v3311_v35 = vor.u32 %v3310_v8, %v3306_v5  ;;  %285 = vst [vmem:[#allocation2 + $0xb4] sm:$0x1] %v284_v23  ;;  %v3060_v23 = vld [vmem:[#allocation2 + $0x84] sm:$0xf] }
 0x21b   : > { %v6053_v12 = vcombine.low %v1525_v13, %v1535_v20  ;;  %v3307_v57 = vsel %vm7423_vm10, %v3302_v11, %v3306_v5  ;;  %v685_v37 = vmax.f32 %v649_v17, 0.0  ;;  %344 = vst [vmem:[#allocation2 + $0xc8] sm:$0x1] %v343_v32  ;;  %v652_v44 = vadd.f32 %v7701_v25, %v7723_v9 }
 0x21c   : > { %v683_v39 = vmax.f32 %v641_v24, 0.0  ;;  %v340_v63 = vsel %vm7391_vm7, 0, %v339_v18  ;;  %v644_v45 = vadd.f32 %v7701_v25, %v7727_v16  ;;  %v3312_v46 = vrot.slane %v3311_v35, 4 }
 0x21d   : > { %6646 = vmatprep.mubr.msk.bf16.mxu0 %vm441_vm4, %v6053_v12  ;;  %v6418_v47 = vpack.c.bf16 %v685_v37, %v685_v37  ;;  %341 = vst [vmem:[#allocation2 + $0xbc] sm:$0x1] %v340_v63  ;;  %v1537_v40 = vshrl.u32 %v7825_v33, 16  ;;  %v1540_v42 = vshll.u32 %v7825_v33, 16  ;;  %v686_v15 = vmax.f32 %v652_v44, 0.0 }
 0x21e   : > { %v6416_v50 = vpack.c.bf16 %v683_v39, %v683_v39  ;;  %v684_v51 = vmax.f32 %v644_v45, 0.0  ;;  %v1546_v9 = vshll.u32 %v7829_v38, 16  ;;  %v3317_v52 = vsel %vm7423_vm10, %v3312_v46, %v3316_v19 }
 0x21f   : > { %v1041_v53 = vshrl.u32 %v6418_v47, 16  ;;  %v1044_v61 = vshll.u32 %v6418_v47, 16  ;;  %v1539_v25 = vrot.slane %v1537_v40, 4  ;;  %v6198_v16 = vcombine.low %v3307_v57, %v3317_v52 }
 0x220   : > { %v1024_v54 = vshrl.u32 %v6416_v50, 16  ;;  %v1027_v55 = vshll.u32 %v6416_v50, 16  ;;  %v6419_v34 = vpack.c.bf16 %v686_v15, %v686_v15  ;;  %v6417_v5 = vpack.c.bf16 %v684_v51, %v684_v51  ;;  %v1213_v1 = vld [vmem:[#allocation2 + $0xc0] sm:$0xf]  ;;  %v7849_v50 = vld [vmem:[#allocation2 + $0x88] sm:$0xf] }
 0x221   : > { %v1043_v59 = vrot.slane %v1041_v53, 7  ;;  %v1542_v62 = vrot.slane %v1540_v42, 5  ;;  %v1548_v58 = vrot.slane %v1546_v9, 5  ;;  %6779 = vmatmul.mubr.msk.bf16.gmra.mrb[16].mxu1 %vm441_vm4, %v6198_v16  ;;  %v1550_v21 = vshrl.u32 %v7829_v38, 16  ;;  %v1206_v10 = vld [vmem:[#allocation2 + $0xb4] sm:$0xf] }
 0x222   : > { %v1026_v3 = vrot.slane %v1024_v54, 7  ;;  %v1049_v60 = vshrl.u32 %v6419_v34, 16  ;;  %v1052_v4 = vshll.u32 %v6419_v34, 16  ;;  %v1032_v11 = vshrl.u32 %v6417_v5, 16  ;;  %v1217_v32 = vld [vmem:[#allocation2 + $0xc8] sm:$0x1] }
 0x223   : > { %v1046_v13 = vor.u32 %v1044_v61, %v1043_v59  ;;  %v1047_v43 = vrot.slane %v1043_v59, 4  ;;  %v1035_v8 = vshll.u32 %v6417_v5, 16  ;;  %v1543_v20 = vor.u32 %v1542_v62, %v1539_v25  ;;  %v7851_v15 = vld [vmem:[#allocation2 + $0x8c] sm:$0x1]  ;;  %v7859_v53 = vld [vmem:[#allocation2 + $0x90] sm:$0xf] }
 0x224   : > { %v1029_v19 = vor.u32 %v1027_v55, %v1026_v3  ;;  %v1030_v17 = vrot.slane %v1026_v3, 4  ;;  %v1051_v18 = vrot.slane %v1049_v60, 7  ;;  %v1034_v12 = vrot.slane %v1032_v11, 7  ;;  %v1210_v63 = vld [vmem:[#allocation2 + $0xbc] sm:$0x1] }
 0x225   : > { %v1214_v24 = vsel %vm7482_vm12, %v1046_v13, %v1213_v1  ;;  %v1552_v57 = vrot.slane %v1550_v21, 4  ;;  %v1556_v35 = vshll.u32 %v1264_v56, 16  ;;  %v1544_v45 = vrot.slane %v1543_v20, 4  ;;  %v7861_v61 = vld [vmem:[#allocation2 + $0x94] sm:$0xf] }
 0x226   : > { %1215 = vst [vmem:[#allocation2 + $0xc0] sm:$0xf] %v1214_v24  ;;  %v1207_v37 = vsel %vm7482_vm12, %v1029_v19, %v1206_v10  ;;  %v1054_v39 = vor.u32 %v1052_v4, %v1051_v18  ;;  %v1056_v44 = vrot.slane %v1051_v18, 4  ;;  %v1037_v46 = vor.u32 %v1035_v8, %v1034_v12  ;;  %v1265_v34 = vld [vmem:[#allocation2 + $0x98] sm:$0x1] }
 0x227   : > { %1208 = vst [vmem:[#allocation2 + $0xb4] sm:$0xf] %v1207_v37  ;;  %v1039_v47 = vrot.slane %v1034_v12, 4  ;;  %v1553_v40 = vor.u32 %v1552_v57, %v1548_v58  ;;  %v1558_v42 = vrot.slane %v1556_v35, 5  ;;  %v1549_v9 = vsel %vm7423_vm10, %v1544_v45, %v1548_v58  ;;  %v3063_v56 = vld [vmem:[#allocation2 + $0x90] sm:$0xf] }
 0x228   : > { %v1055_v51 = vsel %vm7487_vm13, %v1047_v43, %v1054_v39  ;;  %v1218_v30 = vsel %vm7368_vm3, %v1056_v44, %v1217_v32  ;;  %v3319_v52 = vshrl.u32 %v3060_v23, 16  ;;  %v1038_v25 = vsel %vm7487_vm13, %v1030_v17, %v1037_v46  ;;  %v7881_v35 = vld [vmem:[#allocation2 + $0x98] sm:$0x1] }
 0x229   : > { %1216 = vst.msk [vmem:[#allocation2 + $0xc4] sm:$0xf] %vm226_vm6, %v1055_v51  ;;  %1219 = vst [vmem:[#allocation2 + $0xc8] sm:$0x1] %v1218_v30  ;;  %v1211_v16 = vsel %vm7368_vm3, %v1039_v47, %v1210_v63  ;;  %v1554_v54 = vrot.slane %v1553_v40, 4  ;;  %v3322_v55 = vshll.u32 %v3060_v23, 16 }
 0x22a   : > { %1209 = vst.msk [vmem:[#allocation2 + $0xb8] sm:$0xf] %vm226_vm6, %v1038_v25  ;;  %1212 = vst [vmem:[#allocation2 + $0xbc] sm:$0x1] %v1211_v16  ;;  %v3321_v59 = vrot.slane %v3319_v52, 4  ;;  %v3328_v5 = vshll.u32 %v7849_v50, 16 }
 0x22b   : > { %v3332_v62 = vshrl.u32 %v7849_v50, 16  ;;  %v3338_v58 = vshll.u32 %v7851_v15, 16  ;;  %v1559_v41 = vsel %vm7423_vm10, %v1554_v54, %v1558_v42  ;;  %v3324_v1 = vrot.slane %v3322_v55, 5  ;;  %v7879_v23 = vld [vmem:[#allocation2 + $0x94] sm:$0xf] }
 0x22c   : > { %v1561_v3 = vshrl.u32 %v7859_v53, 16  ;;  %v1564_v60 = vshll.u32 %v7859_v53, 16  ;;  %v6054_v4 = vcombine.low %v1549_v9, %v1559_v41  ;;  %v3330_v21 = vrot.slane %v3328_v5, 5  ;;  %v7886_v51 = vld [vmem:[#allocation2 + $0x9c] sm:$0xf] }
 0x22d   : > { %v3334_v13 = vrot.slane %v3332_v62, 4  ;;  %v3340_v43 = vrot.slane %v3338_v58, 5  ;;  %v3325_v10 = vor.u32 %v3324_v1, %v3321_v59  ;;  %v1570_v19 = vshll.u32 %v7861_v61, 16  ;;  %v7892_v16 = vld [vmem:[#allocation2 + $0xa0] sm:$0xf] }
 0x22e   : > { %v1563_v11 = vrot.slane %v1561_v3, 4  ;;  %v1566_v8 = vrot.slane %v1564_v60, 5  ;;  %6647 = vmatmul.mubr.msk.bf16.gmra.mrb[52].mxu0 %vm441_vm4, %v6054_v4  ;;  %v1574_v18 = vshrl.u32 %v7861_v61, 16  ;;  %v1580_v20 = vshll.u32 %v1265_v34, 16  ;;  %v7896_v59 = vld [vmem:[#allocation2 + $0xa4] sm:$0x1] }
 0x22f   : > { %v3335_v17 = vor.u32 %v3334_v13, %v3330_v21  ;;  %v3343_v24 = vshrl.u32 %v3063_v56, 16  ;;  %v3326_v32 = vrot.slane %v3325_v10, 4  ;;  %v1572_v57 = vrot.slane %v1570_v19, 5 }
 0x230   : > { %v1567_v12 = vor.u32 %v1566_v8, %v1563_v11  ;;  %v3346_v37 = vshll.u32 %v3063_v56, 16  ;;  %v1576_v44 = vrot.slane %v1574_v18, 4  ;;  %v1582_v63 = vrot.slane %v1580_v20, 5  ;;  %v7906_v8 = vld [vmem:[#allocation2 + $0xa0] sm:$0xf] }
 0x231   : > { %v3336_v39 = vrot.slane %v3335_v17, 4  ;;  %v3345_v45 = vrot.slane %v3343_v24, 4  ;;  %v3331_v46 = vsel %vm7423_vm10, %v3326_v32, %v3330_v21  ;;  %v3352_v42 = vshll.u32 %v7879_v23, 16  ;;  %v3066_v21 = vld [vmem:[#allocation2 + $0x9c] sm:$0xf] }
 0x232   : > { %v1568_v47 = vrot.slane %v1567_v12, 4  ;;  %v3348_v40 = vrot.slane %v3346_v37, 5  ;;  %v1577_v9 = vor.u32 %v1576_v44, %v1572_v57  ;;  %v3356_v52 = vshrl.u32 %v7879_v23, 16  ;;  %v7910_v24 = vld [vmem:[#allocation2 + $0xa4] sm:$0x1] }
 0x233   : > { %v3341_v30 = vsel %vm7423_vm10, %v3336_v39, %v3340_v43  ;;  %v3362_v25 = vshll.u32 %v7881_v35, 16  ;;  %v3354_v56 = vrot.slane %v3352_v42, 5  ;;  %v1585_v41 = vshrl.u32 %v7886_v51, 16  ;;  %v7912_v32 = vld [vmem:[#allocation2 + $0xa8] sm:$0xf] }
 0x234   : > { %v6199_v54 = vcombine.low %v3331_v46, %v3341_v30  ;;  %v1573_v55 = vsel %vm7423_vm10, %v1568_v47, %v1572_v57  ;;  %v3349_v34 = vor.u32 %v3348_v40, %v3345_v45  ;;  %v1578_v5 = vrot.slane %v1577_v9, 4  ;;  %v7914_v44 = vld [vmem:[#allocation2 + $0xac] sm:$0xf] }
 0x235   : > { %v3358_v62 = vrot.slane %v3356_v52, 4  ;;  %v3364_v58 = vrot.slane %v3362_v25, 5  ;;  %v1588_v3 = vshll.u32 %v7886_v51, 16  ;;  %v1594_v60 = vshll.u32 %v7892_v16, 16 }
 0x236   : > { %6782 = vmatprep.mubr.msk.bf16.mxu1 %vm441_vm4, %v6199_v54  ;;  %v3350_v1 = vrot.slane %v3349_v34, 4  ;;  %v1598_v4 = vshrl.u32 %v7892_v16, 16  ;;  %v1583_v13 = vsel %vm7423_vm10, %v1578_v5, %v1582_v63  ;;  %v1587_v10 = vrot.slane %v1585_v41, 4 }
 0x237   : > { %v3359_v43 = vor.u32 %v3358_v62, %v3354_v56  ;;  %v1604_v11 = vshll.u32 %v7896_v59, 16  ;;  %v6055_v19 = vcombine.low %v1573_v55, %v1583_v13  ;;  %v1590_v18 = vrot.slane %v1588_v3, 5 }
 0x238   : > { %v3355_v17 = vsel %vm7423_vm10, %v3350_v1, %v3354_v56  ;;  %v1596_v20 = vrot.slane %v1594_v60, 5  ;;  %v1600_v57 = vrot.slane %v1598_v4, 4  ;;  %v3367_v39 = vshrl.u32 %v3066_v21, 16  ;;  %v3069_v4 = vld [vmem:[#allocation2 + $0xa8] sm:$0xf] }
 0x239   : > { %v3360_v12 = vrot.slane %v3359_v43, 4  ;;  %v1606_v37 = vrot.slane %v1604_v11, 5  ;;  %6650 = vmatprep.mubr.msk.bf16.mxu0 %vm441_vm4, %v6055_v19  ;;  %v1591_v63 = vor.u32 %v1590_v18, %v1587_v10  ;;  %v3370_v45 = vshll.u32 %v3066_v21, 16  ;;  %v7933_v11 = vld [vmem:[#allocation2 + $0xac] sm:$0xf] }
 0x23a   : > { %v3376_v46 = vshll.u32 %v7906_v8, 16  ;;  %v3380_v47 = vshrl.u32 %v7906_v8, 16  ;;  %v1601_v42 = vor.u32 %v1600_v57, %v1596_v20  ;;  %v3369_v30 = vrot.slane %v3367_v39, 4 }
 0x23b   : > { %v3365_v40 = vsel %vm7423_vm10, %v3360_v12, %v3364_v58  ;;  %v3386_v9 = vshll.u32 %v7910_v24, 16  ;;  %v1592_v25 = vrot.slane %v1591_v63, 4  ;;  %v3372_v54 = vrot.slane %v3370_v45, 5  ;;  %v7926_v58 = vld [vmem:[#allocation2 + $0xb0] sm:$0x1] }
 0x23c   : > { %v6200_v52 = vcombine.low %v3355_v17, %v3365_v40  ;;  %v3378_v55 = vrot.slane %v3376_v46, 5  ;;  %v1602_v34 = vrot.slane %v1601_v42, 4  ;;  %v3382_v56 = vrot.slane %v3380_v47, 4  ;;  %v7939_v46 = vld [vmem:[#allocation2 + $0xb0] sm:$0x1] }
 0x23d   : > { %v3388_v5 = vrot.slane %v3386_v9, 5  ;;  %v1609_v62 = vshrl.u32 %v7912_v32, 16  ;;  %v1597_v41 = vsel %vm7423_vm10, %v1592_v25, %v1596_v20  ;;  %v3373_v1 = vor.u32 %v3372_v54, %v3369_v30  ;;  %v7942_v42 = vld [vmem:[#allocation2 + $0xb4] sm:$0xf]  ;;  %v7946_v54 = vld [vmem:[#allocation2 + $0xb8] sm:$0xf] }
 0x23e   : > { %6783 = vmatmul.mubr.msk.bf16.gmra.mrb[20].mxu1 %vm441_vm4, %v6200_v52  ;;  %v1612_v3 = vshll.u32 %v7912_v32, 16  ;;  %v1618_v60 = vshll.u32 %v7914_v44, 16  ;;  %v1607_v21 = vsel %vm7423_vm10, %v1602_v34, %v1606_v37  ;;  %v3383_v13 = vor.u32 %v3382_v56, %v3378_v55 }
 0x23f   : > { %v1611_v43 = vrot.slane %v1609_v62, 4  ;;  %v1622_v10 = vshrl.u32 %v7914_v44, 16  ;;  %v6056_v19 = vcombine.low %v1597_v41, %v1607_v21  ;;  %v3374_v17 = vrot.slane %v3373_v1, 4  ;;  %v7954_v21 = vld [vmem:[#allocation2 + $0xbc] sm:$0x1] }
 0x240   : > { %v1614_v18 = vrot.slane %v1612_v3, 5  ;;  %v1620_v20 = vrot.slane %v1618_v60, 5  ;;  %v3384_v12 = vrot.slane %v3383_v13, 4  ;;  %v1628_v39 = vshll.u32 %v7926_v58, 16 }
 0x241   : > { %v1624_v57 = vrot.slane %v1622_v10, 4  ;;  %v3391_v63 = vshrl.u32 %v3069_v4, 16  ;;  %6651 = vmatmul.mubr.msk.bf16.gmra.mrb[56].mxu0 %vm441_vm4, %v6056_v19  ;;  %v3379_v37 = vsel %vm7423_vm10, %v3374_v17, %v3378_v55  ;;  %v3394_v47 = vshll.u32 %v3069_v4, 16  ;;  %v3072_v10 = vld [vmem:[#allocation2 + $0xb4] sm:$0xf] }
 0x242   : > { %v1615_v45 = vor.u32 %v1614_v18, %v1611_v43  ;;  %v3400_v40 = vshll.u32 %v7933_v11, 16  ;;  %v3389_v30 = vsel %vm7423_vm10, %v3384_v12, %v3388_v5  ;;  %v1630_v52 = vrot.slane %v1628_v39, 5 }
 0x243   : > { %v1625_v9 = vor.u32 %v1624_v57, %v1620_v20  ;;  %v3393_v25 = vrot.slane %v3391_v63, 4  ;;  %v6201_v34 = vcombine.low %v3379_v37, %v3389_v30  ;;  %v3396_v62 = vrot.slane %v3394_v47, 5  ;;  %v7960_v57 = vld [vmem:[#allocation2 + $0xb8] sm:$0xf]  ;;  %v3075_v47 = vld [vmem:[#allocation2 + $0xc0] sm:$0xf] }
 0x244   : > { %v1616_v56 = vrot.slane %v1615_v45, 4  ;;  %v3402_v55 = vrot.slane %v3400_v40, 5  ;;  %v3404_v1 = vshrl.u32 %v7933_v11, 16  ;;  %v3410_v3 = vshll.u32 %v7939_v46, 16  ;;  %v7962_v45 = vld [vmem:[#allocation2 + $0xbc] sm:$0x1] }
 0x245   : > { %v1626_v41 = vrot.slane %v1625_v9, 4  ;;  %v1633_v60 = vshrl.u32 %v7942_v42, 16  ;;  %6786 = vmatprep.mubr.msk.bf16.mxu1 %vm441_vm4, %v6201_v34  ;;  %v3397_v4 = vor.u32 %v3396_v62, %v3393_v25  ;;  %v1636_v13 = vshll.u32 %v7942_v42, 16 }
 0x246   : > { %v1621_v5 = vsel %vm7423_vm10, %v1616_v56, %v1620_v20  ;;  %v1642_v43 = vshll.u32 %v7946_v54, 16  ;;  %v3406_v17 = vrot.slane %v3404_v1, 4  ;;  %v3412_v18 = vrot.slane %v3410_v3, 5 }
 0x247   : > { %v1631_v19 = vsel %vm7423_vm10, %v1626_v41, %v1630_v52  ;;  %v1635_v12 = vrot.slane %v1633_v60, 4  ;;  %v3398_v63 = vrot.slane %v3397_v4, 4  ;;  %v1638_v37 = vrot.slane %v1636_v13, 5 }
 0x248   : > { %v6057_v39 = vcombine.low %v1621_v5, %v1631_v19  ;;  %v1644_v20 = vrot.slane %v1642_v43, 5  ;;  %v3407_v40 = vor.u32 %v3406_v17, %v3402_v55  ;;  %v1646_v30 = vshrl.u32 %v7946_v54, 16 }
 0x249   : > { %v1652_v9 = vshll.u32 %v7954_v21, 16  ;;  %v3415_v52 = vshrl.u32 %v3072_v10, 16  ;;  %v1639_v25 = vor.u32 %v1638_v37, %v1635_v12  ;;  %v3418_v34 = vshll.u32 %v3072_v10, 16  ;;  %v7974_v10 = vld [vmem:[#allocation2 + $0xc4] sm:$0xf] }
 0x24a   : > { %6654 = vmatprep.mubr.msk.bf16.mxu0 %vm441_vm4, %v6057_v39  ;;  %v3424_v56 = vshll.u32 %v7960_v57, 16  ;;  %v3403_v62 = vsel %vm7423_vm10, %v3398_v63, %v3402_v55  ;;  %v3408_v41 = vrot.slane %v3407_v40, 4  ;;  %v1648_v1 = vrot.slane %v1646_v30, 4 }
 0x24b   : > { %v3417_v3 = vrot.slane %v3415_v52, 4  ;;  %v1640_v60 = vrot.slane %v1639_v25, 4  ;;  %v3420_v5 = vrot.slane %v3418_v34, 5  ;;  %v3428_v13 = vshrl.u32 %v7960_v57, 16  ;;  %v7978_v52 = vld [vmem:[#allocation2 + $0xc8] sm:$0x1] }
 0x24c   : > { %v3426_v4 = vrot.slane %v3424_v56, 5  ;;  %v3413_v43 = vsel %vm7423_vm10, %v3408_v41, %v3412_v18  ;;  %v1649_v19 = vor.u32 %v1648_v1, %v1644_v20  ;;  %v3434_v17 = vshll.u32 %v7962_v45, 16 }
 0x24d   : > { %v3439_v12 = vshrl.u32 %v3075_v47, 16  ;;  %v3830_v55 = vrot.slane %v3828_v0, 4  ;;  %v6202_v39 = vcombine.low %v3403_v62, %v3413_v43  ;;  %v3421_v63 = vor.u32 %v3420_v5, %v3417_v3 }
 0x24e   : > { %v3430_v37 = vrot.slane %v3428_v13, 4  ;;  %v1650_v40 = vrot.slane %v1649_v19, 4  ;;  %v1654_v30 = vrot.slane %v1652_v9, 5  ;;  %v3442_v34 = vshll.u32 %v3075_v47, 16 }
 0x24f   : > { %v3441_v25 = vrot.slane %v3439_v12, 4  ;;  %6787 = vmatmul.mubr.msk.bf16.gmra.mrb[24].mxu1 %vm441_vm4, %v6202_v39  ;;  %v3422_v18 = vrot.slane %v3421_v63, 4  ;;  %v3448_v41 = vshll.u32 %v7974_v10, 16  ;;  %v3452_v1 = vshrl.u32 %v7974_v10, 16 }
 0x250   : > { %v3431_v56 = vor.u32 %v3430_v37, %v3426_v4  ;;  %v1645_v62 = vsel %vm7423_vm10, %v1640_v60, %v1644_v20  ;;  %v1655_v3 = vsel %vm7423_vm10, %v1650_v40, %v1654_v30  ;;  %v3436_v9 = vrot.slane %v3434_v17, 5  ;;  %v3756_v60 = vld [vmem:[#allocation2 + $0x18] sm:$0xe]  ;;  %v7999_v17 = vld [vmem:[%s9155_s3 + $0x4] sm:$0x3] }
 0x251   : > { %v3444_v5 = vrot.slane %v3442_v34, 5  ;;  %v6058_v13 = vcombine.low %v1645_v62, %v1655_v3  ;;  %v3450_v47 = vrot.slane %v3448_v41, 5  ;;  %v3458_v19 = vshll.u32 %v7978_v52, 16  ;;  %v7249_v30 = vld [vmem:[%s9155_s3] sm:$0x3] }
 0x252   : > { %v3432_v43 = vrot.slane %v3431_v56, 4  ;;  %v3427_v12 = vsel %vm7423_vm10, %v3422_v18, %v3426_v4  ;;  %v3454_v63 = vrot.slane %v3452_v1, 4  ;;  %v6221_v20 = vrot.slane %v3755_v7, 9  ;;  %v8010_v34 = vld [vmem:[#allocation2 + $0x4] sm:$0xf] }
 0x253   : > { %v3445_v39 = vor.u32 %v3444_v5, %v3441_v25  ;;  %6655 = vmatmul.mubr.msk.bf16.gmra.mrb[60].mxu0 %vm441_vm4, %v6058_v13  ;;  %v3823_v40 = vrot.slane %v3821_v27, 4  ;;  %v2050_v7 = vsel %vm490_vm0, %v7249_v30, 0  ;;  %v7250_v25 = vld [vmem:[#allocation2] sm:$0xf]  ;;  %v9187_v5 = vrot.slane %v7575_v36, 5 }
 0x254   : > { %v3437_v4 = vsel %vm7423_vm10, %v3432_v43, %v3436_v9  ;;  %v6076_v18 = vcombine.low %v7250_v25, %v8010_v34  ;;  %v3455_v1 = vor.u32 %v3454_v63, %v3450_v47  ;;  %6659 = vmatpush3.bf16.msra.mxu0 %v2050_v7  ;;  %v3822_v62 = vsel %vm7992_vm1, %v6221_v20, %v3821_v27  ;;  %v7253_v20 = vld [vmem:[#allocation2 + $0xc] sm:$0xf]  ;;  %v3757_v7 = vld [vmem:[#allocation2 + $0x24] sm:$0xe]  ;;  %v7258_v25 = vld [vmem:[#allocation2 + $0x40] sm:$0xf] }
 0x255   : > { %v6203_v56 = vcombine.low %v3427_v12, %v3437_v4  ;;  %v3446_v41 = vrot.slane %v3445_v39, 4  ;;  %v3825_v3 = vsel %vm7992_vm1, %v3823_v40, %v3824_v49  ;;  %v6222_v9 = vrot.slane %v3756_v60, 9  ;;  %7189 = vmatprep.subr.msk.bf16.mxu0 %vm490_vm0, %v7999_v17  ;;  %v7252_v49 = vld [vmem:[#allocation2 + $0x28] sm:$0xf]  ;;  %v8037_v60 = vld [vmem:[#allocation2 + $0x10] sm:$0xf] }
 0x256   : > { %6660 = vmatprep.mubr.msk.bf16.mxu0 %vm441_vm4, %v6076_v18  ;;  %v3832_v13 = vsel %vm7992_vm1, %v3830_v55, %v9187_v5  ;;  %v3456_v2 = vrot.slane %v3455_v1, 4  ;;  %v3460_v27 = vrot.slane %v3458_v19, 5  ;;  %v6237_v43 = vcombine.low %v3822_v62, %v3825_v3  ;;  %v7255_v4 = vld [vmem:[#allocation2 + $0x18] sm:$0xf]  ;;  %v7257_v40 = vld [vmem:[#allocation2 + $0x34] sm:$0xf] }
 0x257   : > { %6790 = vmatprep.mubr.msk.bf16.mxu1 %vm441_vm4, %v6203_v56  ;;  %v3829_v29 = vsel %vm7992_vm1, %v6222_v9, %v3828_v0  ;;  %v3835_v12 = vrot.slane %v7252_v49, 5  ;;  %v3451_v36 = vsel %vm7423_vm10, %v3446_v41, %v3450_v47  ;;  %v6077_v19 = vcombine.low %v7253_v20, %v8037_v60  ;;  %v7259_v56 = vld [vmem:[#allocation2 + $0x2c] sm:$0x1]  ;;  %v3758_v3 = vld [vmem:[#allocation2 + $0x30] sm:$0xe] }
 0x258   : > { %v3461_v55 = vsel %vm7423_vm10, %v3456_v2, %v3460_v27  ;;  %v6238_v39 = vcombine.low %v3829_v29, %v3832_v13  ;;  %v6078_v0 = vcombine.low %v7255_v4, %v8040_v28  ;;  %v3842_v30 = vrot.slane %v7257_v40, 5  ;;  %v7260_v5 = vld [vmem:[#allocation2 + $0x4c] sm:$0xf]  ;;  %v7262_v49 = vld [vmem:[#allocation2 + $0x24] sm:$0xf] }
 0x259   : > { %v6204_v63 = vcombine.low %v3451_v36, %v3461_v55  ;;  %v3837_v47 = vrot.slane %v3835_v12, 4  ;;  %v3849_v18 = vrot.slane %v7258_v25, 5  ;;  %v3838_v41 = vrot.slane %v7259_v56, 5  ;;  %v7261_v2 = vld [vmem:[%s9155_s3 + $0xc] sm:$0x3] }
 0x25a   : > { %v6223_v1 = vrot.slane %v3757_v7, 9  ;;  %v3844_v9 = vrot.slane %v3842_v30, 4  ;;  %v3856_v13 = vrot.slane %v7260_v5, 5  ;;  %v4391_v27 = vsel %vm490_vm0, %v7261_v2, 0  ;;  %v8055_v36 = vld [vmem:[#allocation2 + $0x28] sm:$0xf] }
 0x25b   : > { %6791 = vmatmul.mubr.msk.bf16.gmra.mrb[28].mxu1 %vm441_vm4, %v6204_v63  ;;  %6661 = vmatmul.mubr.msk.bf16.vlgmr.msra.gmra.mrb[32].mxu0 %vm441_vm4, %v6077_v19  ;;  %v3839_v62 = vsel %vm7992_vm1, %v3837_v47, %v3838_v41  ;;  %v6079_v55 = vcombine.low %v7262_v49, %v8055_v36  ;;  %v7264_v63 = vld [vmem:[#allocation2 + $0x38] sm:$0x1]  ;;  %v3759_v19 = vld [vmem:[#allocation2 + $0x3c] sm:$0xe]  ;;  %v6224_v40 = vrot.slane %v3758_v3, 9 }
 0x25c   : > { %6796 = vmatprep.mubr.msk.bf16.mxu1 %vm441_vm4, %v6237_v43  ;;  %6664 = vmatprep.mubr.msk.bf16.mxu0 %vm441_vm4, %v6078_v0  ;;  %v3851_v43 = vrot.slane %v3849_v18, 4  ;;  %v3836_v29 = vsel %vm7992_vm1, %v6223_v1, %v3835_v12  ;;  %v3845_v20 = vrot.slane %v7264_v63, 5  ;;  %v7265_v4 = vld [vmem:[#allocation2 + $0x58] sm:$0xf]  ;;  %v7266_v7 = vld [vmem:[#allocation2 + $0x44] sm:$0x1] }
 0x25d   : > { %v3863_v0 = vrot.slane %v7265_v4, 5  ;;  %v6239_v47 = vcombine.low %v3836_v29, %v3839_v62  ;;  %v3852_v25 = vrot.slane %v7266_v7, 5  ;;  %v3760_v56 = vld [vmem:[#allocation2 + $0x48] sm:$0xe]  ;;  %v3761_v41 = vld [vmem:[#allocation2 + $0x54] sm:$0xe] }
 0x25e   : > { %v7267_v12 = vld [vmem:[#allocation2 + $0x30] sm:$0xf]  ;;  %v8060_v1 = vld [vmem:[#allocation2 + $0x34] sm:$0xf]  ;;  %v3846_v2 = vsel %vm7992_vm1, %v3844_v9, %v3845_v20  ;;  %v7269_v49 = vld [vmem:[#allocation2 + $0x3c] sm:$0xf] }
 0x25f   : > { %v6080_v5 = vcombine.low %v7267_v12, %v8060_v1  ;;  %v8065_v63 = vld [vmem:[#allocation2 + $0x40] sm:$0xf]  ;;  %v3858_v3 = vrot.slane %v3856_v13, 4  ;;  %v6225_v29 = vrot.slane %v3759_v19, 9  ;;  %v7271_v4 = vld [vmem:[#allocation2 + $0x48] sm:$0xf] }
 0x260   : > { %v6081_v62 = vcombine.low %v7269_v49, %v8065_v63  ;;  %v8073_v7 = vld [vmem:[#allocation2 + $0x4c] sm:$0xf]  ;;  %v6226_v20 = vrot.slane %v3760_v56, 9  ;;  %v7273_v12 = vld [vmem:[#allocation2 + $0x50] sm:$0x1]  ;;  %v3865_v48 = vrot.slane %v3863_v0, 4 }
 0x261   : > { %v6082_v9 = vcombine.low %v7271_v4, %v8073_v7  ;;  %v3859_v49 = vrot.slane %v7273_v12, 5  ;;  %v7274_v19 = vld [vmem:[#allocation2 + $0x5c] sm:$0x1]  ;;  %v8096_v12 = vld [vmem:[#allocation2 + $0x64] sm:$0xf] }
 0x262   : > { %v8082_v4 = vsel %vm7992_vm1, %v6226_v20, %v3856_v13  ;;  %v7277_v20 = vld [vmem:[#allocation2 + $0x60] sm:$0xf] }
 0x263   : > { %6797 = vmatmul.mubr.msk.bf16.vlgmr.msra.gmra.mrb[0].mxu1 %vm441_vm4, %v6238_v39  ;;  %6665 = vmatmul.mubr.msk.bf16.gmra.mrb[36].mxu0 %vm441_vm4, %v6079_v55  ;;  %v3843_v39 = vsel %vm7992_vm1, %v6224_v40, %v3842_v30  ;;  %v3853_v55 = vsel %vm7992_vm1, %v3851_v43, %v3852_v25  ;;  %v3850_v30 = vsel %vm7992_vm1, %v6225_v29, %v3849_v18  ;;  %v3866_v40 = vrot.slane %v7274_v19, 5 }
 0x264   : > { %6829 = vmatpush3.bf16.msra.mxu1 %v4391_v27  ;;  %6800 = vmatprep.mubr.msk.bf16.mxu1 %vm441_vm4, %v6239_v47  ;;  %v6227_v27 = vrot.slane %v3761_v41, 9  ;;  %v3765_v47 = vld [vmem:[#allocation2 + $0x84] sm:$0xe]  ;;  %v6240_v31 = vcombine.low %v3843_v39, %v3846_v2  ;;  %v3891_v43 = vrot.slane %v7849_v50, 5  ;;  %v6241_v25 = vcombine.low %v3850_v30, %v3853_v55  ;;  %v7275_v2 = vld [vmem:[#allocation2 + $0x54] sm:$0xf] }
 0x265   : > { %6668 = vmatprep.mubr.msk.bf16.mxu0 %vm441_vm4, %v6080_v5  ;;  %v3860_v56 = vsel %vm7992_vm1, %v3858_v3, %v3859_v49  ;;  %v3766_v5 = vld [vmem:[#allocation2 + $0x90] sm:$0xe]  ;;  %v8090_v39 = vld [vmem:[#allocation2 + $0x58] sm:$0xf]  ;;  %v6231_v29 = vrot.slane %v3765_v47, 9  ;;  %v3894_v55 = vrot.slane %v7851_v15, 5  ;;  %v3867_v13 = vsel %vm7992_vm1, %v3865_v48, %v3866_v40 }
 0x266   : > { %v8088_v41 = vsel %vm7992_vm1, %v6227_v27, %v3863_v0  ;;  %v6083_v18 = vcombine.low %v7275_v2, %v8090_v39  ;;  %v3893_v50 = vrot.slane %v3891_v43, 4  ;;  %v6084_v3 = vcombine.low %v7277_v20, %v8096_v12  ;;  %v8099_v0 = vld [vmem:[#allocation2 + $0x64] sm:$0xf]  ;;  %v3767_v30 = vld [vmem:[#allocation2 + $0x9c] sm:$0xe] }
 0x267   : > { %v3870_v49 = vrot.slane %v8099_v0, 5  ;;  %v3898_v27 = vrot.slane %v7879_v23, 5  ;;  %v6242_v47 = vcombine.low %v8082_v4, %v3860_v56  ;;  %v8106_v15 = vsel %vm7992_vm1, %v6231_v29, %v3891_v43  ;;  %v3768_v56 = vld [vmem:[#allocation2 + $0xa8] sm:$0xe]  ;;  %v3764_v0 = vld [vmem:[#allocation2 + $0x78] sm:$0xe] }
 0x268   : > { %v8110_v48 = vsel %vm7992_vm1, %v3893_v50, %v3894_v55  ;;  %v6232_v19 = vrot.slane %v3766_v5, 9  ;;  %v3901_v2 = vrot.slane %v7881_v35, 5  ;;  %v3905_v4 = vrot.slane %v7906_v8, 5  ;;  %v3769_v50 = vld [vmem:[#allocation2 + $0xb4] sm:$0xe] }
 0x269   : > { %v6247_v40 = vcombine.low %v8106_v15, %v8110_v48  ;;  %v3900_v23 = vrot.slane %v3898_v27, 4  ;;  %v6243_v43 = vcombine.low %v8088_v41, %v3867_v13  ;;  %v3877_v5 = vrot.slane %v7780_v14, 5 }
 0x26a   : > { %v3907_v35 = vrot.slane %v3905_v4, 4  ;;  %v3908_v8 = vrot.slane %v7910_v24, 5  ;;  %v6234_v41 = vrot.slane %v3768_v56, 9  ;;  %v3919_v55 = vrot.slane %v7960_v57, 5 }
 0x26b   : > { %6801 = vmatmul.mubr.msk.bf16.gmra.mrb[4].mxu1 %vm441_vm4, %v6240_v31  ;;  %6669 = vmatmul.mubr.msk.bf16.gmra.mrb[40].mxu0 %vm441_vm4, %v6081_v62  ;;  %v8124_v31 = vsel %vm7992_vm1, %v6232_v19, %v3898_v27  ;;  %v6233_v62 = vrot.slane %v3767_v30, 9  ;;  %v8128_v29 = vsel %vm7992_vm1, %v3900_v23, %v3901_v2  ;;  %v6235_v30 = vrot.slane %v3769_v50, 9  ;;  %v3770_v2 = vld [vmem:[#allocation2 + $0xc0] sm:$0xe] }
 0x26c   : > { %6804 = vmatprep.mubr.msk.bf16.mxu1 %vm441_vm4, %v6241_v25  ;;  %6672 = vmatprep.mubr.msk.bf16.mxu0 %vm441_vm4, %v6082_v9  ;;  %v3912_v25 = vrot.slane %v7933_v11, 5  ;;  %v3872_v9 = vrot.slane %v3870_v49, 4  ;;  %v6248_v14 = vcombine.low %v8124_v31, %v8128_v29  ;;  %v8143_v20 = vsel %vm7992_vm1, %v3907_v35, %v3908_v8  ;;  %v7232_v31 = vld [vmem:[%s9155_s3 + $0x4] ss:$0 sps:$4 sm:$0xcc]  }
 0x26d   : > { %v8139_v13 = vsel %vm7992_vm1, %v6233_v62, %v3905_v4  ;;  %v3915_v11 = vrot.slane %v7939_v46, 5  ;;  %v3921_v19 = vrot.slane %v3919_v55, 4  ;;  %v3922_v23 = vrot.slane %v7962_v45, 5  ;;  %v8161_v46 = vld [vmem:[%s9155_s3 + $0xc] ss:$0 sps:$4 sm:$0xcc]  }
 0x26e   : > { %v3914_v24 = vrot.slane %v3912_v25, 4  ;;  %v6249_v27 = vcombine.low %v8139_v13, %v8143_v20  ;;  %v3879_v57 = vrot.slane %v3877_v5, 4  ;;  %v8151_v4 = vsel %vm7992_vm1, %v6234_v41, %v3912_v25  ;;  %v7287_v20 = vld [vmem:[#allocation2 + $0x14] sm:$0x1] }
 0x26f   : > { %v3926_v62 = vrot.slane %v7974_v10, 5  ;;  %v8167_v35 = vsel %vm7992_vm1, %v6235_v30, %v3919_v55  ;;  %v8171_v8 = vsel %vm7992_vm1, %v3921_v19, %v3922_v23  ;;  %v2474_v25 = vsel %vm490_vm0, %v7999_v17, 0  ;;  %v3762_v10 = vld [vmem:[#allocation2 + $0x60] sm:$0xe]  ;;  %v3763_v19 = vld [vmem:[#allocation2 + $0x6c] sm:$0xe] }
 0x270   : > { %v8155_v56 = vsel %vm7992_vm1, %v3914_v24, %v3915_v11  ;;  %v6251_v50 = vcombine.low %v8167_v35, %v8171_v8  ;;  %v6236_v41 = vrot.slane %v3770_v2, 9  ;;  %v3929_v55 = vrot.slane %v7978_v52, 5  ;;  %v7280_v11 = vld [vmem:[#allocation2 + $0x68] sm:$0x1]  ;;  %v7281_v17 = vld [vmem:[#allocation2 + $0x74] sm:$0x1]  ;;  %6693 = vmatpush3.bf16.msra.mxu0 %v2474_v25 }
 0x271   : > { %v6250_v45 = vcombine.low %v8151_v4, %v8155_v56  ;;  %v3928_v24 = vrot.slane %v3926_v62, 4  ;;  %v3873_v30 = vrot.slane %v7280_v11, 5  ;;  %v3880_v23 = vrot.slane %v7281_v17, 5 }
 0x272   : > { %v5070_v52 = vrot.slane %v8161_v46, 2  ;;  %v6228_v2 = vrot.slane %v3762_v10, 9  ;;  %v6229_v17 = vrot.slane %v3763_v19, 9  ;;  %v2273_v15 = vrot.slane %v8037_v60, 5  ;;  %v2214_v60 = vld [vmem:[#allocation2 + $0xc] sm:$0xe] }
 0x273   : > { %6805 = vmatmul.mubr.msk.bf16.gmra.mrb[8].mxu1 %vm441_vm4, %v6242_v47  ;;  %6673 = vmatmul.mubr.msk.bf16.gmra.mrb[44].mxu0 %vm441_vm4, %v6083_v18  ;;  %v8184_v18 = vsel %vm7992_vm1, %v6236_v41, %v3926_v62  ;;  %v8188_v47 = vsel %vm7992_vm1, %v3928_v24, %v3929_v55  ;;  %v3881_v62 = vsel %vm7992_vm1, %v3879_v57, %v3880_v23  ;;  %v8207_v41 = vld [vmem:[#allocation2 + $0x70] sm:$0xf]  ;;  %v7284_v57 = vld [vmem:[#allocation2 + $0x78] sm:$0xf]  ;;  %v2280_v48 = vrot.slane %v8040_v28, 5 }
 0x274   : > { %6808 = vmatprep.mubr.msk.bf16.mxu1 %vm441_vm4, %v6243_v43  ;;  %6676 = vmatprep.mubr.msk.bf16.mxu0 %vm441_vm4, %v6084_v3  ;;  %v3874_v3 = vsel %vm7992_vm1, %v3872_v9, %v3873_v30  ;;  %v3884_v43 = vrot.slane %v7798_v26, 5  ;;  %v6252_v11 = vcombine.low %v8184_v18, %v8188_v47  ;;  %v3871_v25 = vsel %vm7992_vm1, %v6228_v2, %v3870_v49  ;;  %v7282_v9 = vld [vmem:[#allocation2 + $0x6c] sm:$0xf]  ;;  %v8210_v30 = vld [vmem:[#allocation2 + $0x7c] sm:$0xf] }
 0x275   : > { %7194 = vmatprep.subr.msk.bf16.mxu1 %vm490_vm0, %v5070_v52  ;;  %v6244_v10 = vcombine.low %v3871_v25, %v3874_v3  ;;  %v3878_v26 = vsel %vm7992_vm1, %v6229_v17, %v3877_v5  ;;  %v6085_v24 = vcombine.low %v7282_v9, %v8207_v41  ;;  %v6086_v19 = vcombine.low %v7284_v57, %v8210_v30  ;;  %v7288_v9 = vld [vmem:[#allocation2 + $0x20] sm:$0x1]  ;;  %v7290_v47 = vld [vmem:[#allocation2 + $0x38] sm:$0x1] }
 0x276   : > { %v6245_v55 = vcombine.low %v3878_v26, %v3881_v62  ;;  %v3886_v23 = vrot.slane %v3884_v43, 4  ;;  %v3887_v49 = vrot.slane %v7801_v22, 5  ;;  %v6230_v5 = vrot.slane %v3764_v0, 9 }
 0x277   : > { %v6087_v62 = vcombine.low %v7825_v33, %v7829_v38  ;;  %v6088_v25 = vcombine.low %v7859_v53, %v7861_v61  ;;  %v2266_v22 = vrot.slane %v8010_v34, 5  ;;  %v6089_v33 = vcombine.low %v7886_v51, %v7892_v16  ;;  %v7286_v53 = vld [vmem:[#allocation2 + $0x8] sm:$0x1]  ;;  %v289_v51 = vld [vmem:[#allocation2 + $0xcc] sm:$0x1] }
 0x278   : > { %v3888_v2 = vsel %vm7992_vm1, %v3886_v23, %v3887_v49  ;;  %v3885_v3 = vsel %vm7992_vm1, %v6230_v5, %v3884_v43  ;;  %v2213_v43 = vld [vmem:[#allocation2] sm:$0xe]  ;;  %v2269_v61 = vrot.slane %v7286_v53, 5  ;;  %v6090_v26 = vcombine.low %v7912_v32, %v7914_v44  ;;  %v2216_v5 = vld [vmem:[#allocation2 + $0x24] sm:$0xe] }
 0x279   : > { %v6246_v17 = vcombine.low %v3885_v3, %v3888_v2  ;;  %v6108_v38 = vrot.slane %v2213_v43, 9  ;;  %v2275_v13 = vrot.slane %v2273_v15, 4  ;;  %v2282_v6 = vrot.slane %v2280_v48, 4  ;;  %v2217_v2 = vld [vmem:[#allocation2 + $0x30] sm:$0xe] }
 0x27a   : > { %v2785_v28 = vrot.slane %v7232_v31, 2  ;;  %v2287_v4 = vrot.slane %v8055_v36, 5  ;;  %v6109_v56 = vrot.slane %v2214_v60, 9  ;;  %v2301_v57 = vrot.slane %v8065_v63, 5  ;;  %v2219_v53 = vld [vmem:[#allocation2 + $0x48] sm:$0xe] }
 0x27b   : > { %6809 = vmatmul.mubr.msk.bf16.gmra.mrb[12].mxu1 %vm441_vm4, %v6244_v10  ;;  %6677 = vmatmul.mubr.msk.bf16.gmra.mrb[48].mxu0 %vm441_vm4, %v6085_v24  ;;  %v2268_v10 = vrot.slane %v2266_v22, 4  ;;  %v2267_v34 = vsel %vm7992_vm1, %v6108_v38, %v2266_v22  ;;  %v2283_v24 = vrot.slane %v7288_v9, 5  ;;  %v2308_v3 = vrot.slane %v8073_v7, 5  ;;  %v7291_v38 = vld [vmem:[#allocation2 + $0x44] sm:$0x1] }
 0x27c   : > { %6812 = vmatprep.mubr.msk.bf16.mxu1 %vm441_vm4, %v6245_v55  ;;  %6680 = vmatprep.mubr.msk.bf16.mxu0 %vm441_vm4, %v6086_v19  ;;  %v2274_v8 = vsel %vm7992_vm1, %v6109_v56, %v2273_v15  ;;  %v7214_v19 = vld [vmem:[#allocation2 + $0x18] sm:$0xff]   ;;  %v2289_v0 = vrot.slane %v2287_v4, 4  ;;  %v2303_v22 = vrot.slane %v2301_v57, 4  ;;  %v2315_v7 = vrot.slane %v8090_v39, 5  ;;  %v2220_v31 = vld [vmem:[#allocation2 + $0x54] sm:$0xe] }
 0x27d   : > { %v2270_v32 = vsel %vm7992_vm1, %v2268_v10, %v2269_v61  ;;  %7190 = vmatprep.subr.msk.bf16.mxu0 %vm490_vm0, %v2785_v28  ;;  %v2284_v35 = vsel %vm7992_vm1, %v2282_v6, %v2283_v24  ;;  %v6111_v43 = vrot.slane %v2216_v5, 9  ;;  %v6112_v18 = vrot.slane %v2217_v2, 9  ;;  %v7293_v6 = vld [vmem:[#allocation2 + $0x5c] sm:$0x1]  ;;  %v8322_v56 = vld [vmem:[%s9155_s3 + $0x10] sm:$0x3] }
 0x27e   : > { %v6124_v29 = vcombine.low %v2267_v34, %v2270_v32  ;;  %v2304_v10 = vrot.slane %v7291_v38, 5  ;;  %v2310_v61 = vrot.slane %v2308_v3, 4  ;;  %v5120_v39 = vsel %vm490_vm0, %v5070_v52, 0  ;;  %v7216_v52 = vld [vmem:[#allocation2 + $0x24] sm:$0xff]  }
 0x27f   : > { %v2288_v34 = vsel %vm7992_vm1, %v6111_v43, %v2287_v4  ;;  %v2317_v46 = vrot.slane %v2315_v7, 4  ;;  %v6114_v60 = vrot.slane %v2219_v53, 9  ;;  %v2336_v4 = vrot.slane %v8210_v30, 5 }
 0x281   : > { %v2309_v30 = vsel %vm7992_vm1, %v6114_v60, %v2308_v3 }
 0x283   : > { %6813 = vmatmul.mubr.msk.bf16.gmra.mrb[16].mxu1 %vm441_vm4, %v6246_v17  ;;  %6681 = vmatmul.mubr.msk.bf16.gmra.mrb[52].mxu0 %vm441_vm4, %v6087_v62  ;;  %v2835_v17 = vsel %vm490_vm0, %v2785_v28, 0  ;;  %v2318_v28 = vrot.slane %v7293_v6, 5  ;;  %v7300_v6 = vld [vmem:[#allocation2 + $0x98] sm:$0x1] }
 0x284   : > { %6816 = vmatprep.mubr.msk.bf16.mxu1 %vm441_vm4, %v6247_v40  ;;  %6684 = vmatprep.mubr.msk.bf16.mxu0 %vm441_vm4, %v6088_v25  ;;  %v290_v40 = vsel %vm7368_vm3, 0, %v289_v51  ;;  %v2218_v25 = vld [vmem:[#allocation2 + $0x3c] sm:$0xe]  ;;  %v2329_v51 = vrot.slane %v8207_v41, 5 }
 0x285   : > { %291 = vst [vmem:[#allocation2 + $0xcc] sm:$0x1] %v290_v40  ;;  %v6113_v15 = vrot.slane %v2218_v25, 9  ;;  %v8308_v40 = vsel %vm7992_vm1, %v2303_v22, %v2304_v10  ;;  %v2338_v25 = vrot.slane %v2336_v4, 4  ;;  %v7296_v22 = vld [vmem:[#allocation2 + $0x88] sm:$0xf] }
 0x286   : > { %v2331_v24 = vrot.slane %v2329_v51, 4  ;;  %v7298_v10 = vld [vmem:[#allocation2 + $0x80] sm:$0x1] }
 0x287   : > { %v2339_v53 = vrot.slane %v7298_v10, 5 }
 0x28b   : > { %6817 = vmatmul.mubr.msk.bf16.gmra.mrb[20].mxu1 %vm441_vm4, %v6248_v14  ;;  %6685 = vmatmul.mubr.msk.bf16.gmra.mrb[56].mxu0 %vm441_vm4, %v6089_v33  ;;  %v6091_v14 = vcombine.low %v7942_v42, %v7946_v54  ;;  %v2276_v42 = vrot.slane %v7287_v20, 5  ;;  %v2222_v20 = vld [vmem:[#allocation2 + $0x6c] sm:$0xe] }
 0x28c   : > { %6820 = vmatprep.mubr.msk.bf16.mxu1 %vm441_vm4, %v6249_v27  ;;  %6688 = vmatprep.mubr.msk.bf16.mxu0 %vm441_vm4, %v6090_v26  ;;  %v2215_v27 = vld [vmem:[#allocation2 + $0x18] sm:$0xe]  ;;  %v2322_v26 = vrot.slane %v8096_v12, 5  ;;  %v7292_v12 = vld [vmem:[#allocation2 + $0x50] sm:$0x1]  ;;  %v6117_v3 = vrot.slane %v2222_v20, 9 }
 0x28d   : > { %v6110_v55 = vrot.slane %v2215_v27, 9  ;;  %v2311_v41 = vrot.slane %v7292_v12, 5  ;;  %v2226_v20 = vld [vmem:[#allocation2 + $0x9c] sm:$0xe] }
 0x28e   : > { %v2324_v9 = vrot.slane %v2322_v26, 4 }
 0x28f   : > { %v2281_v36 = vsel %vm7992_vm1, %v6110_v55, %v2280_v48  ;;  %v8316_v27 = vsel %vm7992_vm1, %v2310_v61, %v2311_v41  ;;  %v4586_v41 = vld [vmem:[#allocation2 + $0x18] sm:$0xf] }
 0x290   : > { %v6126_v49 = vcombine.low %v2281_v36, %v2284_v35  ;;  %v6115_v35 = vrot.slane %v2220_v31, 9  ;;  %v8371_v31 = vsel %vm7992_vm1, %v2338_v25, %v2339_v53  ;;  %v2228_v25 = vld [vmem:[#allocation2 + $0xb4] sm:$0xe] }
 0x292   : > { %v8339_v5 = vsel %vm7992_vm1, %v6115_v35, %v2315_v7  ;;  %v2343_v7 = vrot.slane %v7296_v22, 5 }
 0x293   : > { %6821 = vmatmul.mubr.msk.bf16.gmra.mrb[24].mxu1 %vm441_vm4, %v6250_v45  ;;  %6689 = vmatmul.mubr.msk.bf16.gmra.mrb[60].mxu0 %vm441_vm4, %v6091_v14  ;;  %v2277_v45 = vsel %vm7992_vm1, %v2275_v13, %v2276_v42  ;;  %v8312_v13 = vsel %vm7992_vm1, %v6113_v15, %v2301_v57  ;;  %v7217_v42 = vld [vmem:[#allocation2 + $0x30] sm:$0xff]   ;;  %v7294_v57 = vld [vmem:[#allocation2 + $0x68] sm:$0x1] }
 0x294   : > { %6824 = vmatprep.mubr.msk.bf16.mxu1 %vm441_vm4, %v6251_v50  ;;  %6694 = vmatprep.mubr.msk.bf16.mxu0 %vm441_vm4, %v6124_v29  ;;  %v2294_v50 = vrot.slane %v8060_v1, 5  ;;  %v6125_v23 = vcombine.low %v2274_v8, %v2277_v45  ;;  %v7289_v1 = vld [vmem:[#allocation2 + $0x2c] sm:$0x1]  ;;  %v2221_v29 = vld [vmem:[#allocation2 + $0x60] sm:$0xe]  ;;  %v6129_v55 = vcombine.low %v8312_v13, %v8308_v40 }
 0x295   : > { %v2290_v63 = vrot.slane %v7289_v1, 5  ;;  %v6116_v8 = vrot.slane %v2221_v29, 9  ;;  %v4587_v1 = vld [vmem:[#allocation2 + $0x1c] sm:$0xf]  ;;  %v7299_v40 = vld [vmem:[#allocation2 + $0x8c] sm:$0x1] }
 0x296   : > { %v2296_v62 = vrot.slane %v2294_v50, 4  ;;  %v2295_v32 = vsel %vm7992_vm1, %v6112_v18, %v2294_v50  ;;  %v8333_v50 = vsel %vm7992_vm1, %v2317_v46, %v2318_v28  ;;  %v2346_v12 = vrot.slane %v7299_v40, 5  ;;  %v4590_v13 = vld [vmem:[#allocation2 + $0x28] sm:$0xf] }
 0x297   : > { %v2291_v33 = vsel %vm7992_vm1, %v2289_v0, %v2290_v63  ;;  %v2223_v0 = vld [vmem:[#allocation2 + $0x78] sm:$0xe]  ;;  %v8343_v2 = vsel %vm7992_vm1, %v6116_v8, %v2322_v26  ;;  %v6131_v43 = vcombine.low %v8339_v5, %v8333_v50  ;;  %v4644_v26 = vshll.u32 %v4587_v1, 16 }
 0x298   : > { %v6127_v14 = vcombine.low %v2288_v34, %v2291_v33  ;;  %v8359_v33 = vsel %vm7992_vm1, %v6117_v3, %v2329_v51  ;;  %v6118_v18 = vrot.slane %v2223_v0, 9  ;;  %v7218_v34 = vld [vmem:[#allocation2 + $0x3c] sm:$0xff]   ;;  %v2345_v29 = vrot.slane %v2343_v7, 4  ;;  %v2227_v3 = vld [vmem:[#allocation2 + $0xa8] sm:$0xe] }
 0x299   : > { %v2353_v28 = vrot.slane %v7300_v6, 5 }
 0x29a   : > { %v8367_v51 = vsel %vm7992_vm1, %v6118_v18, %v2336_v4  ;;  %v8383_v4 = vrot.slane %v4644_v26, 5 }
 0x29b   : > { %6825 = vmatmul.mubr.msk.bf16.gmra.mrb[28].mxu1 %vm441_vm4, %v6252_v11  ;;  %6695 = vmatmul.mubr.msk.bf16.vlgmr.msra.gmra.mrb[32].mxu0 %vm441_vm4, %v6125_v23  ;;  %v2297_v11 = vrot.slane %v7290_v47, 5  ;;  %v7295_v23 = vld [vmem:[#allocation2 + $0x74] sm:$0x1]  ;;  %v2225_v47 = vld [vmem:[#allocation2 + $0x90] sm:$0xe] }
 0x29c   : > { %6830 = vmatprep.mubr.msk.bf16.mxu1 %vm441_vm4, %v7214_v19  ;;  %6698 = vmatprep.mubr.msk.bf16.mxu0 %vm441_vm4, %v6126_v49  ;;  %v2325_v19 = vrot.slane %v7294_v57, 5  ;;  %v2332_v36 = vrot.slane %v7295_v23, 5  ;;  %v6130_v49 = vcombine.low %v2309_v30, %v8316_v27  ;;  %v2364_v27 = vrot.slane %v7914_v44, 5  ;;  %v4588_v23 = vld [vmem:[#allocation2 + $0x20] sm:$0x1] }
 0x29d   : > { %6727 = vmatpush3.bf16.msra.mxu0 %v2835_v17  ;;  %v2298_v48 = vsel %vm7992_vm1, %v2296_v62, %v2297_v11  ;;  %v2224_v17 = vld [vmem:[#allocation2 + $0x84] sm:$0xe]  ;;  %v7297_v11 = vld [vmem:[#allocation2 + $0x94] sm:$0xf]  ;;  %v4672_v30 = vshrl.u32 %v4590_v13, 16  ;;  %v6134_v57 = vcombine.low %v8367_v51, %v8371_v31 }
 0x29e   : > { %v6128_v45 = vcombine.low %v2295_v32, %v2298_v48  ;;  %v8349_v63 = vsel %vm7992_vm1, %v2324_v9, %v2325_v19  ;;  %v8353_v62 = vsel %vm7992_vm1, %v2331_v24, %v2332_v36  ;;  %v2350_v38 = vrot.slane %v7297_v11, 5  ;;  %v7219_v32 = vld [vmem:[#allocation2 + $0x48] sm:$0xff]  }
 0x29f   : > { %v6119_v61 = vrot.slane %v2224_v17, 9  ;;  %v6132_v15 = vcombine.low %v8343_v2, %v8349_v63  ;;  %v6133_v48 = vcombine.low %v8359_v33, %v8353_v62  ;;  %v4635_v9 = vshrl.u32 %v4586_v41, 16 }
 0x2a0   : > { %v2352_v60 = vrot.slane %v2350_v38, 4  ;;  %v4638_v24 = vshll.u32 %v4586_v41, 16  ;;  %v6121_v19 = vrot.slane %v2226_v20, 9  ;;  %v2371_v17 = vrot.slane %v7946_v54, 5 }
 0x2a1   : > { %v8375_v46 = vsel %vm7992_vm1, %v6119_v61, %v2343_v7  ;;  %v4637_v22 = vrot.slane %v4635_v9, 4  ;;  %v4674_v53 = vrot.slane %v4672_v30, 4  ;;  %v7221_v61 = vld [vmem:[#allocation2 + $0x60] sm:$0xff]   ;;  %v2367_v54 = vrot.slane %v7926_v58, 5 }
 0x2a2   : > { %v8397_v36 = vsel %vm7992_vm1, %v2352_v60, %v2353_v28  ;;  %v4640_v7 = vrot.slane %v4638_v24, 5  ;;  %v6123_v41 = vrot.slane %v2228_v25, 9  ;;  %v2373_v50 = vrot.slane %v2371_v17, 4  ;;  %v7223_v25 = vld [vmem:[#allocation2 + $0x78] sm:$0xff]  }
 0x2a3   : > { %6831 = vmatmul.mubr.msk.bf16.vlgmr.msra.gmra.mrb[0].mxu1 %vm441_vm4, %v7216_v52  ;;  %6699 = vmatmul.mubr.msk.bf16.gmra.mrb[36].mxu0 %vm441_vm4, %v6127_v14  ;;  %v6120_v52 = vrot.slane %v2225_v47, 9  ;;  %v4589_v14 = vld [vmem:[#allocation2 + $0x24] sm:$0xf]  ;;  %v7220_v47 = vld [vmem:[#allocation2 + $0x54] sm:$0xff]   ;;  %v2374_v28 = vrot.slane %v7954_v21, 5  ;;  %v7222_v21 = vld [vmem:[#allocation2 + $0x6c] sm:$0xff]  }
 0x2a4   : > { %6863 = vmatpush3.bf16.msra.mxu1 %v5120_v39  ;;  %6834 = vmatprep.mubr.msk.bf16.mxu1 %vm441_vm4, %v7217_v42  ;;  %v4648_v39 = vshrl.u32 %v4587_v1, 16  ;;  %v2357_v42 = vrot.slane %v7892_v16, 5  ;;  %v4659_v35 = vshrl.u32 %v4589_v14, 16  ;;  %v4662_v8 = vshll.u32 %v4589_v14, 16 }
 0x2a5   : > { %6702 = vmatprep.mubr.msk.bf16.mxu0 %vm441_vm4, %v6128_v45  ;;  %7195 = vmatprep.subr.msk.bf16.mxu1 %vm490_vm0, %v8322_v56  ;;  %v8389_v16 = vsel %vm7992_vm1, %v2345_v29, %v2346_v12  ;;  %v8393_v44 = vsel %vm7992_vm1, %v6120_v52, %v2350_v38  ;;  %v2366_v1 = vrot.slane %v2364_v27, 4  ;;  %v6122_v12 = vrot.slane %v2227_v3, 9  ;;  %v8422_v29 = vld [vmem:[#allocation2 + $0x34] sm:$0xf]  ;;  %v8433_v52 = vld [vmem:[#allocation2 + $0x2c] sm:$0x1] }
 0x2a6   : > { %v4650_v45 = vrot.slane %v4648_v39, 4  ;;  %v2359_v0 = vrot.slane %v2357_v42, 4  ;;  %v4661_v11 = vrot.slane %v4659_v35, 4  ;;  %v4664_v38 = vrot.slane %v4662_v8, 5 }
 0x2a7   : > { %v6135_v26 = vcombine.low %v8375_v46, %v8389_v16  ;;  %v4654_v39 = vshll.u32 %v4588_v23, 16  ;;  %v8431_v58 = vsel %vm7992_vm1, %v2366_v1, %v2367_v54  ;;  %v4641_v5 = vor.u32 %v4640_v7, %v4637_v22  ;;  %v8460_v23 = vld [vmem:[#allocation2 + $0x40] sm:$0xf]  ;;  %v8462_v1 = vld [vmem:[#allocation2 + $0x4c] sm:$0xf] }
 0x2a8   : > { %v4651_v18 = vor.u32 %v4650_v45, %v8383_v4  ;;  %v4665_v14 = vor.u32 %v4664_v38, %v4661_v11  ;;  %v4692_v2 = vshll.u32 %v8422_v29, 16  ;;  %v4696_v63 = vshrl.u32 %v8422_v29, 16  ;;  %v4595_v45 = vld [vmem:[#allocation2 + $0x3c] sm:$0xf]  ;;  %v4598_v54 = vld [vmem:[#allocation2 + $0x48] sm:$0xf] }
 0x2a9   : > { %v4656_v20 = vrot.slane %v4654_v39, 5  ;;  %v8447_v9 = vsel %vm7992_vm1, %v6123_v41, %v2371_v17  ;;  %v4678_v24 = vshll.u32 %v8433_v52, 16  ;;  %v8454_v8 = vsel %vm7992_vm1, %v2373_v50, %v2374_v28  ;;  %v8489_v39 = vld [vmem:[#allocation2 + $0x58] sm:$0xf] }
 0x2aa   : > { %v8464_v22 = vrot.slane %v4692_v2, 5  ;;  %v4698_v7 = vrot.slane %v4696_v63, 4  ;;  %v6139_v11 = vcombine.low %v8447_v9, %v8454_v8  ;;  %v4720_v33 = vshrl.u32 %v8460_v23, 16  ;;  %v8508_v63 = vld [vmem:[#allocation2 + $0x64] sm:$0xf] }
 0x2ab   : > { %6835 = vmatmul.mubr.msk.bf16.gmra.mrb[4].mxu1 %vm441_vm4, %v7218_v34  ;;  %6703 = vmatmul.mubr.msk.bf16.gmra.mrb[40].mxu0 %vm441_vm4, %v6129_v55  ;;  %v4668_v55 = vshll.u32 %v4590_v13, 16  ;;  %v4592_v34 = vld [vmem:[#allocation2 + $0x30] sm:$0xf]  ;;  %v4680_v38 = vrot.slane %v4678_v24, 5  ;;  %v4734_v28 = vshll.u32 %v4598_v54, 16  ;;  %v7224_v24 = vld [vmem:[#allocation2 + $0x84] sm:$0xff]  }
 0x2ac   : > { %6838 = vmatprep.mubr.msk.bf16.mxu1 %vm441_vm4, %v7219_v32  ;;  %6706 = vmatprep.mubr.msk.bf16.mxu0 %vm441_vm4, %v6130_v49  ;;  %v2360_v49 = vrot.slane %v7896_v59, 5  ;;  %v8408_v59 = vsel %vm7992_vm1, %v6121_v19, %v2357_v42  ;;  %v6136_v32 = vcombine.low %v8393_v44, %v8397_v36  ;;  %v4683_v60 = vshrl.u32 %v4592_v34, 16  ;;  %v8458_v19 = vld [vmem:[#allocation2 + $0x38] sm:$0x1] }
 0x2ad   : > { %v8402_v10 = vrot.slane %v4668_v55, 5  ;;  %v4686_v6 = vshll.u32 %v4592_v34, 16  ;;  %v8443_v42 = vsel %vm7992_vm1, %v6122_v12, %v2364_v27  ;;  %v4642_v55 = vrot.slane %v4641_v5, 4  ;;  %v4601_v5 = vld [vmem:[#allocation2 + $0x54] sm:$0xf] }
 0x2ae   : > { %v8420_v40 = vsel %vm7992_vm1, %v2359_v0, %v2360_v49  ;;  %v6138_v35 = vcombine.low %v8443_v42, %v8431_v58  ;;  %v4666_v0 = vrot.slane %v4665_v14, 4  ;;  %v4685_v3 = vrot.slane %v4683_v60, 4 }
 0x2af   : > { %v4675_v13 = vor.u32 %v4674_v53, %v8402_v10  ;;  %v4688_v17 = vrot.slane %v4686_v6, 5  ;;  %v8475_v53 = vsel %vm490_vm0, %v8322_v56, 0  ;;  %v4647_v62 = vsel %vm7423_vm10, %v4642_v55, %v8383_v4 }
 0x2b0   : > { %v4744_v56 = vshrl.u32 %v8462_v1, 16  ;;  %v4671_v51 = vsel %vm7423_vm10, %v4666_v0, %v8402_v10  ;;  %v4699_v12 = vor.u32 %v4698_v7, %v8464_v22  ;;  %v4764_v60 = vshll.u32 %v8489_v39, 16  ;;  %v7225_v0 = vld [vmem:[#allocation2 + $0x90] sm:$0xff]   ;;  %v4604_v7 = vld [vmem:[#allocation2 + $0x60] sm:$0xf] }
 0x2b1   : > { %v4676_v49 = vrot.slane %v4675_v13, 4  ;;  %v4689_v4 = vor.u32 %v4688_v17, %v4685_v3  ;;  %v4731_v13 = vshrl.u32 %v4598_v54, 16  ;;  %v4768_v10 = vshrl.u32 %v8489_v39, 16 }
 0x2b2   : > { %v4722_v6 = vrot.slane %v4720_v33, 4  ;;  %v4746_v2 = vrot.slane %v4744_v56, 4  ;;  %v4755_v55 = vshrl.u32 %v4601_v5, 16  ;;  %v4700_v3 = vrot.slane %v4699_v12, 4  ;;  %v8531_v33 = vld [vmem:[#allocation2 + $0x5c] sm:$0x1] }
 0x2b3   : > { %6839 = vmatmul.mubr.msk.bf16.gmra.mrb[8].mxu1 %vm441_vm4, %v7220_v47  ;;  %6707 = vmatmul.mubr.msk.bf16.gmra.mrb[44].mxu0 %vm441_vm4, %v6131_v43  ;;  %v4652_v43 = vrot.slane %v4651_v18, 4  ;;  %v4707_v18 = vshrl.u32 %v4595_v45, 16  ;;  %v4710_v47 = vshll.u32 %v4595_v45, 16  ;;  %v4681_v31 = vsel %vm7423_vm10, %v4676_v49, %v4680_v38 }
 0x2b4   : > { %6842 = vmatprep.mubr.msk.bf16.mxu1 %vm441_vm4, %v7221_v61  ;;  %6710 = vmatprep.mubr.msk.bf16.mxu0 %vm441_vm4, %v6132_v15  ;;  %v6137_v15 = vcombine.low %v8408_v59, %v8420_v40  ;;  %v4716_v61 = vshll.u32 %v8460_v23, 16  ;;  %v8510_v45 = vcombine.low %v4671_v51, %v4681_v31  ;;  %v4690_v49 = vrot.slane %v4689_v4, 4 }
 0x2b5   : > { %v4657_v27 = vsel %vm7423_vm10, %v4652_v43, %v4656_v20  ;;  %v4709_v41 = vrot.slane %v4707_v18, 4  ;;  %v4712_v50 = vrot.slane %v4710_v47, 5  ;;  %v8500_v43 = vld [vmem:[#allocation2 + $0x44] sm:$0x1]  ;;  %v8518_v18 = vld [vmem:[#allocation2 + $0x50] sm:$0x1] }
 0x2b6   : > { %v8491_v34 = vcombine.low %v4647_v62, %v4657_v27  ;;  %v8502_v14 = vrot.slane %v4716_v61, 5  ;;  %v4758_v27 = vshll.u32 %v4601_v5, 16  ;;  %v8520_v47 = vrot.slane %v4764_v60, 5 }
 0x2b7   : > { %v4713_v17 = vor.u32 %v4712_v50, %v4709_v41  ;;  %v4770_v38 = vrot.slane %v4768_v10, 4  ;;  %v4788_v61 = vshll.u32 %v8508_v63, 16  ;;  %v4792_v54 = vshrl.u32 %v8508_v63, 16 }
 0x2b8   : > { %v4723_v46 = vor.u32 %v4722_v6, %v8502_v14  ;;  %v4733_v16 = vrot.slane %v4731_v13, 4  ;;  %v4760_v56 = vrot.slane %v4758_v27, 5  ;;  %v4779_v51 = vshrl.u32 %v4604_v7, 16  ;;  %v8542_v13 = vld [vmem:[#allocation2 + $0x70] sm:$0xf] }
 0x2b9   : > { %v4782_v31 = vshll.u32 %v4604_v7, 16  ;;  %v4714_v4 = vrot.slane %v4713_v17, 4  ;;  %v4750_v36 = vshll.u32 %v8518_v18, 16  ;;  %v4771_v41 = vor.u32 %v4770_v38, %v8520_v47 }
 0x2ba   : > { %v8540_v50 = vrot.slane %v4788_v61, 5  ;;  %v4794_v5 = vrot.slane %v4792_v54, 4  ;;  %v4724_v60 = vrot.slane %v4723_v46, 4  ;;  %v4812_v17 = vshll.u32 %v8542_v13, 16  ;;  %v345_v46 = vld [vmem:[#allocation2 + $0xd4] sm:$0x1] }
 0x2bb   : > { %6843 = vmatmul.mubr.msk.bf16.gmra.mrb[12].mxu1 %vm441_vm4, %v7222_v21  ;;  %6711 = vmatmul.mubr.msk.bf16.gmra.mrb[48].mxu0 %vm441_vm4, %v6133_v48  ;;  %v4740_v48 = vshll.u32 %v8462_v1, 16  ;;  %v4784_v27 = vrot.slane %v4782_v31, 5  ;;  %v4719_v38 = vsel %vm7423_vm10, %v4714_v4, %v8502_v14  ;;  %v4772_v61 = vrot.slane %v4771_v41, 4  ;;  %v4610_v14 = vld [vmem:[#allocation2 + $0x78] sm:$0xf] }
 0x2bc   : > { %6846 = vmatprep.mubr.msk.bf16.mxu1 %vm441_vm4, %v7223_v25  ;;  %6714 = vmatprep.mubr.msk.bf16.mxu0 %vm441_vm4, %v6134_v57  ;;  %v4702_v57 = vshll.u32 %v8458_v19, 16  ;;  %v4726_v25 = vshll.u32 %v8500_v43, 16  ;;  %v4795_v54 = vor.u32 %v4794_v5, %v8540_v50  ;;  %v8572_v58 = vrot.slane %v4812_v17, 5 }
 0x2bd   : > { %v8506_v20 = vrot.slane %v4740_v48, 5  ;;  %v4757_v48 = vrot.slane %v4755_v55, 4  ;;  %v4781_v55 = vrot.slane %v4779_v51, 4  ;;  %v8570_v51 = vld [vmem:[#allocation2 + $0x7c] sm:$0xf]  ;;  %v5391_v30 = vrot.slane %v8433_v52, 5 }
 0x2be   : > { %v4704_v21 = vrot.slane %v4702_v57, 5  ;;  %v4695_v57 = vsel %vm7423_vm10, %v4690_v49, %v8464_v22  ;;  %v4728_v44 = vrot.slane %v4726_v25, 5  ;;  %v4774_v22 = vshll.u32 %v8531_v33, 16 }
 0x2bf   : > { %v4747_v62 = vor.u32 %v4746_v2, %v8506_v20  ;;  %v4761_v2 = vor.u32 %v4760_v56, %v4757_v48  ;;  %v4752_v49 = vrot.slane %v4750_v36, 5  ;;  %v4816_v25 = vshrl.u32 %v8542_v13, 16  ;;  %v8578_v36 = vld [vmem:[#allocation2 + $0x74] sm:$0x1] }
 0x2c0   : > { %v4705_v12 = vsel %vm7423_vm10, %v4700_v3, %v4704_v21  ;;  %v7227_v21 = vld [vmem:[#allocation2 + $0xa8] sm:$0xff]   ;;  %v4729_v59 = vsel %vm7423_vm10, %v4724_v60, %v4728_v44  ;;  %v4796_v44 = vrot.slane %v4795_v54, 4  ;;  %v4836_v60 = vshll.u32 %v8570_v51, 16 }
 0x2c1   : > { %v4748_v6 = vrot.slane %v4747_v62, 4  ;;  %v8554_v7 = vcombine.low %v4695_v57, %v4705_v12  ;;  %v4785_v62 = vor.u32 %v4784_v27, %v4781_v55  ;;  %v4818_v42 = vrot.slane %v4816_v25, 4 }
 0x2c2   : > { %v346_v57 = vsel %vm7391_vm7, 0, %v345_v46  ;;  %v4830_v12 = vshll.u32 %v4610_v14, 16  ;;  %v8580_v41 = vcombine.low %v4719_v38, %v4729_v59  ;;  %v4822_v25 = vshll.u32 %v8578_v36, 16  ;;  %v4616_v38 = vld [vmem:[#allocation2 + $0x90] sm:$0xf] }
 0x2c3   : > { %6847 = vmatmul.mubr.msk.bf16.gmra.mrb[16].mxu1 %vm441_vm4, %v7224_v24  ;;  %6715 = vmatmul.mubr.msk.bf16.gmra.mrb[52].mxu0 %vm441_vm4, %v6135_v26  ;;  %v4736_v26 = vrot.slane %v4734_v28, 5  ;;  %v7226_v28 = vld [vmem:[#allocation2 + $0x9c] sm:$0xff]   ;;  %v8545_v24 = vld [vmem:[#allocation2 + $0x68] sm:$0x1]  ;;  %347 = vst [vmem:[#allocation2 + $0xd4] sm:$0x1] %v346_v57  ;;  %v4819_v17 = vor.u32 %v4818_v42, %v8572_v58 }
 0x2c4   : > { %6850 = vmatprep.mubr.msk.bf16.mxu1 %vm441_vm4, %v7225_v0  ;;  %6718 = vmatprep.mubr.msk.bf16.mxu0 %vm441_vm4, %v6136_v32  ;;  %v4607_v32 = vld [vmem:[#allocation2 + $0x6c] sm:$0xf]  ;;  %v4798_v48 = vshll.u32 %v8545_v24, 16  ;;  %v4786_v55 = vrot.slane %v4785_v62, 4  ;;  %v8609_v46 = vrot.slane %v4830_v12, 5  ;;  %v4878_v62 = vshll.u32 %v4616_v38, 16 }
 0x2c5   : > { %v4737_v10 = vor.u32 %v4736_v26, %v4733_v16  ;;  %v4803_v0 = vshrl.u32 %v4607_v32, 16  ;;  %v4806_v3 = vshll.u32 %v4607_v32, 16  ;;  %v4776_v16 = vrot.slane %v4774_v22, 5  ;;  %v7228_v22 = vld [vmem:[#allocation2 + $0xb4] sm:$0xff]  }
 0x2c6   : > { %v4762_v26 = vrot.slane %v4761_v2, 4  ;;  %v4827_v32 = vshrl.u32 %v4610_v14, 16  ;;  %v4800_v27 = vrot.slane %v4798_v48, 5  ;;  %v8630_v42 = vrot.slane %v4822_v25, 5  ;;  %v7233_v12 = vld [vmem:[#allocation2 + $0x18] sm:$0xff]  }
 0x2c7   : > { %v4738_v40 = vrot.slane %v4737_v10, 4  ;;  %v4805_v56 = vrot.slane %v4803_v0, 4  ;;  %v4808_v31 = vrot.slane %v4806_v3, 5  ;;  %v4777_v4 = vsel %vm7423_vm10, %v4772_v61, %v4776_v16  ;;  %v8592_v0 = vld [vmem:[#allocation2 + $0x88] sm:$0xf] }
 0x2c8   : > { %v4840_v10 = vshrl.u32 %v8570_v51, 16  ;;  %v4767_v2 = vsel %vm7423_vm10, %v4762_v26, %v8520_v47  ;;  %v4801_v47 = vsel %vm7423_vm10, %v4796_v44, %v4800_v27  ;;  %v8605_v61 = vld [vmem:[#allocation2 + $0x80] sm:$0x1]  ;;  %v8607_v54 = vrot.slane %v4827_v32, 4  ;;  %v5317_v32 = vld [vmem:[#allocation2 + $0x30] sm:$0xe] }
 0x2c9   : > { %v4743_v5 = vsel %vm7423_vm10, %v4738_v40, %v8506_v20  ;;  %v8594_v3 = vcombine.low %v4767_v2, %v4777_v4  ;;  %v4809_v20 = vor.u32 %v4808_v31, %v4805_v56  ;;  %v8613_v40 = vrot.slane %v4836_v60, 5 }
 0x2ca   : > { %v4860_v8 = vshll.u32 %v8592_v0, 16  ;;  %v4791_v16 = vsel %vm7423_vm10, %v4786_v55, %v8540_v50  ;;  %v4864_v14 = vshrl.u32 %v8592_v0, 16  ;;  %v4875_v26 = vshrl.u32 %v4616_v38, 16 }
 0x2cb   : > { %6851 = vmatmul.mubr.msk.bf16.gmra.mrb[20].mxu1 %vm441_vm4, %v7226_v28  ;;  %6719 = vmatmul.mubr.msk.bf16.gmra.mrb[56].mxu0 %vm441_vm4, %v6137_v15  ;;  %v4753_v15 = vsel %vm7423_vm10, %v4748_v6, %v4752_v49  ;;  %v4613_v6 = vld [vmem:[#allocation2 + $0x84] sm:$0xf]  ;;  %v7230_v49 = vld [vmem:[#allocation2 + $0xc] sm:$0xff]   ;;  %v8624_v48 = vcombine.low %v4791_v16, %v4801_v47  ;;  %v8626_v56 = vrot.slane %v4809_v20, 4  ;;  %v8628_v31 = vrot.slane %v4819_v17, 4 }
 0x2cc   : > { %6854 = vmatprep.mubr.msk.bf16.mxu1 %vm441_vm4, %v7227_v21  ;;  %6722 = vmatprep.mubr.msk.bf16.mxu0 %vm441_vm4, %v6138_v35  ;;  %v8587_v28 = vcombine.low %v4743_v5, %v4753_v15  ;;  %v7229_v21 = vld [vmem:[#allocation2 + $0xc0] sm:$0xff]   ;;  %v4851_v59 = vshrl.u32 %v4613_v6, 16  ;;  %v8615_v15 = vrot.slane %v4840_v10, 4  ;;  %v4854_v9 = vshll.u32 %v4613_v6, 16  ;;  %v7231_v35 = vld [vmem:[#allocation2 + $0xcc] sm:$0xff]  }
 0x2cd   : > { %v8642_v10 = vrot.slane %v4860_v8, 5  ;;  %v5395_v6 = vrot.slane %v8422_v29, 5  ;;  %v8645_v2 = vrot.slane %v4864_v14, 4  ;;  %v8647_v55 = vrot.slane %v4875_v26, 4  ;;  %v7234_v20 = vld [vmem:[#allocation2 + $0x24] sm:$0xff]  }
 0x2ce   : > { %v8635_v44 = vrot.slane %v4851_v59, 4  ;;  %v8640_v60 = vrot.slane %v4854_v9, 5  ;;  %v8649_v27 = vrot.slane %v4878_v62, 5  ;;  %v6337_v17 = vrot.slane %v5317_v32, 9  ;;  %v5320_v16 = vld [vmem:[#allocation2 + $0x54] sm:$0xe] }
 0x2cf   : > { %v5397_v25 = vrot.slane %v5395_v6, 4  ;;  %v5398_v38 = vrot.slane %v8458_v19, 5  ;;  %v5409_v47 = vrot.slane %v8462_v1, 5  ;;  %v5405_v8 = vrot.slane %v8500_v43, 5  ;;  %v5321_v26 = vld [vmem:[#allocation2 + $0x60] sm:$0xe] }
 0x2d0   : > { %v8664_v19 = vsel %vm7992_vm1, %v6337_v17, %v5395_v6  ;;  %v5416_v6 = vrot.slane %v8489_v39, 5  ;;  %v7235_v39 = vld [vmem:[#allocation2 + $0x30] sm:$0xff]   ;;  %v8765_v17 = vld [vmem:[#allocation2 + $0xb8] sm:$0xf] }
 0x2d1   : > { %v5411_v14 = vrot.slane %v5409_v47, 4 }
 0x2d3   : > { %6855 = vmatmul.mubr.msk.bf16.gmra.mrb[24].mxu1 %vm441_vm4, %v7228_v22  ;;  %6723 = vmatmul.mubr.msk.bf16.gmra.mrb[60].mxu0 %vm441_vm4, %v6139_v11  ;;  %v8618_v11 = vld [vmem:[#allocation2 + $0x94] sm:$0xf]  ;;  %v5318_v22 = vld [vmem:[#allocation2 + $0x3c] sm:$0xe] }
 0x2d4   : > { %6858 = vmatprep.mubr.msk.bf16.mxu1 %vm441_vm4, %v7229_v21  ;;  %6728 = vmatprep.mubr.msk.bf16.mxu0 %vm441_vm4, %v7230_v49  ;;  %v4884_v50 = vshll.u32 %v8618_v11, 16  ;;  %v5402_v21 = vrot.slane %v8460_v23, 5  ;;  %v5319_v49 = vld [vmem:[#allocation2 + $0x48] sm:$0xe]  ;;  %v6338_v59 = vrot.slane %v5318_v22, 9  ;;  %v8668_v23 = vsel %vm7992_vm1, %v5397_v25, %v5398_v38 }
 0x2d5   : > { %v6339_v1 = vrot.slane %v5319_v49, 9  ;;  %v5322_v22 = vld [vmem:[#allocation2 + $0x6c] sm:$0xe]  ;;  %v5419_v49 = vrot.slane %v8531_v33, 5  ;;  %v5418_v25 = vrot.slane %v5416_v6, 4  ;;  %v5426_v38 = vrot.slane %v8545_v24, 5 }
 0x2d6   : > { %v8656_v29 = vrot.slane %v4884_v50, 5  ;;  %v5404_v9 = vrot.slane %v5402_v21, 4  ;;  %v8674_v62 = vsel %vm7992_vm1, %v6338_v59, %v5402_v21  ;;  %v5323_v59 = vld [vmem:[#allocation2 + $0x78] sm:$0xe]  ;;  %v5433_v24 = vrot.slane %v8578_v36, 5  ;;  %v7237_v50 = vld [vmem:[#allocation2 + $0x48] sm:$0xff]  }
 0x2d7   : > { %v8685_v32 = vsel %vm7992_vm1, %v6339_v1, %v5409_v47  ;;  %v5430_v47 = vrot.slane %v8542_v13, 5  ;;  %v5437_v13 = vrot.slane %v8570_v51, 5  ;;  %v6343_v51 = vrot.slane %v5323_v59, 9 }
 0x2d9   : > { %v5432_v1 = vrot.slane %v5430_v47, 4 }
 0x2db   : > { %6859 = vmatmul.mubr.msk.bf16.gmra.mrb[28].mxu1 %vm441_vm4, %v7231_v35  ;;  %6729 = vmatmul.mubr.msk.bf16.vlgmr.msra.gmra.mrb[32].mxu0 %vm441_vm4, %v7233_v12  ;;  %v5412_v35 = vrot.slane %v8518_v18, 5  ;;  %v6340_v12 = vrot.slane %v5320_v16, 9  ;;  %v5423_v18 = vrot.slane %v8508_v63, 5  ;;  %v6342_v63 = vrot.slane %v5322_v22, 9  ;;  %v5325_v22 = vld [vmem:[#allocation2 + $0x90] sm:$0xe] }
 0x2dc   : > { %6864 = vmatprep.mubr.msk.bf16.mxu1 %vm441_vm4, %v8491_v34  ;;  %6732 = vmatprep.mubr.msk.bf16.mxu0 %vm441_vm4, %v7234_v20  ;;  %v8678_v34 = vsel %vm7992_vm1, %v5404_v9, %v5405_v8  ;;  %v6341_v20 = vrot.slane %v5321_v26, 9  ;;  %v8708_v16 = vsel %vm7992_vm1, %v5418_v25, %v5419_v49  ;;  %v7236_v26 = vld [vmem:[#allocation2 + $0x3c] sm:$0xff]   ;;  %v5439_v25 = vrot.slane %v5437_v13, 4 }
 0x2dd   : > { %v8690_v21 = vsel %vm7992_vm1, %v5411_v14, %v5412_v35  ;;  %v8700_v9 = vsel %vm7992_vm1, %v6340_v12, %v5416_v6  ;;  %v5425_v8 = vrot.slane %v5423_v18, 4  ;;  %v5324_v14 = vld [vmem:[#allocation2 + $0x84] sm:$0xe]  ;;  %v8715_v35 = vld [vmem:[#allocation2 + $0x8c] sm:$0x1]  ;;  %v8725_v36 = vsel %vm7992_vm1, %v6342_v63, %v5430_v47 }
 0x2de   : > { %v8704_v33 = vsel %vm7992_vm1, %v6341_v20, %v5423_v18  ;;  %9190 = vst [vmem:[#allocation4_spill] sm:$0xff] %v8725_v36  ;;  %v8732_v49 = vld [vmem:[#allocation2 + $0xa0] sm:$0xf]  ;;  %v8738_v18 = vsel %vm7992_vm1, %v5432_v1, %v5433_v24  ;;  %v8748_v47 = vsel %vm7992_vm1, %v6343_v51, %v5437_v13  ;;  %v6344_v59 = vrot.slane %v5324_v14, 9  ;;  %v8751_v63 = vld [vmem:[#allocation2 + $0xa4] sm:$0x1] }
 0x2df   : > { %v8721_v6 = vsel %vm7992_vm1, %v5425_v8, %v5426_v38  ;;  %9191 = vst [vmem:[#allocation3_spill] sm:$0xff] %v8738_v18  ;;  %v5440_v38 = vrot.slane %v8605_v61, 5  ;;  %9192 = vst [vmem:[#allocation5_spill] sm:$0xff] %v8748_v47  ;;  %v5326_v8 = vld [vmem:[#allocation2 + $0x9c] sm:$0xe]  ;;  %v5447_v24 = vrot.slane %v8715_v35, 5  ;;  %v9207_v52 = vcombine.low %v8685_v32, %v8690_v21 }
 0x2e0   : > { %v5451_v20 = vrot.slane %v8618_v11, 5  ;;  %v5327_v51 = vld [vmem:[#allocation2 + $0xa8] sm:$0xe]  ;;  %v8763_v12 = vld [vmem:[#allocation2 + $0xb0] sm:$0x1]  ;;  %v5461_v5 = vrot.slane %v8751_v63, 5  ;;  %v9208_v37 = vcombine.low %v8700_v9, %v8708_v16 }
 0x2e1   : > { %v8755_v1 = vsel %vm7992_vm1, %v5439_v25, %v5440_v38  ;;  %v7238_v47 = vld [vmem:[#allocation2 + $0x54] sm:$0xff]   ;;  %v8798_v18 = vld [vmem:[#allocation2 + $0xc8] sm:$0x1] }
 0x2e2   : > { %9193 = vst [vmem:[#allocation6_spill] sm:$0xff] %v8755_v1  ;;  %v5453_v38 = vrot.slane %v5451_v20, 4  ;;  %v5328_v1 = vld [vmem:[#allocation2 + $0xb4] sm:$0xe] }
 0x2e3   : > { %6865 = vmatmul.mubr.msk.bf16.vlgmr.msra.gmra.mrb[0].mxu1 %vm441_vm4, %v8510_v45  ;;  %6733 = vmatmul.mubr.msk.bf16.gmra.mrb[36].mxu0 %vm441_vm4, %v7235_v39  ;;  %v8730_v45 = vld [vmem:[#allocation2 + $0x98] sm:$0x1]  ;;  %v5444_v39 = vrot.slane %v8592_v0, 5  ;;  %v5458_v0 = vrot.slane %v8732_v49, 5 }
 0x2e4   : > { %6897 = vmatpush3.bf16.msra.mxu1 %v8475_v53  ;;  %6868 = vmatprep.mubr.msk.bf16.mxu1 %vm441_vm4, %v8554_v7  ;;  %v8742_v53 = vld [vmem:[#allocation2 + $0xac] sm:$0xf]  ;;  %v5454_v14 = vrot.slane %v8730_v45, 5  ;;  %v6346_v7 = vrot.slane %v5326_v8, 9 }
 0x2e5   : > { %6736 = vmatprep.mubr.msk.bf16.mxu0 %vm441_vm4, %v7236_v26  ;;  %v6345_v26 = vrot.slane %v5325_v22, 9  ;;  %v5446_v13 = vrot.slane %v5444_v39, 4  ;;  %v8769_v25 = vsel %vm7992_vm1, %v6344_v59, %v5444_v39  ;;  %v5460_v4 = vrot.slane %v5458_v0, 4  ;;  %v8781_v59 = vld [vmem:[#allocation2 + $0xc4] sm:$0xf] }
 0x2e6   : > { %9194 = vst [vmem:[#allocation7_spill] sm:$0xff] %v8769_v25  ;;  %v5465_v57 = vrot.slane %v8742_v53, 5  ;;  %v8791_v8 = vsel %vm7992_vm1, %v6346_v7, %v5458_v0  ;;  %v5468_v0 = vrot.slane %v8763_v12, 5  ;;  %v5329_v39 = vld [vmem:[#allocation2 + $0xc0] sm:$0xe] }
 0x2e7   : > { %v8773_v22 = vsel %vm7992_vm1, %v6345_v26, %v5451_v20  ;;  %v8777_v43 = vsel %vm7992_vm1, %v5446_v13, %v5447_v24  ;;  %v8787_v20 = vsel %vm7992_vm1, %v5453_v38, %v5454_v14  ;;  %9198 = vst [vmem:[#allocation11_spill] sm:$0xff] %v8791_v8  ;;  %v6347_v24 = vrot.slane %v5327_v51, 9  ;;  %v5330_v26 = vld [vmem:[#allocation2 + $0xcc] sm:$0xe]  ;;  %v8796_v13 = vld [vmem:[#allocation2 + $0xbc] sm:$0x1] }
 0x2e8   : > { %9195 = vst [vmem:[#allocation8_spill] sm:$0xff] %v8773_v22  ;;  %9196 = vst [vmem:[#allocation9_spill] sm:$0xff] %v8777_v43  ;;  %v8804_v14 = vsel %vm7992_vm1, %v5460_v4, %v5461_v5  ;;  %v5467_v7 = vrot.slane %v5465_v57, 4  ;;  %v6348_v51 = vrot.slane %v5328_v1, 9  ;;  %v5472_v38 = vrot.slane %v8765_v17, 5 }
 0x2e9   : > { %9197 = vst [vmem:[#allocation10_spill] sm:$0xff] %v8787_v20  ;;  %9199 = vst [vmem:[#allocation12_spill] sm:$0xff] %v8804_v14  ;;  %v8814_v20 = vld [vmem:[#allocation2 + $0xd0] sm:$0xf]  ;;  %v8818_v4 = vsel %vm7992_vm1, %v6347_v24, %v5465_v57  ;;  %v5479_v5 = vrot.slane %v8781_v59, 5  ;;  %v5475_v14 = vrot.slane %v8796_v13, 5 }
 0x2ea   : > { %9200 = vst [vmem:[#allocation13_spill] sm:$0xff] %v8818_v4  ;;  %v5486_v8 = vrot.slane %v8814_v20, 5  ;;  %v6349_v22 = vrot.slane %v5329_v39, 9  ;;  %v5482_v24 = vrot.slane %v8798_v18, 5  ;;  %v7239_v4 = vld [vmem:[#allocation2 + $0x60] sm:$0xff]  }
 0x2eb   : > { %6869 = vmatmul.mubr.msk.bf16.gmra.mrb[4].mxu1 %vm441_vm4, %v8580_v41  ;;  %6737 = vmatmul.mubr.msk.bf16.gmra.mrb[40].mxu0 %vm441_vm4, %v7237_v50  ;;  %v4888_v41 = vshrl.u32 %v8618_v11, 16  ;;  %v6350_v11 = vrot.slane %v5330_v26, 9  ;;  %v5474_v50 = vrot.slane %v5472_v38, 4  ;;  %v5481_v57 = vrot.slane %v5479_v5, 4  ;;  %v4619_v43 = vld [vmem:[#allocation2 + $0x9c] sm:$0xf] }
 0x2ec   : > { %6872 = vmatprep.mubr.msk.bf16.mxu1 %vm441_vm4, %v8587_v28  ;;  %6740 = vmatprep.mubr.msk.bf16.mxu0 %vm441_vm4, %v7238_v47  ;;  %v8822_v28 = vsel %vm7992_vm1, %v5467_v7, %v5468_v0  ;;  %v8825_v47 = vld [vmem:[#allocation2 + $0xd4] sm:$0x1]  ;;  %v8835_v0 = vsel %vm7992_vm1, %v6348_v51, %v5472_v38  ;;  %v8849_v36 = vsel %vm7992_vm1, %v6349_v22, %v5479_v5 }
 0x2ed   : > { %9201 = vst [vmem:[#allocation14_spill] sm:$0xff] %v8822_v28  ;;  %v5489_v7 = vrot.slane %v8825_v47, 5  ;;  %v8839_v26 = vsel %vm7992_vm1, %v5474_v50, %v5475_v14  ;;  %v8843_v1 = vsel %vm7992_vm1, %v6350_v11, %v5486_v8  ;;  %v5488_v28 = vrot.slane %v5486_v8, 4  ;;  %v7240_v14 = vld [vmem:[#allocation2 + $0x6c] sm:$0xff]   ;;  %v9216_v21 = vld [vmem:[#allocation7_spill] sm:$0xff] }
 0x2ee   : > { %v4890_v39 = vrot.slane %v4888_v41, 4  ;;  %v6364_v25 = vcombine.low %v8835_v0, %v8839_v26  ;;  %v8853_v51 = vsel %vm7992_vm1, %v5481_v57, %v5482_v24  ;;  %v4825_v8 = vsel %vm7423_vm10, %v8628_v31, %v8630_v42 }
 0x2ef   : > { %v9202_v41 = vor.u32 %v8609_v46, %v8607_v54  ;;  %v6365_v38 = vcombine.low %v8849_v36, %v8853_v51  ;;  %v8866_v22 = vsel %vm7992_vm1, %v5488_v28, %v5489_v7  ;;  %v4815_v31 = vsel %vm7423_vm10, %v8626_v56, %v8572_v58  ;;  %v9219_v16 = vld [vmem:[#allocation8_spill] sm:$0xff] }
 0x2f0   : > { %v9203_v54 = vor.u32 %v8615_v15, %v8613_v40  ;;  %v4899_v28 = vshrl.u32 %v4619_v43, 16  ;;  %v4902_v58 = vshll.u32 %v4619_v43, 16  ;;  %v6309_v56 = vcombine.low %v4815_v31, %v4825_v8  ;;  %v4622_v43 = vld [vmem:[#allocation2 + $0xa8] sm:$0xf]  ;;  %v7241_v8 = vld [vmem:[#allocation2 + $0x78] sm:$0xff]  }
 0x2f1   : > { %v4834_v50 = vrot.slane %v9202_v41, 4  ;;  %v9204_v15 = vshll.u32 %v8605_v61, 16  ;;  %v4881_v11 = vor.u32 %v8649_v27, %v8647_v55  ;;  %v4891_v57 = vor.u32 %v4890_v39, %v8656_v29 }
 0x2f2   : > { %v4844_v46 = vrot.slane %v9203_v54, 4  ;;  %v4894_v24 = vshll.u32 %v8730_v45, 16  ;;  %v4932_v55 = vshll.u32 %v8742_v53, 16  ;;  %v4936_v27 = vshrl.u32 %v8742_v53, 16  ;;  %v7242_v54 = vld [vmem:[#allocation2 + $0x84] sm:$0xff]  }
 0x2f3   : > { %6873 = vmatmul.mubr.msk.bf16.gmra.mrb[8].mxu1 %vm441_vm4, %v8594_v3  ;;  %6741 = vmatmul.mubr.msk.bf16.gmra.mrb[44].mxu0 %vm441_vm4, %v7239_v4  ;;  %v4857_v3 = vor.u32 %v8640_v60, %v8635_v44  ;;  %v4867_v4 = vor.u32 %v8645_v2, %v8642_v10  ;;  %v4848_v5 = vrot.slane %v9204_v15, 5  ;;  %v4870_v44 = vshll.u32 %v8715_v35, 16 }
 0x2f4   : > { %6876 = vmatprep.mubr.msk.bf16.mxu1 %vm441_vm4, %v8624_v48  ;;  %6744 = vmatprep.mubr.msk.bf16.mxu0 %vm441_vm4, %v7240_v14  ;;  %v4839_v48 = vsel %vm7423_vm10, %v4834_v50, %v8613_v40  ;;  %v4908_v60 = vshll.u32 %v8732_v49, 16  ;;  %v4912_v2 = vshrl.u32 %v8732_v49, 16  ;;  %v4901_v14 = vrot.slane %v4899_v28, 4 }
 0x2f5   : > { %v4849_v61 = vsel %vm7423_vm10, %v4844_v46, %v4848_v5  ;;  %v4858_v7 = vrot.slane %v4857_v3, 4  ;;  %v4868_v39 = vrot.slane %v4867_v4, 4  ;;  %v4904_v40 = vrot.slane %v4902_v58, 5  ;;  %v4625_v4 = vld [vmem:[#allocation2 + $0xb4] sm:$0xf] }
 0x2f6   : > { %v4882_v35 = vrot.slane %v4881_v11, 4  ;;  %v4892_v41 = vrot.slane %v4891_v57, 4  ;;  %v4923_v50 = vshrl.u32 %v4622_v43, 16  ;;  %v4926_v31 = vshll.u32 %v4622_v43, 16 }
 0x2f7   : > { %v6310_v49 = vcombine.low %v4839_v48, %v4849_v61  ;;  %v4872_v15 = vrot.slane %v4870_v44, 5  ;;  %v8903_v42 = vrot.slane %v4908_v60, 5  ;;  %v4914_v46 = vrot.slane %v4912_v2, 4  ;;  %v4628_v61 = vld [vmem:[#allocation2 + $0xc0] sm:$0xf] }
 0x2f8   : > { %v4896_v45 = vrot.slane %v4894_v24, 5  ;;  %v8907_v53 = vrot.slane %v4932_v55, 5  ;;  %v4938_v3 = vrot.slane %v4936_v27, 4  ;;  %v4863_v28 = vsel %vm7423_vm10, %v4858_v7, %v8642_v10 }
 0x2f9   : > { %v4873_v58 = vsel %vm7423_vm10, %v4868_v39, %v4872_v15  ;;  %v4905_v5 = vor.u32 %v4904_v40, %v4901_v14  ;;  %v4887_v11 = vsel %vm7423_vm10, %v4882_v35, %v8656_v29  ;;  %v4925_v48 = vrot.slane %v4923_v50, 4  ;;  %v7243_v40 = vld [vmem:[#allocation2 + $0x90] sm:$0xff]  }
 0x2fa   : > { %v4897_v57 = vsel %vm7423_vm10, %v4892_v41, %v4896_v45  ;;  %v4928_v44 = vrot.slane %v4926_v31, 5  ;;  %v4915_v60 = vor.u32 %v4914_v46, %v8903_v42  ;;  %v4947_v2 = vshrl.u32 %v4625_v4, 16  ;;  %v4631_v31 = vld [vmem:[#allocation2 + $0xcc] sm:$0xf] }
 0x2fb   : > { %6877 = vmatmul.mubr.msk.bf16.gmra.mrb[12].mxu1 %vm441_vm4, %v6309_v56  ;;  %6745 = vmatmul.mubr.msk.bf16.gmra.mrb[48].mxu0 %vm441_vm4, %v7241_v8  ;;  %v4918_v56 = vshll.u32 %v8751_v63, 16  ;;  %v4956_v10 = vshll.u32 %v8765_v17, 16  ;;  %v4960_v43 = vshrl.u32 %v8765_v17, 16  ;;  %v4939_v24 = vor.u32 %v4938_v3, %v8907_v53  ;;  %v7244_v17 = vld [vmem:[#allocation2 + $0x9c] sm:$0xff]  }
 0x2fc   : > { %6880 = vmatprep.mubr.msk.bf16.mxu1 %vm441_vm4, %v6310_v49  ;;  %6748 = vmatprep.mubr.msk.bf16.mxu0 %vm441_vm4, %v7242_v54  ;;  %v4950_v63 = vshll.u32 %v4625_v4, 16  ;;  %v4980_v55 = vshll.u32 %v8781_v59, 16  ;;  %v4984_v29 = vshrl.u32 %v8781_v59, 16  ;;  %v6311_v27 = vcombine.low %v4863_v28, %v4873_v58 }
 0x2fd   : > { %v6312_v7 = vcombine.low %v4887_v11, %v4897_v57  ;;  %v4906_v39 = vrot.slane %v4905_v5, 4  ;;  %v4920_v14 = vrot.slane %v4918_v56, 5  ;;  %v4929_v8 = vor.u32 %v4928_v44, %v4925_v48 }
 0x2fe   : > { %v4942_v35 = vshll.u32 %v8763_v12, 16  ;;  %v4971_v41 = vshrl.u32 %v4628_v61, 16  ;;  %v4974_v50 = vshll.u32 %v4628_v61, 16  ;;  %v4916_v49 = vrot.slane %v4915_v60, 4 }
 0x2ff   : > { %v4949_v54 = vrot.slane %v4947_v2, 4  ;;  %v4958_v15 = vrot.slane %v4956_v10, 5  ;;  %v4962_v46 = vrot.slane %v4960_v43, 4  ;;  %v4940_v59 = vrot.slane %v4939_v24, 4 }
 0x300   : > { %v4952_v45 = vrot.slane %v4950_v63, 5  ;;  %v4982_v3 = vrot.slane %v4980_v55, 5  ;;  %v4986_v4 = vrot.slane %v4984_v29, 4  ;;  %v4995_v12 = vshrl.u32 %v4631_v31, 16 }
 0x301   : > { %v4998_v28 = vshll.u32 %v4631_v31, 16  ;;  %v5004_v58 = vshll.u32 %v8814_v20, 16  ;;  %v5008_v5 = vshrl.u32 %v8814_v20, 16  ;;  %v4930_v56 = vrot.slane %v4929_v8, 4  ;;  %v7246_v8 = vld [vmem:[#allocation2 + $0xb4] sm:$0xff]  }
 0x302   : > { %v4944_v11 = vrot.slane %v4942_v35, 5  ;;  %v4973_v57 = vrot.slane %v4971_v41, 4  ;;  %v4976_v48 = vrot.slane %v4974_v50, 5  ;;  %v4911_v44 = vsel %vm7423_vm10, %v4906_v39, %v8903_v42 }
 0x303   : > { %6881 = vmatmul.mubr.msk.bf16.gmra.mrb[16].mxu1 %vm441_vm4, %v6311_v27  ;;  %6749 = vmatmul.mubr.msk.bf16.gmra.mrb[52].mxu0 %vm441_vm4, %v7243_v40  ;;  %v4921_v60 = vsel %vm7423_vm10, %v4916_v49, %v4920_v14  ;;  %v4963_v2 = vor.u32 %v4962_v46, %v4958_v15  ;;  %v4953_v43 = vor.u32 %v4952_v45, %v4949_v54  ;;  %v4966_v61 = vshll.u32 %v8796_v13, 16 }
 0x304   : > { %6884 = vmatprep.mubr.msk.bf16.mxu1 %vm441_vm4, %v6312_v7  ;;  %6752 = vmatprep.mubr.msk.bf16.mxu0 %vm441_vm4, %v7244_v17  ;;  %v4945_v10 = vsel %vm7423_vm10, %v4940_v59, %v4944_v11  ;;  %v4987_v24 = vor.u32 %v4986_v4, %v4982_v3  ;;  %v4997_v20 = vrot.slane %v4995_v12, 4  ;;  %v5000_v63 = vrot.slane %v4998_v28, 5  ;;  %v7245_v7 = vld [vmem:[#allocation2 + $0xa8] sm:$0xff]   ;;  %v7301_v59 = vld [vmem:[#allocation2 + $0x1c] sm:$0xf] }
 0x305   : > { %v5006_v55 = vrot.slane %v5004_v58, 5  ;;  %v5010_v29 = vrot.slane %v5008_v5, 4  ;;  %v6313_v27 = vcombine.low %v4911_v44, %v4921_v60  ;;  %v4935_v42 = vsel %vm7423_vm10, %v4930_v56, %v8907_v53  ;;  %v7247_v56 = vld [vmem:[#allocation2 + $0xc0] sm:$0xff]   ;;  %v5315_v44 = vld [vmem:[#allocation2 + $0x18] sm:$0xe] }
 0x306   : > { %v4977_v39 = vor.u32 %v4976_v48, %v4973_v57  ;;  %v4990_v14 = vshll.u32 %v8798_v18, 16  ;;  %v6314_v40 = vcombine.low %v4935_v42, %v4945_v10  ;;  %v4964_v35 = vrot.slane %v4963_v2, 4  ;;  %v7302_v60 = vld [vmem:[#allocation2 + $0x20] sm:$0x1]  ;;  %v7303_v10 = vld [vmem:[#allocation2 + $0x28] sm:$0xf] }
 0x307   : > { %v4968_v13 = vrot.slane %v4966_v61, 5  ;;  %v4988_v41 = vrot.slane %v4987_v24, 4  ;;  %v4954_v50 = vrot.slane %v4953_v43, 4  ;;  %v5001_v31 = vor.u32 %v5000_v63, %v4997_v20 }
 0x308   : > { %v5011_v53 = vor.u32 %v5010_v29, %v5006_v55  ;;  %v5014_v17 = vshll.u32 %v8825_v47, 16  ;;  %v4978_v49 = vrot.slane %v4977_v39, 4  ;;  %v4992_v18 = vrot.slane %v4990_v14, 5 }
 0x309   : > { %v4969_v54 = vsel %vm7423_vm10, %v4964_v35, %v4968_v13  ;;  %v5381_v45 = vrot.slane %v7301_v59, 5  ;;  %v4959_v4 = vsel %vm7423_vm10, %v4954_v50, %v4958_v15  ;;  %v5002_v12 = vrot.slane %v5001_v31, 4  ;;  %v9214_v35 = vld [vmem:[#allocation6_spill] sm:$0xff]  ;;  %v9217_v13 = vld [vmem:[#allocation9_spill] sm:$0xff]  ;;  %v9223_v50 = vld [vmem:[#allocation12_spill] sm:$0xff] }
 0x30a   : > { %v4993_v46 = vsel %vm7423_vm10, %v4988_v41, %v4992_v18  ;;  %v5012_v28 = vrot.slane %v5011_v53, 4  ;;  %v5016_v58 = vrot.slane %v5014_v17, 5  ;;  %v6315_v5 = vcombine.low %v4959_v4, %v4969_v54  ;;  %v9220_v41 = vld [vmem:[#allocation10_spill] sm:$0xff]  ;;  %v9225_v53 = vld [vmem:[#allocation13_spill] sm:$0xff] }
 0x30b   : > { %6885 = vmatmul.mubr.msk.bf16.gmra.mrb[20].mxu1 %vm441_vm4, %v6313_v27  ;;  %6753 = vmatmul.mubr.msk.bf16.gmra.mrb[56].mxu0 %vm441_vm4, %v7245_v7  ;;  %v4983_v47 = vsel %vm7423_vm10, %v4978_v49, %v4982_v3  ;;  %v5383_v57 = vrot.slane %v5381_v45, 4  ;;  %v5007_v48 = vsel %vm7423_vm10, %v5002_v12, %v5006_v55  ;;  %v5384_v2 = vrot.slane %v7302_v60, 5  ;;  %v5316_v55 = vld [vmem:[#allocation2 + $0x24] sm:$0xe]  ;;  %v9226_v17 = vld [vmem:[#allocation14_spill] sm:$0xff] }
 0x30c   : > { %6888 = vmatprep.mubr.msk.bf16.mxu1 %vm441_vm4, %v6314_v40  ;;  %6756 = vmatprep.mubr.msk.bf16.mxu0 %vm441_vm4, %v7246_v8  ;;  %v6316_v11 = vcombine.low %v4983_v47, %v4993_v46  ;;  %v5017_v15 = vsel %vm7423_vm10, %v5012_v28, %v5016_v58  ;;  %v5388_v3 = vrot.slane %v7303_v10, 5  ;;  %v6335_v61 = vrot.slane %v5315_v44, 9  ;;  %v9211_v8 = vld [vmem:[#allocation3_spill] sm:$0xff] }
 0x30d   : > { %v6317_v43 = vcombine.low %v5007_v48, %v5017_v15  ;;  %v5385_v24 = vsel %vm7992_vm1, %v5383_v57, %v5384_v2  ;;  %v6336_v27 = vrot.slane %v5316_v55, 9  ;;  %v9205_v14 = vcombine.low %v8664_v19, %v8668_v23  ;;  %v9210_v23 = vld [vmem:[#allocation4_spill] sm:$0xff] }
 0x30e   : > { %v5382_v20 = vsel %vm7992_vm1, %v6335_v61, %v5381_v45  ;;  %v5390_v29 = vrot.slane %v5388_v3, 4  ;;  %v9206_v40 = vcombine.low %v8674_v62, %v8678_v34  ;;  %v9209_v19 = vcombine.low %v8704_v33, %v8721_v6  ;;  %v9213_v34 = vld [vmem:[#allocation5_spill] sm:$0xff]  ;;  %v9222_v6 = vld [vmem:[#allocation11_spill] sm:$0xff] }
 0x30f   : > { %v6351_v63 = vcombine.low %v5382_v20, %v5385_v24  ;;  %v5389_v7 = vsel %vm7992_vm1, %v6336_v27, %v5388_v3  ;;  %v9212_v62 = vcombine.low %v9210_v23, %v9211_v8  ;;  %v9215_v32 = vcombine.low %v9213_v34, %v9214_v35 }
 0x310   : > { %v5392_v42 = vsel %vm7992_vm1, %v5390_v29, %v5391_v30  ;;  %v9218_v9 = vcombine.low %v9216_v21, %v9217_v13  ;;  %v9221_v33 = vcombine.low %v9219_v16, %v9220_v41  ;;  %v9224_v31 = vcombine.low %v9222_v6, %v9223_v50  ;;  %v9076_v30 = vld [vmem:[%s9156_s4] ss:$0 sm:$0xff] }
 0x311   : > { %v6352_v39 = vcombine.low %v5389_v7, %v5392_v42  ;;  %v9227_v49 = vcombine.low %v9225_v53, %v9226_v17  ;;  %v9228_v18 = vcombine.low %v8843_v1, %v8866_v22 }
 0x313   : > { %6889 = vmatmul.mubr.msk.bf16.gmra.mrb[24].mxu1 %vm441_vm4, %v6315_v5  ;;  %6757 = vmatmul.mubr.msk.bf16.gmra.mrb[60].mxu0 %vm441_vm4, %v7247_v56 }
 0x314   : > { %6892 = vmatprep.mubr.msk.bf16.mxu1 %vm441_vm4, %v6316_v11 }
 0x31b   : > { %6893 = vmatmul.mubr.msk.bf16.gmra.mrb[28].mxu1 %vm441_vm4, %v6317_v43 }
 0x31c   : > { %6898 = vmatprep.mubr.msk.bf16.mxu1 %vm441_vm4, %v6351_v63 }
 0x323   : > { %6899 = vmatmul.mubr.msk.bf16.vlgmr.msra.gmra.mrb[0].mxu1 %vm441_vm4, %v6352_v39 }
 0x324   : > { %6902 = vmatprep.mubr.msk.bf16.mxu1 %vm441_vm4, %v9205_v14 }
 0x32b   : > { %6903 = vmatmul.mubr.msk.bf16.gmra.mrb[4].mxu1 %vm441_vm4, %v9206_v40 }
 0x32c   : > { %6906 = vmatprep.mubr.msk.bf16.mxu1 %vm441_vm4, %v9207_v52 }
 0x333   : > { %6907 = vmatmul.mubr.msk.bf16.gmra.mrb[8].mxu1 %vm441_vm4, %v9208_v37 }
 0x334   : > { %6910 = vmatprep.mubr.msk.bf16.mxu1 %vm441_vm4, %v9209_v19 }
 0x33b   : > { %6911 = vmatmul.mubr.msk.bf16.gmra.mrb[12].mxu1 %vm441_vm4, %v9212_v62 }
 0x33c   : > { %6914 = vmatprep.mubr.msk.bf16.mxu1 %vm441_vm4, %v9215_v32 }
 0x343   : > { %6915 = vmatmul.mubr.msk.bf16.gmra.mrb[16].mxu1 %vm441_vm4, %v9218_v9 }
 0x344   : > { %6918 = vmatprep.mubr.msk.bf16.mxu1 %vm441_vm4, %v9221_v33 }
 0x34b   : > { %6919 = vmatmul.mubr.msk.bf16.gmra.mrb[20].mxu1 %vm441_vm4, %v9224_v31 }
 0x34c   : > { %6922 = vmatprep.mubr.msk.bf16.mxu1 %vm441_vm4, %v9227_v49 }
 0x353   : > { %6923 = vmatmul.mubr.msk.bf16.gmra.mrb[24].mxu1 %vm441_vm4, %v6364_v25 }
 0x354   : > { %6926 = vmatprep.mubr.msk.bf16.mxu1 %vm441_vm4, %v6365_v38 }
 0x35b   : > { %6927 = vmatmul.mubr.msk.bf16.gmra.mrb[28].mxu1 %vm441_vm4, %v9228_v18 }
 0x3ae   : > { %v6730_v54 = vpop.f32.mrb[32].mxu0 }
 0x3af   : > { %v2871_v46 = vpop.f32.mrb[33].mxu0 }
 0x3b0   : > { %v6731_v59 = vpop.f32.mrb[34].mxu0 }
 0x3b1   : > { %v2874_v45 = vpop.f32.mrb[35].mxu0 }
 0x3b6   : > { %v6734_v4 = vpop.f32.mrb[36].mxu0 }
 0x3b7   : > { %v2887_v12 = vpop.f32.mrb[37].mxu0 }
 0x3b8   : > { %v6735_v28 = vpop.f32.mrb[38].mxu0 }
 0x3b9   : > { %v2890_v0 = vpop.f32.mrb[39].mxu0 }
 0x3be   : > { %v6738_v26 = vpop.f32.mrb[40].mxu0 }
 0x3bf   : > { %v2903_v25 = vpop.f32.mrb[41].mxu0 }
 0x3c0   : > { %v6739_v58 = vpop.f32.mrb[42].mxu0 }
 0x3c1   : > { %v2906_v5 = vpop.f32.mrb[43].mxu0 }
 0x3c6   : > { %v6742_v36 = vpop.f32.mrb[44].mxu0 }
 0x3c7   : > { %v9035_v51 = vpop.f32.mrb[45].mxu0 }
 0x3c8   : > { %v9037_v38 = vpop.f32.mrb[46].mxu0 }
 0x3c9   : > { %v9039_v1 = vpop.f32.mrb[47].mxu0 }
 0x3ce   : > { %v9041_v22 = vpop.f32.mrb[48].mxu0 }
 0x3cf   : > { %v9043_v47 = vpop.f32.mrb[49].mxu0 }
 0x3d0   : > { %v9045_v56 = vpop.f32.mrb[50].mxu0 }
 0x3d1   : > { %v9047_v11 = vpop.f32.mrb[51].mxu0 }
 0x3d6   : > { %v9049_v57 = vpop.f32.mrb[52].mxu0 }
 0x3d7   : > { %v9051_v48 = vpop.f32.mrb[53].mxu0 }
 0x3d8   : > { %v9053_v15 = vpop.f32.mrb[54].mxu0 }
 0x3d9   : > { %v9055_v44 = vpop.f32.mrb[55].mxu0 }
 0x3de   : > { %v9057_v60 = vpop.f32.mrb[56].mxu0 }
 0x3df   : > { %v9059_v2 = vpop.f32.mrb[57].mxu0 }
 0x3e0   : > { %v9061_v10 = vpop.f32.mrb[58].mxu0 }
 0x3e1   : > { %v9063_v3 = vpop.f32.mrb[59].mxu0 }
 0x3e6   : > { %v9065_v43 = vpop.f32.mrb[60].mxu0 }
 0x3e7   : > { %v9067_v61 = vpop.f32.mrb[61].mxu0 }
 0x3e8   : > { %v9069_v24 = vpop.f32.mrb[62].mxu0 }
 0x3e9   : > { %v9071_v20 = vpop.f32.mrb[63].mxu0 }
 0x3f6   : > { %v6900_v63 = vpop.f32.mrb[0].mxu1 }
 0x3f7   : > { %v6930_v29 = vadd.f32 %v6900_v63, %v6730_v54  ;;  %v5625_v55 = vpop.f32.mrb[1].mxu1 }
 0x3f8   : > { %v6931_v27 = vadd.f32 %v5625_v55, %v2871_v46  ;;  %v6901_v42 = vpop.f32.mrb[2].mxu1 }
 0x3f9   : > { %v6932_v7 = vadd.f32 %v6901_v42, %v6731_v59  ;;  %v5628_v39 = vpop.f32.mrb[3].mxu1  ;;  %v5792_v32 = vadd.f32 %v6930_v29, %v9076_v30 }
 0x3fa   : > { %v6933_v14 = vadd.f32 %v5628_v39, %v2874_v45  ;;  %v5790_v40 = vadd.f32 %v6931_v27, %v9076_v30 }
 0x3fb   : > { %v5824_v16 = vmax.f32 %v5792_v32, 0.0  ;;  %v5793_v41 = vadd.f32 %v6932_v7, %v9076_v30 }
 0x3fc   : > { %v5822_v52 = vmax.f32 %v5790_v40, 0.0  ;;  %v5791_v37 = vadd.f32 %v6933_v14, %v9076_v30 }
 0x3fd   : > { %v5825_v17 = vmax.f32 %v5793_v41, 0.0 }
 0x3fe   : > { %v6904_v19 = vpop.f32.mrb[4].mxu1  ;;  %5856 = vxpose.xlu1.b32.start [1/16] (narrow) %v5822_v52, 8  ;;  %v5823_v35 = vmax.f32 %v5791_v37, 0.0 }
 0x3ff   : > { %v6934_v23 = vadd.f32 %v6904_v19, %v6734_v4  ;;  %v5641_v8 = vpop.f32.mrb[5].mxu1 }
 0x400   : > { %v6935_v62 = vadd.f32 %v5641_v8, %v2887_v12  ;;  %v6905_v34 = vpop.f32.mrb[6].mxu1 }
 0x401   : > { %v6936_v21 = vadd.f32 %v6905_v34, %v6735_v28  ;;  %v5644_v13 = vpop.f32.mrb[7].mxu1  ;;  %v5796_v63 = vadd.f32 %v6934_v23, %v9076_v30 }
 0x402   : > { %v6937_v9 = vadd.f32 %v5644_v13, %v2890_v0  ;;  %5857 = vxpose.xlu1.b32.cont [2/16] (narrow) %v5823_v35, 8  ;;  %v5794_v49 = vadd.f32 %v6935_v62, %v9076_v30 }
 0x403   : > { %v5828_v55 = vmax.f32 %v5796_v63, 0.0  ;;  %v5797_v27 = vadd.f32 %v6936_v21, %v9076_v30 }
 0x404   : > { %v5826_v59 = vmax.f32 %v5794_v49, 0.0  ;;  %v5795_v45 = vadd.f32 %v6937_v9, %v9076_v30 }
 0x405   : > { %v5829_v14 = vmax.f32 %v5797_v27, 0.0 }
 0x406   : > { %v6908_v33 = vpop.f32.mrb[8].mxu1  ;;  %5858 = vxpose.xlu1.b32.cont [3/16] (narrow) %v5824_v16, 8 }
 0x407   : > { %v6938_v6 = vadd.f32 %v6908_v33, %v6738_v26  ;;  %v5657_v50 = vpop.f32.mrb[9].mxu1 }
 0x408   : > { %v6939_v31 = vadd.f32 %v5657_v50, %v2903_v25  ;;  %v6909_v53 = vpop.f32.mrb[10].mxu1  ;;  %v5827_v25 = vmax.f32 %v5795_v45, 0.0 }
 0x409   : > { %v6940_v18 = vadd.f32 %v6909_v53, %v6739_v58  ;;  %v5660_v54 = vpop.f32.mrb[11].mxu1  ;;  %v5800_v21 = vadd.f32 %v6938_v6, %v9076_v30 }
 0x40a   : > { %v6941_v46 = vadd.f32 %v5660_v54, %v2906_v5  ;;  %5859 = vxpose.xlu1.b32.cont [4/16] (narrow) %v5825_v17, 8  ;;  %v5798_v40 = vadd.f32 %v6939_v31, %v9076_v30 }
 0x40b   : > { %v5832_v31 = vmax.f32 %v5800_v21, 0.0 }
 0x40c   : > { %v5830_v23 = vmax.f32 %v5798_v40, 0.0  ;;  %v5799_v8 = vadd.f32 %v6941_v46, %v9076_v30 }
 0x40e   : > { %v6912_v4 = vpop.f32.mrb[12].mxu1  ;;  %5860 = vxpose.xlu1.b32.cont [5/16] (narrow) %v5826_v59, 8  ;;  %v5831_v32 = vmax.f32 %v5799_v8, 0.0 }
 0x40f   : > { %v9084_v12 = vadd.f32 %v6912_v4, %v6742_v36  ;;  %v5673_v28 = vpop.f32.mrb[13].mxu1 }
 0x410   : > { %v6943_v0 = vadd.f32 %v5673_v28, %v9035_v51  ;;  %v6913_v26 = vpop.f32.mrb[14].mxu1 }
 0x411   : > { %v9089_v29 = vadd.f32 %v6913_v26, %v9037_v38  ;;  %v5676_v58 = vpop.f32.mrb[15].mxu1 }
 0x412   : > { %v6945_v5 = vadd.f32 %v5676_v58, %v9039_v1  ;;  %5861 = vxpose.xlu1.b32.cont [6/16] (narrow) %v5827_v25, 8  ;;  %v5802_v46 = vadd.f32 %v6943_v0, %v9076_v30 }
 0x414   : > { %v5834_v26 = vmax.f32 %v5802_v46, 0.0 }
 0x416   : > { %v6916_v42 = vpop.f32.mrb[16].mxu1  ;;  %5862 = vxpose.xlu1.b32.cont [7/16] (narrow) %v5828_v55, 8 }
 0x417   : > { %v6946_v36 = vadd.f32 %v6916_v42, %v9041_v22  ;;  %v5689_v7 = vpop.f32.mrb[17].mxu1 }
 0x418   : > { %v6947_v51 = vadd.f32 %v5689_v7, %v9043_v47  ;;  %v6917_v39 = vpop.f32.mrb[18].mxu1 }
 0x419   : > { %v9097_v38 = vadd.f32 %v6946_v36, %v9076_v30  ;;  %v6948_v1 = vadd.f32 %v6917_v39, %v9045_v56  ;;  %v5692_v52 = vpop.f32.mrb[19].mxu1  ;;  %v5805_v39 = vadd.f32 %v9089_v29, %v9076_v30 }
 0x41a   : > { %v6949_v37 = vadd.f32 %v5692_v52, %v9047_v11  ;;  %5863 = vxpose.xlu1.b32.cont [8/16] (narrow) %v5829_v14, 8  ;;  %v9102_v19 = vadd.f32 %v6947_v51, %v9076_v30 }
 0x41b   : > { %v9105_v22 = vadd.f32 %v6948_v1, %v9076_v30 }
 0x41c   : > { %v9108_v47 = vadd.f32 %v6949_v37, %v9076_v30  ;;  %v5838_v14 = vmax.f32 %v9102_v19, 0.0 }
 0x41d   : > { %v5841_v40 = vmax.f32 %v9105_v22, 0.0 }
 0x41e   : > { %v6920_v62 = vpop.f32.mrb[20].mxu1  ;;  %5864 = vxpose.xlu1.b32.cont [9/16] (narrow) %v5830_v23, 8 }
 0x41f   : > { %v6950_v56 = vadd.f32 %v6920_v62, %v9049_v57  ;;  %v5705_v34 = vpop.f32.mrb[21].mxu1 }
 0x420   : > { %v6951_v11 = vadd.f32 %v5705_v34, %v9051_v48  ;;  %v6921_v35 = vpop.f32.mrb[22].mxu1  ;;  %v5801_v48 = vadd.f32 %v6940_v18, %v9076_v30 }
 0x421   : > { %v5812_v13 = vadd.f32 %v6950_v56, %v9076_v30  ;;  %v6952_v9 = vadd.f32 %v6921_v35, %v9053_v15  ;;  %v5708_v16 = vpop.f32.mrb[23].mxu1 }
 0x422   : > { %v5810_v41 = vadd.f32 %v6951_v11, %v9076_v30  ;;  %v6953_v33 = vadd.f32 %v5708_v16, %v9055_v44  ;;  %5865 = vxpose.xlu1.b32.cont [10/16] (narrow) %v5831_v32, 8  ;;  %v5833_v54 = vmax.f32 %v5801_v48, 0.0 }
 0x423   : > { %v5813_v50 = vadd.f32 %v6952_v9, %v9076_v30 }
 0x424   : > { %v5811_v57 = vadd.f32 %v6953_v33, %v9076_v30  ;;  %v5842_v1 = vmax.f32 %v5810_v41, 0.0 }
 0x425   : > { %v5845_v29 = vmax.f32 %v5813_v50, 0.0 }
 0x426   : > { %v6924_v53 = vpop.f32.mrb[24].mxu1  ;;  %5866 = vxpose.xlu1.b32.cont [11/16] (narrow) %v5832_v31, 8  ;;  %v5843_v52 = vmax.f32 %v5811_v57, 0.0 }
 0x427   : > { %v6954_v6 = vadd.f32 %v6924_v53, %v9057_v60  ;;  %v5721_v17 = vpop.f32.mrb[25].mxu1 }
 0x428   : > { %v6955_v15 = vadd.f32 %v5721_v17, %v9059_v2  ;;  %v6925_v49 = vpop.f32.mrb[26].mxu1  ;;  %v5803_v2 = vadd.f32 %v6945_v5, %v9076_v30 }
 0x429   : > { %v5816_v44 = vadd.f32 %v6954_v6, %v9076_v30  ;;  %v6956_v59 = vadd.f32 %v6925_v49, %v9061_v10  ;;  %v5724_v45 = vpop.f32.mrb[27].mxu1 }
 0x42a   : > { %v5814_v4 = vadd.f32 %v6955_v15, %v9076_v30  ;;  %v6957_v18 = vadd.f32 %v5724_v45, %v9063_v3  ;;  %5867 = vxpose.xlu1.b32.cont [12/16] (narrow) %v5833_v54, 8  ;;  %v5835_v55 = vmax.f32 %v5803_v2, 0.0  ;;  %v5804_v3 = vadd.f32 %v9084_v12, %v9076_v30 }
 0x42b   : > { %v5817_v28 = vadd.f32 %v6956_v59, %v9076_v30  ;;  %v5837_v12 = vmax.f32 %v5805_v39, 0.0 }
 0x42c   : > { %v5815_v60 = vadd.f32 %v6957_v18, %v9076_v30  ;;  %v5846_v37 = vmax.f32 %v5814_v4, 0.0 }
 0x42e   : > { %v6928_v25 = vpop.f32.mrb[28].mxu1  ;;  %5868 = vxpose.xlu1.b32.cont [13/16] (narrow) %v5834_v26, 8  ;;  %v5847_v19 = vmax.f32 %v5815_v60, 0.0 }
 0x42f   : > { %v6958_v0 = vadd.f32 %v6928_v25, %v9065_v43  ;;  %v5737_v63 = vpop.f32.mrb[29].mxu1 }
 0x430   : > { %v6959_v10 = vadd.f32 %v5737_v63, %v9067_v61  ;;  %v6929_v58 = vpop.f32.mrb[30].mxu1  ;;  %v5836_v61 = vmax.f32 %v5804_v3, 0.0 }
 0x431   : > { %v5820_v27 = vadd.f32 %v6958_v0, %v9076_v30  ;;  %v6960_v42 = vadd.f32 %v6929_v58, %v9069_v24  ;;  %v5740_v36 = vpop.f32.mrb[31].mxu1  ;;  %v5839_v24 = vmax.f32 %v9108_v47, 0.0  ;;  %v5848_v47 = vmax.f32 %v5816_v44, 0.0 }
 0x432   : > { %v5818_v7 = vadd.f32 %v6959_v10, %v9076_v30  ;;  %v6961_v5 = vadd.f32 %v5740_v36, %v9071_v20  ;;  %5869 = vxpose.xlu1.b32.cont [14/16] (narrow) %v5835_v55, 8  ;;  %v5840_v20 = vmax.f32 %v9097_v38, 0.0  ;;  %v5849_v38 = vmax.f32 %v5817_v28, 0.0 }
 0x433   : > { %v5821_v43 = vadd.f32 %v6960_v42, %v9076_v30  ;;  %v5852_v8 = vmax.f32 %v5820_v27, 0.0 }
 0x434   : > { %v5819_v51 = vadd.f32 %v6961_v5, %v9076_v30  ;;  %v5844_v30 = vmax.f32 %v5812_v13, 0.0  ;;  %v5850_v22 = vmax.f32 %v5818_v7, 0.0 }
 0x435   : > { %v5853_v62 = vmax.f32 %v5821_v43, 0.0 }
 0x436   : > { %5870 = vxpose.xlu1.b32.cont [15/16] (narrow) %v5836_v61, 8  ;;  %v5851_v23 = vmax.f32 %v5819_v51, 0.0 }
 0x43a   : > { %5871 = vxpose.xlu1.b32.end [16/16] (narrow) %v5837_v12, 8 }
 0x43e   : > { %5888 = vxpose.xlu1.b32.start [1/16] (narrow) %v5838_v14, 8 }
 0x442   : > { %5889 = vxpose.xlu1.b32.cont [2/16] (narrow) %v5839_v24, 8 }
 0x446   : > { %5890 = vxpose.xlu1.b32.cont [3/16] (narrow) %v5840_v20, 8 }
 0x44a   : > { %5891 = vxpose.xlu1.b32.cont [4/16] (narrow) %v5841_v40, 8 }
 0x44e   : > { %5892 = vxpose.xlu1.b32.cont [5/16] (narrow) %v5842_v1, 8 }
 0x452   : > { %5893 = vxpose.xlu1.b32.cont [6/16] (narrow) %v5843_v52, 8 }
 0x456   : > { %5894 = vxpose.xlu1.b32.cont [7/16] (narrow) %v5844_v30, 8 }
 0x45a   : > { %5895 = vxpose.xlu1.b32.cont [8/16] (narrow) %v5845_v29, 8 }
 0x45e   : > { %5896 = vxpose.xlu1.b32.cont [9/16] (narrow) %v5846_v37, 8 }
 0x462   : > { %5897 = vxpose.xlu1.b32.cont [10/16] (narrow) %v5847_v19, 8 }
 0x466   : > { %5898 = vxpose.xlu1.b32.cont [11/16] (narrow) %v5848_v47, 8 }
 0x46a   : > { %5899 = vxpose.xlu1.b32.cont [12/16] (narrow) %v5849_v38, 8 }
 0x46e   : > { %5900 = vxpose.xlu1.b32.cont [13/16] (narrow) %v5850_v22, 8 }
 0x472   : > { %5901 = vxpose.xlu1.b32.cont [14/16] (narrow) %v5851_v23, 8 }
 0x476   : > { %5902 = vxpose.xlu1.b32.cont [15/16] (narrow) %v5852_v8, 8 }
 0x47a   : > { %5903 = vxpose.xlu1.b32.end [16/16] (narrow) %v5853_v62, 8 }
 0x47e   : > { %v5872_v56 = vpop.trf.xlu1 }
 0x47f   : > { %v5922_v34 = vrot.slane %v5872_v56, 4 }
 0x481   : > { %5926 = vst [vmem:[%s7357_s27 + $0x10] ss:$-12 sps:$4 sm:$0xff] %v5922_v34  }
 0x4be   : > { %v5904_v11 = vpop.trf.xlu1 }
 0x4bf   : > { %v5923_v35 = vrot.slane %v5904_v11, 4 }
 0x4c1   : > { %5927 = vst [vmem:[%s7357_s27 + $0x18] ss:$-12 sps:$4 sm:$0xff] %v5923_v35  }
 0x4c2 PF: > { %s15_s18 = sadd.s32 1, %s7310_s18  }
 0x4c3   : > { %p12_p4 = scmp.ge.s32.totalorder %s15_s18, 4  }
 0x4c5   :  { %14 = sbr.rel (!%p12_p4) target bundleno = 1 (0x1), region = 73 }

</bundles_post_ra>
